<compile_context>
chip_gen: v7x
topology: tpu7x:2x2x1
jax: 0.10.0
libtpu: 0.0.40
codegen_flags: <defaults>
</compile_context>

<pallas_src>
import functools
import math

import jax
import jax.numpy as jnp
from jax.experimental import pallas as pl
from jax.experimental.pallas import tpu as pltpu

LN_EPS = 1e-5
_F32 = jnp.float32
_BF16 = jnp.bfloat16


# ---------------------------------------------------------------------------
# VMEM-aware tiling helpers
# ---------------------------------------------------------------------------

@functools.lru_cache(maxsize=None)
def _vmem_budget_bytes():
    """Usable VMEM budget: 80% of the chip's capacity (fallback: 64 MiB)."""
    try:
        cap = int(pltpu.get_tpu_info().vmem_capacity_bytes)
    except Exception:
        cap = 64 * 1024 * 1024
    return int(cap * 0.8)


def _pick_row_tile(m, per_row_io_bytes, per_row_scratch_bytes, resident_bytes):
    """Largest row tile whose estimated footprint fits the VMEM budget."""
    budget = _vmem_budget_bytes()
    for t in (1024, 512, 256, 128, 64, 32, 16, 8):
        if m % t:
            continue
        need = (resident_bytes + 2 * t * per_row_io_bytes
                + t * per_row_scratch_bytes)
        if need <= budget:
            return t
    for t in (8, 16, 32, 64, 128, 256, 512, 1024):   # smallest dividing tile
        if m % t == 0:
            return t
    return m                                          # single full block


def _compiler_params(n_axes):
    return pltpu.CompilerParams(
        dimension_semantics=("parallel",) * n_axes,
        vmem_limit_bytes=_vmem_budget_bytes(),
    )


# ---------------------------------------------------------------------------
# Kernel 1: fused LayerNorm -> Linear (ln_1 -> attention in_proj producing QKV)
# ---------------------------------------------------------------------------

def _ln_linear_kernel(x_ref, g_ref, b_ref, w_ref, bias_ref, o_ref, *, eps):
    x = x_ref[...].astype(_F32)
    mu = jnp.mean(x, axis=-1, keepdims=True)
    var = jnp.mean(jnp.square(x - mu), axis=-1, keepdims=True)
    xn = (x - mu) * jax.lax.rsqrt(var + eps) * g_ref[...] + b_ref[...]
    y = (jnp.dot(xn.astype(_BF16), w_ref[...], preferred_element_type=_F32)
         + bias_ref[...])
    o_ref[...] = y.astype(o_ref.dtype)


def ln_linear(x, g, b, w, bias, *, eps=LN_EPS):
    """LayerNorm(x) @ w + bias, emitted in bf16.  x:(M,K) f32, w:(K,N) bf16."""
    M, K = x.shape
    N = w.shape[1]
    resident = 2 * (K * N * 2 + 2 * K * 4 + N * 4)           # double-buffered
    tm = _pick_row_tile(M, per_row_io_bytes=K * 4 + N * 2,
                        per_row_scratch_bytes=(K + N) * 4,
                        resident_bytes=resident)
    return pl.pallas_call(
        functools.partial(_ln_linear_kernel, eps=eps),
        out_shape=jax.ShapeDtypeStruct((M, N), _BF16),
        grid=(M // tm,),
        in_specs=[
            pl.BlockSpec((tm, K), lambda i: (i, 0)),
            pl.BlockSpec((1, K), lambda i: (0, 0)),
            pl.BlockSpec((1, K), lambda i: (0, 0)),
            pl.BlockSpec((K, N), lambda i: (0, 0)),
            pl.BlockSpec((1, N), lambda i: (0, 0)),
        ],
        out_specs=pl.BlockSpec((tm, N), lambda i: (i, 0)),
        compiler_params=_compiler_params(1),
    )(x, g, b, w, bias)


# ---------------------------------------------------------------------------
# Kernel 2: attention (all heads, static in-kernel loop) -> out_proj -> bias
#           -> residual add.  One grid step per batch element; qkv stays
#           resident in VMEM while every head is processed, and the per-head
#           out_proj slice is accumulated in fp32 so the (B,L,D) attention
#           output never round-trips HBM.
# ---------------------------------------------------------------------------

def _attn_outproj_kernel(qkv_ref, mask_ref, w_out_ref, b_out_ref, res_ref, o_ref,
                         *, heads, head_dim, scale):
    L = qkv_ref.shape[1]
    D = heads * head_dim
    qkv = qkv_ref[0]                       # (L, 3D) bf16, resident
    mask = mask_ref[...]                   # (L, L) f32 additive mask
    acc = jnp.zeros((L, D), _F32)
    for h in range(heads):                 # static unroll over heads
        lo = h * head_dim
        hi = lo + head_dim
        # fold 1/sqrt(hd) into q (L x hd) instead of scaling the (L, L) scores
        q = (qkv[:, lo:hi].astype(_F32) * scale).astype(_BF16)
        k = qkv[:, D + lo:D + hi]
        v = qkv[:, 2 * D + lo:2 * D + hi]
        # s[i, j] = q[i, :] . k[j, :]   (contract last dims; no k.T materialized)
        s = jax.lax.dot_general(q, k, (((1,), (1,)), ((), ())),
                                preferred_element_type=_F32)
        s = s + mask
        s = s - jnp.max(s, axis=-1, keepdims=True)
        p = jnp.exp(s)
        p = p * pl.reciprocal(jnp.sum(p, axis=-1, keepdims=True), approx=False)
        o_h = jnp.dot(p.astype(_BF16), v, preferred_element_type=_F32)  # (L, hd)
        # fused out_proj: accumulate o_h @ W_out[h*hd:(h+1)*hd, :]
        w_h = w_out_ref[lo:hi, :]                                       # (hd, D)
        acc = acc + jnp.dot(o_h.astype(_BF16), w_h, preferred_element_type=_F32)
    o_ref[0] = res_ref[0] + acc + b_out_ref[...]


def attention_outproj_residual(qkv, mask, w_out, b_out, residual, heads, scale):
    """residual + out_proj(MHA(qkv)).  qkv:(B,L,3D) bf16, residual:(B,L,D) f32."""
    B, L, three_d = qkv.shape
    D = three_d // 3
    head_dim = D // heads
    # TODO(synk): add flash-style KV tiling (online softmax) once L grows beyond
    # ~1-2K; here the full (L, L) fp32 score matrix per head lives in VMEM.
    return pl.pallas_call(
        functools.partial(_attn_outproj_kernel, heads=heads, head_dim=head_dim,
                          scale=scale),
        out_shape=jax.ShapeDtypeStruct((B, L, D), _F32),
        grid=(B,),
        in_specs=[
            pl.BlockSpec((1, L, 3 * D), lambda b: (b, 0, 0)),
            pl.BlockSpec((L, L), lambda b: (0, 0)),
            pl.BlockSpec((D, D), lambda b: (0, 0)),
            pl.BlockSpec((1, D), lambda b: (0, 0)),
            pl.BlockSpec((1, L, D), lambda b: (b, 0, 0)),
        ],
        out_specs=pl.BlockSpec((1, L, D), lambda b: (b, 0, 0)),
        compiler_params=_compiler_params(1),
    )(qkv, mask, w_out, b_out, residual)


# ---------------------------------------------------------------------------
# Kernel 3: fused ln_2 -> c_fc -> QuickGELU -> c_proj -> residual add
# (the (tm, 4D) hidden activation never leaves VMEM)
# ---------------------------------------------------------------------------

def _ln_mlp_residual_kernel(x_ref, g_ref, b_ref, wfc_ref, bfc_ref,
                            wproj_ref, bproj_ref, o_ref, *, eps):
    x = x_ref[...].astype(_F32)
    mu = jnp.mean(x, axis=-1, keepdims=True)
    var = jnp.mean(jnp.square(x - mu), axis=-1, keepdims=True)
    xn = (x - mu) * jax.lax.rsqrt(var + eps) * g_ref[...] + b_ref[...]
    h = (jnp.dot(xn.astype(_BF16), wfc_ref[...], preferred_element_type=_F32)
         + bfc_ref[...])
    h = h * jax.nn.sigmoid(1.702 * h)        # QuickGELU in fp32 (sigmoid -> EUP)
    o_ref[...] = (x
                  + jnp.dot(h.astype(_BF16), wproj_ref[...],
                            preferred_element_type=_F32)
                  + bproj_ref[...])


def ln_mlp_residual(x, g, b, w_fc, b_fc, w_proj, b_proj, *, eps=LN_EPS):
    M, D = x.shape
    H = w_fc.shape[1]
    # TODO(synk): for very large widths (D >= ~1536) on 64 MiB-VMEM parts, tile
    # the hidden dim H with an extra "arbitrary" grid axis + fp32 accumulator.
    resident = 2 * (D * H * 2 + H * D * 2 + 2 * D * 4 + H * 4 + D * 4)
    tm = _pick_row_tile(M, per_row_io_bytes=2 * D * 4,
                        per_row_scratch_bytes=2 * H * 4 + D * 4,
                        resident_bytes=resident)
    return pl.pallas_call(
        functools.partial(_ln_mlp_residual_kernel, eps=eps),
        out_shape=jax.ShapeDtypeStruct((M, D), _F32),
        grid=(M // tm,),
        in_specs=[
            pl.BlockSpec((tm, D), lambda i: (i, 0)),
            pl.BlockSpec((1, D), lambda i: (0, 0)),
            pl.BlockSpec((1, D), lambda i: (0, 0)),
            pl.BlockSpec((D, H), lambda i: (0, 0)),
            pl.BlockSpec((1, H), lambda i: (0, 0)),
            pl.BlockSpec((H, D), lambda i: (0, 0)),
            pl.BlockSpec((1, D), lambda i: (0, 0)),
        ],
        out_specs=pl.BlockSpec((tm, D), lambda i: (i, 0)),
        compiler_params=_compiler_params(1),
    )(x, g, b, w_fc, b_fc, w_proj, b_proj)


# ---------------------------------------------------------------------------
# ResidualAttentionBlock / Transformer built from the fused kernels
# ---------------------------------------------------------------------------

def residual_block(x2d, p, heads, mask, B, L):
    """x2d: (B*L, D) batch-major fp32 rows -> (B*L, D)."""
    D = x2d.shape[1]
    head_dim = D // heads
    # x + out_proj(attn(ln_1(x)))
    qkv = ln_linear(x2d, p["ln1_g"], p["ln1_b"], p["w_qkv"], p["b_qkv"])
    x3d = attention_outproj_residual(
        qkv.reshape(B, L, 3 * D), mask, p["w_out"], p["b_out"],
        x2d.reshape(B, L, D), heads, 1.0 / math.sqrt(head_dim))
    x2d = x3d.reshape(B * L, D)
    # x + mlp(ln_2(x))
    return ln_mlp_residual(x2d, p["ln2_g"], p["ln2_b"],
                           p["w_fc"], p["b_fc"], p["w_proj"], p["b_proj"])


def transformer_forward(params, x, heads, attn_mask=None):
    """x: (L, N, D) (PyTorch convention) -> (L, N, D)."""
    L, N, D = x.shape
    mask = (attn_mask.astype(_F32) if attn_mask is not None
            else jnp.zeros((L, L), _F32))
    # one layout transpose in / one out; everything in between is lane-dense
    xb = jnp.transpose(x.astype(_F32), (1, 0, 2)).reshape(N * L, D)
    for p in params["blocks"]:
        xb = residual_block(xb, p, heads, mask, N, L)
    return jnp.transpose(xb.reshape(N, L, D), (1, 0, 2))


# ---------------------------------------------------------------------------
# Deterministic parameter init (shapes mirror the PyTorch module; weights are
# stored pre-transposed (K, N) and pre-cast to bf16 -- no .T per forward pass)
# ---------------------------------------------------------------------------

def init_block_params(key, d):
    ks = jax.random.split(key, 4)
    attn_std = d ** -0.5
    fc_std = (2 * d) ** -0.5
    return dict(
        ln1_g=jnp.ones((1, d), _F32), ln1_b=jnp.zeros((1, d), _F32),
        w_qkv=(attn_std * jax.random.normal(ks[0], (d, 3 * d), _F32)).astype(_BF16),
        b_qkv=jnp.zeros((1, 3 * d), _F32),
        w_out=(attn_std * jax.random.normal(ks[1], (d, d), _F32)).astype(_BF16),
        b_out=jnp.zeros((1, d), _F32),
        ln2_g=jnp.ones((1, d), _F32), ln2_b=jnp.zeros((1, d), _F32),
        w_fc=(fc_std * jax.random.normal(ks[2], (d, 4 * d), _F32)).astype(_BF16),
        b_fc=jnp.zeros((1, 4 * d), _F32),
        w_proj=(attn_std * jax.random.normal(ks[3], (4 * d, d), _F32)).astype(_BF16),
        b_proj=jnp.zeros((1, d), _F32),
    )


def init_transformer_params(key, width, layers):
    ks = jax.random.split(key, layers)
    return dict(blocks=[init_block_params(ks[i], width) for i in range(layers)])


# ---------------------------------------------------------------------------
# main
# ---------------------------------------------------------------------------

if __name__ == "__main__":
    width = 256       # d_model
    heads = 2         # head_dim = 128
    layers = 2
    L = 8             # sequence length
    N = 2             # batch

    key = jax.random.PRNGKey(0)
    k_params, k_x = jax.random.split(key)

    params = init_transformer_params(k_params, width, layers)
    x = jax.random.normal(k_x, (L, N, width), _F32)

    # causal additive mask (as used by the CLIP text Transformer)
    attn_mask = jnp.where(jnp.triu(jnp.ones((L, L), bool), 1),
                          -jnp.inf, 0.0).astype(_F32)

    @functools.partial(jax.jit, static_argnames=("heads",))
    def run(params, x, mask, heads):
        return transformer_forward(params, x, heads, mask)

    y = run(params, x, attn_mask, heads)
    jax.block_until_ready(y)

    assert y.shape == (L, N, width)
    assert bool(jnp.all(jnp.isfinite(y)))
    print("KERNEL_OK")
</pallas_src>

<mosaic_0001>
module attributes {stable_mosaic.version = 11 : i64} {
  func.func @_attn_outproj_kernel(%arg0: i32, %arg1: memref<1x8x768xbf16, #tpu.memory_space<vmem>>, %arg2: memref<8x8xf32, #tpu.memory_space<vmem>>, %arg3: memref<256x256xbf16, #tpu.memory_space<vmem>>, %arg4: memref<1x256xf32, #tpu.memory_space<vmem>>, %arg5: memref<1x8x256xf32, #tpu.memory_space<vmem>>, %arg6: memref<1x8x256xf32, #tpu.memory_space<vmem>>) attributes {dimension_semantics = [#tpu.dimension_semantics<parallel>], iteration_bounds = array<i64: 2>, scalar_prefetch = 0 : i64, scratch_operands = 0 : i64, tpu.core_type = #tpu.core_type<tc>, window_params = [{transform_indices = @transform_0, window_bounds = array<i64: 1, 8, 768>}, {pipeline_mode = #tpu.pipeline_mode<synchronous>, transform_indices = @transform_1, window_bounds = array<i64: 8, 8>}, {pipeline_mode = #tpu.pipeline_mode<synchronous>, transform_indices = @transform_2, window_bounds = array<i64: 256, 256>}, {pipeline_mode = #tpu.pipeline_mode<synchronous>, transform_indices = @transform_3, window_bounds = array<i64: 1, 256>}, {transform_indices = @transform_4, window_bounds = array<i64: 1, 8, 256>}, {transform_indices = @transform_5, window_bounds = array<i64: 1, 8, 256>}]} {
    %c0 = arith.constant 0 : index
    %c0_0 = arith.constant 0 : index
    %c0_1 = arith.constant 0 : index
    %0 = vector.load %arg1[%c0, %c0_0, %c0_1] : memref<1x8x768xbf16, #tpu.memory_space<vmem>>, vector<1x8x768xbf16>
    %1 = vector.shape_cast %0 : vector<1x8x768xbf16> to vector<8x768xbf16>
    %c0_2 = arith.constant 0 : index
    %c0_3 = arith.constant 0 : index
    %2 = vector.load %arg2[%c0_2, %c0_3] : memref<8x8xf32, #tpu.memory_space<vmem>>, vector<8x8xf32>
    %cst = arith.constant 0.000000e+00 : f32
    %3 = vector.broadcast %cst : f32 to vector<8x256xf32>
    %4 = vector.extract_strided_slice %1 {offsets = [0, 0], sizes = [8, 128], strides = [1, 1]} : vector<8x768xbf16> to vector<8x128xbf16>
    %5 = arith.extf %4 : vector<8x128xbf16> to vector<8x128xf32>
    %cst_4 = arith.constant 0.0883883461 : f32
    %6 = vector.broadcast %cst_4 : f32 to vector<8x128xf32>
    %7 = arith.mulf %5, %6 : vector<8x128xf32>
    %8 = arith.truncf %7 : vector<8x128xf32> to vector<8x128xbf16>
    %9 = vector.extract_strided_slice %1 {offsets = [0, 256], sizes = [8, 128], strides = [1, 1]} : vector<8x768xbf16> to vector<8x128xbf16>
    %10 = vector.extract_strided_slice %1 {offsets = [0, 512], sizes = [8, 128], strides = [1, 1]} : vector<8x768xbf16> to vector<8x128xbf16>
    %cst_5 = arith.constant dense<0.000000e+00> : vector<8x8xf32>
    %11 = tpu.matmul %8, %9, %cst_5 {dimension_numbers = #tpu.dot_dimension_numbers<[1], [1], [0], [0], [0, 0, 1, 0], [], []>} : vector<8x128xbf16>, vector<8x128xbf16>, vector<8x8xf32> -> vector<8x8xf32>
    %12 = arith.addf %11, %2 : vector<8x8xf32>
    %cst_6 = arith.constant dense<0xFF800000> : vector<8xf32>
    %13 = vector.multi_reduction <maximumf>, %12, %cst_6 [1] : vector<8x8xf32> to vector<8xf32>
    %14 = vector.shape_cast %13 : vector<8xf32> to vector<8x1xf32>
    %15 = vector.broadcast %14 : vector<8x1xf32> to vector<8x8xf32>
    %16 = arith.subf %12, %15 : vector<8x8xf32>
    %17 = math.exp %16 : vector<8x8xf32>
    %cst_7 = arith.constant dense<0.000000e+00> : vector<8xf32>
    %18 = vector.multi_reduction <add>, %17, %cst_7 [1] : vector<8x8xf32> to vector<8xf32>
    %19 = vector.shape_cast %18 : vector<8xf32> to vector<8x1xf32>
    %20 = tpu.reciprocal %19 : vector<8x1xf32> -> vector<8x1xf32>
    %21 = vector.broadcast %20 : vector<8x1xf32> to vector<8x8xf32>
    %22 = arith.mulf %17, %21 : vector<8x8xf32>
    %23 = arith.truncf %22 : vector<8x8xf32> to vector<8x8xbf16>
    %cst_8 = arith.constant dense<0.000000e+00> : vector<8x128xf32>
    %24 = tpu.matmul %23, %10, %cst_8 {dimension_numbers = #tpu.dot_dimension_numbers<[1], [0], [0], [1], [0, 0, 1, 1], [], []>} : vector<8x8xbf16>, vector<8x128xbf16>, vector<8x128xf32> -> vector<8x128xf32>
    %c0_9 = arith.constant 0 : index
    %c0_10 = arith.constant 0 : index
    %25 = vector.load %arg3[%c0_9, %c0_10] : memref<256x256xbf16, #tpu.memory_space<vmem>>, vector<128x256xbf16>
    %26 = arith.truncf %24 : vector<8x128xf32> to vector<8x128xbf16>
    %cst_11 = arith.constant dense<0.000000e+00> : vector<8x256xf32>
    %27 = tpu.matmul %26, %25, %cst_11 {dimension_numbers = #tpu.dot_dimension_numbers<[1], [0], [0], [1], [0, 0, 1, 1], [], []>} : vector<8x128xbf16>, vector<128x256xbf16>, vector<8x256xf32> -> vector<8x256xf32>
    %28 = arith.addf %3, %27 : vector<8x256xf32>
    %29 = vector.extract_strided_slice %1 {offsets = [0, 128], sizes = [8, 128], strides = [1, 1]} : vector<8x768xbf16> to vector<8x128xbf16>
    %30 = arith.extf %29 : vector<8x128xbf16> to vector<8x128xf32>
    %cst_12 = arith.constant 0.0883883461 : f32
    %31 = vector.broadcast %cst_12 : f32 to vector<8x128xf32>
    %32 = arith.mulf %30, %31 : vector<8x128xf32>
    %33 = arith.truncf %32 : vector<8x128xf32> to vector<8x128xbf16>
    %34 = vector.extract_strided_slice %1 {offsets = [0, 384], sizes = [8, 128], strides = [1, 1]} : vector<8x768xbf16> to vector<8x128xbf16>
    %35 = vector.extract_strided_slice %1 {offsets = [0, 640], sizes = [8, 128], strides = [1, 1]} : vector<8x768xbf16> to vector<8x128xbf16>
    %cst_13 = arith.constant dense<0.000000e+00> : vector<8x8xf32>
    %36 = tpu.matmul %33, %34, %cst_13 {dimension_numbers = #tpu.dot_dimension_numbers<[1], [1], [0], [0], [0, 0, 1, 0], [], []>} : vector<8x128xbf16>, vector<8x128xbf16>, vector<8x8xf32> -> vector<8x8xf32>
    %37 = arith.addf %36, %2 : vector<8x8xf32>
    %cst_14 = arith.constant dense<0xFF800000> : vector<8xf32>
    %38 = vector.multi_reduction <maximumf>, %37, %cst_14 [1] : vector<8x8xf32> to vector<8xf32>
    %39 = vector.shape_cast %38 : vector<8xf32> to vector<8x1xf32>
    %40 = vector.broadcast %39 : vector<8x1xf32> to vector<8x8xf32>
    %41 = arith.subf %37, %40 : vector<8x8xf32>
    %42 = math.exp %41 : vector<8x8xf32>
    %cst_15 = arith.constant dense<0.000000e+00> : vector<8xf32>
    %43 = vector.multi_reduction <add>, %42, %cst_15 [1] : vector<8x8xf32> to vector<8xf32>
    %44 = vector.shape_cast %43 : vector<8xf32> to vector<8x1xf32>
    %45 = tpu.reciprocal %44 : vector<8x1xf32> -> vector<8x1xf32>
    %46 = vector.broadcast %45 : vector<8x1xf32> to vector<8x8xf32>
    %47 = arith.mulf %42, %46 : vector<8x8xf32>
    %48 = arith.truncf %47 : vector<8x8xf32> to vector<8x8xbf16>
    %cst_16 = arith.constant dense<0.000000e+00> : vector<8x128xf32>
    %49 = tpu.matmul %48, %35, %cst_16 {dimension_numbers = #tpu.dot_dimension_numbers<[1], [0], [0], [1], [0, 0, 1, 1], [], []>} : vector<8x8xbf16>, vector<8x128xbf16>, vector<8x128xf32> -> vector<8x128xf32>
    %c128 = arith.constant 128 : index
    %c0_17 = arith.constant 0 : index
    %50 = vector.load %arg3[%c128, %c0_17] : memref<256x256xbf16, #tpu.memory_space<vmem>>, vector<128x256xbf16>
    %51 = arith.truncf %49 : vector<8x128xf32> to vector<8x128xbf16>
    %cst_18 = arith.constant dense<0.000000e+00> : vector<8x256xf32>
    %52 = tpu.matmul %51, %50, %cst_18 {dimension_numbers = #tpu.dot_dimension_numbers<[1], [0], [0], [1], [0, 0, 1, 1], [], []>} : vector<8x128xbf16>, vector<128x256xbf16>, vector<8x256xf32> -> vector<8x256xf32>
    %53 = arith.addf %28, %52 : vector<8x256xf32>
    %c0_19 = arith.constant 0 : index
    %c0_20 = arith.constant 0 : index
    %c0_21 = arith.constant 0 : index
    %54 = vector.load %arg5[%c0_19, %c0_20, %c0_21] : memref<1x8x256xf32, #tpu.memory_space<vmem>>, vector<1x8x256xf32>
    %55 = vector.shape_cast %54 : vector<1x8x256xf32> to vector<8x256xf32>
    %56 = arith.addf %55, %53 : vector<8x256xf32>
    %c0_22 = arith.constant 0 : index
    %c0_23 = arith.constant 0 : index
    %57 = vector.load %arg4[%c0_22, %c0_23] : memref<1x256xf32, #tpu.memory_space<vmem>>, vector<1x256xf32>
    %58 = vector.broadcast %57 : vector<1x256xf32> to vector<8x256xf32>
    %59 = arith.addf %56, %58 : vector<8x256xf32>
    %c0_24 = arith.constant 0 : index
    %c0_25 = arith.constant 0 : index
    %c0_26 = arith.constant 0 : index
    %60 = vector.load %arg6[%c0_24, %c0_25, %c0_26] : memref<1x8x256xf32, #tpu.memory_space<vmem>>, vector<1x8x256xf32>
    %61 = vector.shape_cast %60 : vector<1x8x256xf32> to vector<8x256xf32>
    %62 = vector.shape_cast %59 : vector<8x256xf32> to vector<1x8x256xf32>
    tpu.vector_store %arg6[%c0_24, %c0_25, %c0_26], %62 {strides = array<i32>} : memref<1x8x256xf32, #tpu.memory_space<vmem>>, vector<1x8x256xf32>,
    return
  }
  func.func @transform_0(%arg0: i32) -> (i32, i32, i32) {
    %c0_i32 = arith.constant 0 : i32
    %c0_i32_0 = arith.constant 0 : i32
    %c0_i32_1 = arith.constant 0 : i32
    return %arg0, %c0_i32, %c0_i32_0 : i32, i32, i32
  }
  func.func @transform_1(%arg0: i32) -> (i32, i32) {
    %c0_i32 = arith.constant 0 : i32
    %c0_i32_0 = arith.constant 0 : i32
    %c0_i32_1 = arith.constant 0 : i32
    return %c0_i32, %c0_i32_0 : i32, i32
  }
  func.func @transform_2(%arg0: i32) -> (i32, i32) {
    %c0_i32 = arith.constant 0 : i32
    %c0_i32_0 = arith.constant 0 : i32
    %c0_i32_1 = arith.constant 0 : i32
    return %c0_i32, %c0_i32_0 : i32, i32
  }
  func.func @transform_3(%arg0: i32) -> (i32, i32) {
    %c0_i32 = arith.constant 0 : i32
    %c0_i32_0 = arith.constant 0 : i32
    %c0_i32_1 = arith.constant 0 : i32
    return %c0_i32, %c0_i32_0 : i32, i32
  }
  func.func @transform_4(%arg0: i32) -> (i32, i32, i32) {
    %c0_i32 = arith.constant 0 : i32
    %c0_i32_0 = arith.constant 0 : i32
    %c0_i32_1 = arith.constant 0 : i32
    return %arg0, %c0_i32, %c0_i32_0 : i32, i32, i32
  }
  func.func @transform_5(%arg0: i32) -> (i32, i32, i32) {
    %c0_i32 = arith.constant 0 : i32
    %c0_i32_0 = arith.constant 0 : i32
    %c0_i32_1 = arith.constant 0 : i32
    return %arg0, %c0_i32, %c0_i32_0 : i32, i32, i32
  }
}

module attributes {stable_mosaic.version = 11 : i64} {
  func.func @_ln_mlp_residual_kernel(%arg0: i32, %arg1: memref<16x256xf32, #tpu.memory_space<vmem>>, %arg2: memref<1x256xf32, #tpu.memory_space<vmem>>, %arg3: memref<1x256xf32, #tpu.memory_space<vmem>>, %arg4: memref<256x1024xbf16, #tpu.memory_space<vmem>>, %arg5: memref<1x1024xf32, #tpu.memory_space<vmem>>, %arg6: memref<1024x256xbf16, #tpu.memory_space<vmem>>, %arg7: memref<1x256xf32, #tpu.memory_space<vmem>>, %arg8: memref<16x256xf32, #tpu.memory_space<vmem>>) attributes {dimension_semantics = [#tpu.dimension_semantics<parallel>], iteration_bounds = array<i64: 1>, scalar_prefetch = 0 : i64, scratch_operands = 0 : i64, tpu.core_type = #tpu.core_type<tc>, window_params = [{transform_indices = @transform_0, window_bounds = array<i64: 16, 256>}, {pipeline_mode = #tpu.pipeline_mode<synchronous>, transform_indices = @transform_1, window_bounds = array<i64: 1, 256>}, {pipeline_mode = #tpu.pipeline_mode<synchronous>, transform_indices = @transform_2, window_bounds = array<i64: 1, 256>}, {pipeline_mode = #tpu.pipeline_mode<synchronous>, transform_indices = @transform_3, window_bounds = array<i64: 256, 1024>}, {pipeline_mode = #tpu.pipeline_mode<synchronous>, transform_indices = @transform_4, window_bounds = array<i64: 1, 1024>}, {pipeline_mode = #tpu.pipeline_mode<synchronous>, transform_indices = @transform_5, window_bounds = array<i64: 1024, 256>}, {pipeline_mode = #tpu.pipeline_mode<synchronous>, transform_indices = @transform_6, window_bounds = array<i64: 1, 256>}, {transform_indices = @transform_7, window_bounds = array<i64: 16, 256>}]} {
    %c0 = arith.constant 0 : index
    %c0_0 = arith.constant 0 : index
    %0 = vector.load %arg1[%c0, %c0_0] : memref<16x256xf32, #tpu.memory_space<vmem>>, vector<16x256xf32>
    %cst = arith.constant dense<0.000000e+00> : vector<16xf32>
    %1 = vector.multi_reduction <add>, %0, %cst [1] : vector<16x256xf32> to vector<16xf32>
    %2 = vector.shape_cast %1 : vector<16xf32> to vector<16x1xf32>
    %cst_1 = arith.constant 2.560000e+02 : f32
    %3 = vector.broadcast %cst_1 : f32 to vector<16x1xf32>
    %4 = arith.divf %2, %3 : vector<16x1xf32>
    %5 = vector.broadcast %4 : vector<16x1xf32> to vector<16x256xf32>
    %6 = arith.subf %0, %5 : vector<16x256xf32>
    %7 = arith.mulf %6, %6 : vector<16x256xf32>
    %cst_2 = arith.constant dense<0.000000e+00> : vector<16xf32>
    %8 = vector.multi_reduction <add>, %7, %cst_2 [1] : vector<16x256xf32> to vector<16xf32>
    %9 = vector.shape_cast %8 : vector<16xf32> to vector<16x1xf32>
    %cst_3 = arith.constant 2.560000e+02 : f32
    %10 = vector.broadcast %cst_3 : f32 to vector<16x1xf32>
    %11 = arith.divf %9, %10 : vector<16x1xf32>
    %12 = vector.broadcast %4 : vector<16x1xf32> to vector<16x256xf32>
    %13 = arith.subf %0, %12 : vector<16x256xf32>
    %cst_4 = arith.constant 9.99999974E-6 : f32
    %14 = vector.broadcast %cst_4 : f32 to vector<16x1xf32>
    %15 = arith.addf %11, %14 : vector<16x1xf32>
    %16 = math.rsqrt %15 : vector<16x1xf32>
    %17 = vector.broadcast %16 : vector<16x1xf32> to vector<16x256xf32>
    %18 = arith.mulf %13, %17 : vector<16x256xf32>
    %c0_5 = arith.constant 0 : index
    %c0_6 = arith.constant 0 : index
    %19 = vector.load %arg2[%c0_5, %c0_6] : memref<1x256xf32, #tpu.memory_space<vmem>>, vector<1x256xf32>
    %20 = vector.broadcast %19 : vector<1x256xf32> to vector<16x256xf32>
    %21 = arith.mulf %18, %20 : vector<16x256xf32>
    %c0_7 = arith.constant 0 : index
    %c0_8 = arith.constant 0 : index
    %22 = vector.load %arg3[%c0_7, %c0_8] : memref<1x256xf32, #tpu.memory_space<vmem>>, vector<1x256xf32>
    %23 = vector.broadcast %22 : vector<1x256xf32> to vector<16x256xf32>
    %24 = arith.addf %21, %23 : vector<16x256xf32>
    %25 = arith.truncf %24 : vector<16x256xf32> to vector<16x256xbf16>
    %c0_9 = arith.constant 0 : index
    %c0_10 = arith.constant 0 : index
    %26 = vector.load %arg4[%c0_9, %c0_10] : memref<256x1024xbf16, #tpu.memory_space<vmem>>, vector<256x1024xbf16>
    %cst_11 = arith.constant dense<0.000000e+00> : vector<16x1024xf32>
    %27 = tpu.matmul %25, %26, %cst_11 {dimension_numbers = #tpu.dot_dimension_numbers<[1], [0], [0], [1], [0, 0, 1, 1], [], []>} : vector<16x256xbf16>, vector<256x1024xbf16>, vector<16x1024xf32> -> vector<16x1024xf32>
    %c0_12 = arith.constant 0 : index
    %c0_13 = arith.constant 0 : index
    %28 = vector.load %arg5[%c0_12, %c0_13] : memref<1x1024xf32, #tpu.memory_space<vmem>>, vector<1x1024xf32>
    %29 = vector.broadcast %28 : vector<1x1024xf32> to vector<16x1024xf32>
    %30 = arith.addf %27, %29 : vector<16x1024xf32>
    %cst_14 = arith.constant 1.702000e+00 : f32
    %31 = vector.broadcast %cst_14 : f32 to vector<16x1024xf32>
    %32 = arith.mulf %31, %30 : vector<16x1024xf32>
    %33 = arith.negf %32 : vector<16x1024xf32>
    %34 = math.exp %33 : vector<16x1024xf32>
    %cst_15 = arith.constant 1.000000e+00 : f32
    %35 = vector.broadcast %cst_15 : f32 to vector<16x1024xf32>
    %36 = arith.addf %35, %34 : vector<16x1024xf32>
    %37 = arith.divf %35, %36 : vector<16x1024xf32>
    %38 = arith.mulf %30, %37 : vector<16x1024xf32>
    %39 = arith.truncf %38 : vector<16x1024xf32> to vector<16x1024xbf16>
    %c0_16 = arith.constant 0 : index
    %c0_17 = arith.constant 0 : index
    %40 = vector.load %arg6[%c0_16, %c0_17] : memref<1024x256xbf16, #tpu.memory_space<vmem>>, vector<1024x256xbf16>
    %cst_18 = arith.constant dense<0.000000e+00> : vector<16x256xf32>
    %41 = tpu.matmul %39, %40, %cst_18 {dimension_numbers = #tpu.dot_dimension_numbers<[1], [0], [0], [1], [0, 0, 1, 1], [], []>} : vector<16x1024xbf16>, vector<1024x256xbf16>, vector<16x256xf32> -> vector<16x256xf32>
    %42 = arith.addf %0, %41 : vector<16x256xf32>
    %c0_19 = arith.constant 0 : index
    %c0_20 = arith.constant 0 : index
    %43 = vector.load %arg7[%c0_19, %c0_20] : memref<1x256xf32, #tpu.memory_space<vmem>>, vector<1x256xf32>
    %44 = vector.broadcast %43 : vector<1x256xf32> to vector<16x256xf32>
    %45 = arith.addf %42, %44 : vector<16x256xf32>
    %c0_21 = arith.constant 0 : index
    %c0_22 = arith.constant 0 : index
    %46 = vector.load %arg8[%c0_21, %c0_22] : memref<16x256xf32, #tpu.memory_space<vmem>>, vector<16x256xf32>
    tpu.vector_store %arg8[%c0_21, %c0_22], %45 {strides = array<i32>} : memref<16x256xf32, #tpu.memory_space<vmem>>, vector<16x256xf32>,
    return
  }
  func.func @transform_0(%arg0: i32) -> (i32, i32) {
    %c0_i32 = arith.constant 0 : i32
    %c0_i32_0 = arith.constant 0 : i32
    return %arg0, %c0_i32 : i32, i32
  }
  func.func @transform_1(%arg0: i32) -> (i32, i32) {
    %c0_i32 = arith.constant 0 : i32
    %c0_i32_0 = arith.constant 0 : i32
    %c0_i32_1 = arith.constant 0 : i32
    return %c0_i32, %c0_i32_0 : i32, i32
  }
  func.func @transform_2(%arg0: i32) -> (i32, i32) {
    %c0_i32 = arith.constant 0 : i32
    %c0_i32_0 = arith.constant 0 : i32
    %c0_i32_1 = arith.constant 0 : i32
    return %c0_i32, %c0_i32_0 : i32, i32
  }
  func.func @transform_3(%arg0: i32) -> (i32, i32) {
    %c0_i32 = arith.constant 0 : i32
    %c0_i32_0 = arith.constant 0 : i32
    %c0_i32_1 = arith.constant 0 : i32
    return %c0_i32, %c0_i32_0 : i32, i32
  }
  func.func @transform_4(%arg0: i32) -> (i32, i32) {
    %c0_i32 = arith.constant 0 : i32
    %c0_i32_0 = arith.constant 0 : i32
    %c0_i32_1 = arith.constant 0 : i32
    return %c0_i32, %c0_i32_0 : i32, i32
  }
  func.func @transform_5(%arg0: i32) -> (i32, i32) {
    %c0_i32 = arith.constant 0 : i32
    %c0_i32_0 = arith.constant 0 : i32
    %c0_i32_1 = arith.constant 0 : i32
    return %c0_i32, %c0_i32_0 : i32, i32
  }
  func.func @transform_6(%arg0: i32) -> (i32, i32) {
    %c0_i32 = arith.constant 0 : i32
    %c0_i32_0 = arith.constant 0 : i32
    %c0_i32_1 = arith.constant 0 : i32
    return %c0_i32, %c0_i32_0 : i32, i32
  }
  func.func @transform_7(%arg0: i32) -> (i32, i32) {
    %c0_i32 = arith.constant 0 : i32
    %c0_i32_0 = arith.constant 0 : i32
    return %arg0, %c0_i32 : i32, i32
  }
}

module attributes {stable_mosaic.version = 11 : i64} {
  func.func @_ln_linear_kernel(%arg0: i32, %arg1: memref<16x256xf32, #tpu.memory_space<vmem>>, %arg2: memref<1x256xf32, #tpu.memory_space<vmem>>, %arg3: memref<1x256xf32, #tpu.memory_space<vmem>>, %arg4: memref<256x768xbf16, #tpu.memory_space<vmem>>, %arg5: memref<1x768xf32, #tpu.memory_space<vmem>>, %arg6: memref<16x768xbf16, #tpu.memory_space<vmem>>) attributes {dimension_semantics = [#tpu.dimension_semantics<parallel>], iteration_bounds = array<i64: 1>, scalar_prefetch = 0 : i64, scratch_operands = 0 : i64, tpu.core_type = #tpu.core_type<tc>, window_params = [{transform_indices = @transform_0, window_bounds = array<i64: 16, 256>}, {pipeline_mode = #tpu.pipeline_mode<synchronous>, transform_indices = @transform_1, window_bounds = array<i64: 1, 256>}, {pipeline_mode = #tpu.pipeline_mode<synchronous>, transform_indices = @transform_2, window_bounds = array<i64: 1, 256>}, {pipeline_mode = #tpu.pipeline_mode<synchronous>, transform_indices = @transform_3, window_bounds = array<i64: 256, 768>}, {pipeline_mode = #tpu.pipeline_mode<synchronous>, transform_indices = @transform_4, window_bounds = array<i64: 1, 768>}, {transform_indices = @transform_5, window_bounds = array<i64: 16, 768>}]} {
    %c0 = arith.constant 0 : index
    %c0_0 = arith.constant 0 : index
    %0 = vector.load %arg1[%c0, %c0_0] : memref<16x256xf32, #tpu.memory_space<vmem>>, vector<16x256xf32>
    %cst = arith.constant dense<0.000000e+00> : vector<16xf32>
    %1 = vector.multi_reduction <add>, %0, %cst [1] : vector<16x256xf32> to vector<16xf32>
    %2 = vector.shape_cast %1 : vector<16xf32> to vector<16x1xf32>
    %cst_1 = arith.constant 2.560000e+02 : f32
    %3 = vector.broadcast %cst_1 : f32 to vector<16x1xf32>
    %4 = arith.divf %2, %3 : vector<16x1xf32>
    %5 = vector.broadcast %4 : vector<16x1xf32> to vector<16x256xf32>
    %6 = arith.subf %0, %5 : vector<16x256xf32>
    %7 = arith.mulf %6, %6 : vector<16x256xf32>
    %cst_2 = arith.constant dense<0.000000e+00> : vector<16xf32>
    %8 = vector.multi_reduction <add>, %7, %cst_2 [1] : vector<16x256xf32> to vector<16xf32>
    %9 = vector.shape_cast %8 : vector<16xf32> to vector<16x1xf32>
    %cst_3 = arith.constant 2.560000e+02 : f32
    %10 = vector.broadcast %cst_3 : f32 to vector<16x1xf32>
    %11 = arith.divf %9, %10 : vector<16x1xf32>
    %12 = vector.broadcast %4 : vector<16x1xf32> to vector<16x256xf32>
    %13 = arith.subf %0, %12 : vector<16x256xf32>
    %cst_4 = arith.constant 9.99999974E-6 : f32
    %14 = vector.broadcast %cst_4 : f32 to vector<16x1xf32>
    %15 = arith.addf %11, %14 : vector<16x1xf32>
    %16 = math.rsqrt %15 : vector<16x1xf32>
    %17 = vector.broadcast %16 : vector<16x1xf32> to vector<16x256xf32>
    %18 = arith.mulf %13, %17 : vector<16x256xf32>
    %c0_5 = arith.constant 0 : index
    %c0_6 = arith.constant 0 : index
    %19 = vector.load %arg2[%c0_5, %c0_6] : memref<1x256xf32, #tpu.memory_space<vmem>>, vector<1x256xf32>
    %20 = vector.broadcast %19 : vector<1x256xf32> to vector<16x256xf32>
    %21 = arith.mulf %18, %20 : vector<16x256xf32>
    %c0_7 = arith.constant 0 : index
    %c0_8 = arith.constant 0 : index
    %22 = vector.load %arg3[%c0_7, %c0_8] : memref<1x256xf32, #tpu.memory_space<vmem>>, vector<1x256xf32>
    %23 = vector.broadcast %22 : vector<1x256xf32> to vector<16x256xf32>
    %24 = arith.addf %21, %23 : vector<16x256xf32>
    %25 = arith.truncf %24 : vector<16x256xf32> to vector<16x256xbf16>
    %c0_9 = arith.constant 0 : index
    %c0_10 = arith.constant 0 : index
    %26 = vector.load %arg4[%c0_9, %c0_10] : memref<256x768xbf16, #tpu.memory_space<vmem>>, vector<256x768xbf16>
    %cst_11 = arith.constant dense<0.000000e+00> : vector<16x768xf32>
    %27 = tpu.matmul %25, %26, %cst_11 {dimension_numbers = #tpu.dot_dimension_numbers<[1], [0], [0], [1], [0, 0, 1, 1], [], []>} : vector<16x256xbf16>, vector<256x768xbf16>, vector<16x768xf32> -> vector<16x768xf32>
    %c0_12 = arith.constant 0 : index
    %c0_13 = arith.constant 0 : index
    %28 = vector.load %arg5[%c0_12, %c0_13] : memref<1x768xf32, #tpu.memory_space<vmem>>, vector<1x768xf32>
    %29 = vector.broadcast %28 : vector<1x768xf32> to vector<16x768xf32>
    %30 = arith.addf %27, %29 : vector<16x768xf32>
    %31 = arith.truncf %30 : vector<16x768xf32> to vector<16x768xbf16>
    %c0_14 = arith.constant 0 : index
    %c0_15 = arith.constant 0 : index
    %32 = vector.load %arg6[%c0_14, %c0_15] : memref<16x768xbf16, #tpu.memory_space<vmem>>, vector<16x768xbf16>
    tpu.vector_store %arg6[%c0_14, %c0_15], %31 {strides = array<i32>} : memref<16x768xbf16, #tpu.memory_space<vmem>>, vector<16x768xbf16>,
    return
  }
  func.func @transform_0(%arg0: i32) -> (i32, i32) {
    %c0_i32 = arith.constant 0 : i32
    %c0_i32_0 = arith.constant 0 : i32
    return %arg0, %c0_i32 : i32, i32
  }
  func.func @transform_1(%arg0: i32) -> (i32, i32) {
    %c0_i32 = arith.constant 0 : i32
    %c0_i32_0 = arith.constant 0 : i32
    %c0_i32_1 = arith.constant 0 : i32
    return %c0_i32, %c0_i32_0 : i32, i32
  }
  func.func @transform_2(%arg0: i32) -> (i32, i32) {
    %c0_i32 = arith.constant 0 : i32
    %c0_i32_0 = arith.constant 0 : i32
    %c0_i32_1 = arith.constant 0 : i32
    return %c0_i32, %c0_i32_0 : i32, i32
  }
  func.func @transform_3(%arg0: i32) -> (i32, i32) {
    %c0_i32 = arith.constant 0 : i32
    %c0_i32_0 = arith.constant 0 : i32
    %c0_i32_1 = arith.constant 0 : i32
    return %c0_i32, %c0_i32_0 : i32, i32
  }
  func.func @transform_4(%arg0: i32) -> (i32, i32) {
    %c0_i32 = arith.constant 0 : i32
    %c0_i32_0 = arith.constant 0 : i32
    %c0_i32_1 = arith.constant 0 : i32
    return %c0_i32, %c0_i32_0 : i32, i32
  }
  func.func @transform_5(%arg0: i32) -> (i32, i32) {
    %c0_i32 = arith.constant 0 : i32
    %c0_i32_0 = arith.constant 0 : i32
    return %arg0, %c0_i32 : i32, i32
  }
}

module attributes {stable_mosaic.version = 11 : i64} {
  func.func @_ln_linear_kernel(%arg0: i32, %arg1: memref<16x256xf32, #tpu.memory_space<vmem>>, %arg2: memref<1x256xf32, #tpu.memory_space<vmem>>, %arg3: memref<1x256xf32, #tpu.memory_space<vmem>>, %arg4: memref<256x768xbf16, #tpu.memory_space<vmem>>, %arg5: memref<1x768xf32, #tpu.memory_space<vmem>>, %arg6: memref<16x768xbf16, #tpu.memory_space<vmem>>) attributes {dimension_semantics = [#tpu.dimension_semantics<parallel>], iteration_bounds = array<i64: 1>, scalar_prefetch = 0 : i64, scratch_operands = 0 : i64, tpu.core_type = #tpu.core_type<tc>, window_params = [{transform_indices = @transform_0, window_bounds = array<i64: 16, 256>}, {pipeline_mode = #tpu.pipeline_mode<synchronous>, transform_indices = @transform_1, window_bounds = array<i64: 1, 256>}, {pipeline_mode = #tpu.pipeline_mode<synchronous>, transform_indices = @transform_2, window_bounds = array<i64: 1, 256>}, {pipeline_mode = #tpu.pipeline_mode<synchronous>, transform_indices = @transform_3, window_bounds = array<i64: 256, 768>}, {pipeline_mode = #tpu.pipeline_mode<synchronous>, transform_indices = @transform_4, window_bounds = array<i64: 1, 768>}, {transform_indices = @transform_5, window_bounds = array<i64: 16, 768>}]} {
    %c0 = arith.constant 0 : index
    %c0_0 = arith.constant 0 : index
    %0 = vector.load %arg1[%c0, %c0_0] : memref<16x256xf32, #tpu.memory_space<vmem>>, vector<16x256xf32>
    %cst = arith.constant dense<0.000000e+00> : vector<16xf32>
    %1 = vector.multi_reduction <add>, %0, %cst [1] : vector<16x256xf32> to vector<16xf32>
    %2 = vector.shape_cast %1 : vector<16xf32> to vector<16x1xf32>
    %cst_1 = arith.constant 2.560000e+02 : f32
    %3 = vector.broadcast %cst_1 : f32 to vector<16x1xf32>
    %4 = arith.divf %2, %3 : vector<16x1xf32>
    %5 = vector.broadcast %4 : vector<16x1xf32> to vector<16x256xf32>
    %6 = arith.subf %0, %5 : vector<16x256xf32>
    %7 = arith.mulf %6, %6 : vector<16x256xf32>
    %cst_2 = arith.constant dense<0.000000e+00> : vector<16xf32>
    %8 = vector.multi_reduction <add>, %7, %cst_2 [1] : vector<16x256xf32> to vector<16xf32>
    %9 = vector.shape_cast %8 : vector<16xf32> to vector<16x1xf32>
    %cst_3 = arith.constant 2.560000e+02 : f32
    %10 = vector.broadcast %cst_3 : f32 to vector<16x1xf32>
    %11 = arith.divf %9, %10 : vector<16x1xf32>
    %12 = vector.broadcast %4 : vector<16x1xf32> to vector<16x256xf32>
    %13 = arith.subf %0, %12 : vector<16x256xf32>
    %cst_4 = arith.constant 9.99999974E-6 : f32
    %14 = vector.broadcast %cst_4 : f32 to vector<16x1xf32>
    %15 = arith.addf %11, %14 : vector<16x1xf32>
    %16 = math.rsqrt %15 : vector<16x1xf32>
    %17 = vector.broadcast %16 : vector<16x1xf32> to vector<16x256xf32>
    %18 = arith.mulf %13, %17 : vector<16x256xf32>
    %c0_5 = arith.constant 0 : index
    %c0_6 = arith.constant 0 : index
    %19 = vector.load %arg2[%c0_5, %c0_6] : memref<1x256xf32, #tpu.memory_space<vmem>>, vector<1x256xf32>
    %20 = vector.broadcast %19 : vector<1x256xf32> to vector<16x256xf32>
    %21 = arith.mulf %18, %20 : vector<16x256xf32>
    %c0_7 = arith.constant 0 : index
    %c0_8 = arith.constant 0 : index
    %22 = vector.load %arg3[%c0_7, %c0_8] : memref<1x256xf32, #tpu.memory_space<vmem>>, vector<1x256xf32>
    %23 = vector.broadcast %22 : vector<1x256xf32> to vector<16x256xf32>
    %24 = arith.addf %21, %23 : vector<16x256xf32>
    %25 = arith.truncf %24 : vector<16x256xf32> to vector<16x256xbf16>
    %c0_9 = arith.constant 0 : index
    %c0_10 = arith.constant 0 : index
    %26 = vector.load %arg4[%c0_9, %c0_10] : memref<256x768xbf16, #tpu.memory_space<vmem>>, vector<256x768xbf16>
    %cst_11 = arith.constant dense<0.000000e+00> : vector<16x768xf32>
    %27 = tpu.matmul %25, %26, %cst_11 {dimension_numbers = #tpu.dot_dimension_numbers<[1], [0], [0], [1], [0, 0, 1, 1], [], []>} : vector<16x256xbf16>, vector<256x768xbf16>, vector<16x768xf32> -> vector<16x768xf32>
    %c0_12 = arith.constant 0 : index
    %c0_13 = arith.constant 0 : index
    %28 = vector.load %arg5[%c0_12, %c0_13] : memref<1x768xf32, #tpu.memory_space<vmem>>, vector<1x768xf32>
    %29 = vector.broadcast %28 : vector<1x768xf32> to vector<16x768xf32>
    %30 = arith.addf %27, %29 : vector<16x768xf32>
    %31 = arith.truncf %30 : vector<16x768xf32> to vector<16x768xbf16>
    %c0_14 = arith.constant 0 : index
    %c0_15 = arith.constant 0 : index
    %32 = vector.load %arg6[%c0_14, %c0_15] : memref<16x768xbf16, #tpu.memory_space<vmem>>, vector<16x768xbf16>
    tpu.vector_store %arg6[%c0_14, %c0_15], %31 {strides = array<i32>} : memref<16x768xbf16, #tpu.memory_space<vmem>>, vector<16x768xbf16>,
    return
  }
  func.func @transform_0(%arg0: i32) -> (i32, i32) {
    %c0_i32 = arith.constant 0 : i32
    %c0_i32_0 = arith.constant 0 : i32
    return %arg0, %c0_i32 : i32, i32
  }
  func.func @transform_1(%arg0: i32) -> (i32, i32) {
    %c0_i32 = arith.constant 0 : i32
    %c0_i32_0 = arith.constant 0 : i32
    %c0_i32_1 = arith.constant 0 : i32
    return %c0_i32, %c0_i32_0 : i32, i32
  }
  func.func @transform_2(%arg0: i32) -> (i32, i32) {
    %c0_i32 = arith.constant 0 : i32
    %c0_i32_0 = arith.constant 0 : i32
    %c0_i32_1 = arith.constant 0 : i32
    return %c0_i32, %c0_i32_0 : i32, i32
  }
  func.func @transform_3(%arg0: i32) -> (i32, i32) {
    %c0_i32 = arith.constant 0 : i32
    %c0_i32_0 = arith.constant 0 : i32
    %c0_i32_1 = arith.constant 0 : i32
    return %c0_i32, %c0_i32_0 : i32, i32
  }
  func.func @transform_4(%arg0: i32) -> (i32, i32) {
    %c0_i32 = arith.constant 0 : i32
    %c0_i32_0 = arith.constant 0 : i32
    %c0_i32_1 = arith.constant 0 : i32
    return %c0_i32, %c0_i32_0 : i32, i32
  }
  func.func @transform_5(%arg0: i32) -> (i32, i32) {
    %c0_i32 = arith.constant 0 : i32
    %c0_i32_0 = arith.constant 0 : i32
    return %arg0, %c0_i32 : i32, i32
  }
}

module attributes {stable_mosaic.version = 11 : i64} {
  func.func @_attn_outproj_kernel(%arg0: i32, %arg1: memref<1x8x768xbf16, #tpu.memory_space<vmem>>, %arg2: memref<8x8xf32, #tpu.memory_space<vmem>>, %arg3: memref<256x256xbf16, #tpu.memory_space<vmem>>, %arg4: memref<1x256xf32, #tpu.memory_space<vmem>>, %arg5: memref<1x8x256xf32, #tpu.memory_space<vmem>>, %arg6: memref<1x8x256xf32, #tpu.memory_space<vmem>>) attributes {dimension_semantics = [#tpu.dimension_semantics<parallel>], iteration_bounds = array<i64: 2>, scalar_prefetch = 0 : i64, scratch_operands = 0 : i64, tpu.core_type = #tpu.core_type<tc>, window_params = [{transform_indices = @transform_0, window_bounds = array<i64: 1, 8, 768>}, {pipeline_mode = #tpu.pipeline_mode<synchronous>, transform_indices = @transform_1, window_bounds = array<i64: 8, 8>}, {pipeline_mode = #tpu.pipeline_mode<synchronous>, transform_indices = @transform_2, window_bounds = array<i64: 256, 256>}, {pipeline_mode = #tpu.pipeline_mode<synchronous>, transform_indices = @transform_3, window_bounds = array<i64: 1, 256>}, {transform_indices = @transform_4, window_bounds = array<i64: 1, 8, 256>}, {transform_indices = @transform_5, window_bounds = array<i64: 1, 8, 256>}]} {
    %c0 = arith.constant 0 : index
    %c0_0 = arith.constant 0 : index
    %c0_1 = arith.constant 0 : index
    %0 = vector.load %arg1[%c0, %c0_0, %c0_1] : memref<1x8x768xbf16, #tpu.memory_space<vmem>>, vector<1x8x768xbf16>
    %1 = vector.shape_cast %0 : vector<1x8x768xbf16> to vector<8x768xbf16>
    %c0_2 = arith.constant 0 : index
    %c0_3 = arith.constant 0 : index
    %2 = vector.load %arg2[%c0_2, %c0_3] : memref<8x8xf32, #tpu.memory_space<vmem>>, vector<8x8xf32>
    %cst = arith.constant 0.000000e+00 : f32
    %3 = vector.broadcast %cst : f32 to vector<8x256xf32>
    %4 = vector.extract_strided_slice %1 {offsets = [0, 0], sizes = [8, 128], strides = [1, 1]} : vector<8x768xbf16> to vector<8x128xbf16>
    %5 = arith.extf %4 : vector<8x128xbf16> to vector<8x128xf32>
    %cst_4 = arith.constant 0.0883883461 : f32
    %6 = vector.broadcast %cst_4 : f32 to vector<8x128xf32>
    %7 = arith.mulf %5, %6 : vector<8x128xf32>
    %8 = arith.truncf %7 : vector<8x128xf32> to vector<8x128xbf16>
    %9 = vector.extract_strided_slice %1 {offsets = [0, 256], sizes = [8, 128], strides = [1, 1]} : vector<8x768xbf16> to vector<8x128xbf16>
    %10 = vector.extract_strided_slice %1 {offsets = [0, 512], sizes = [8, 128], strides = [1, 1]} : vector<8x768xbf16> to vector<8x128xbf16>
    %cst_5 = arith.constant dense<0.000000e+00> : vector<8x8xf32>
    %11 = tpu.matmul %8, %9, %cst_5 {dimension_numbers = #tpu.dot_dimension_numbers<[1], [1], [0], [0], [0, 0, 1, 0], [], []>} : vector<8x128xbf16>, vector<8x128xbf16>, vector<8x8xf32> -> vector<8x8xf32>
    %12 = arith.addf %11, %2 : vector<8x8xf32>
    %cst_6 = arith.constant dense<0xFF800000> : vector<8xf32>
    %13 = vector.multi_reduction <maximumf>, %12, %cst_6 [1] : vector<8x8xf32> to vector<8xf32>
    %14 = vector.shape_cast %13 : vector<8xf32> to vector<8x1xf32>
    %15 = vector.broadcast %14 : vector<8x1xf32> to vector<8x8xf32>
    %16 = arith.subf %12, %15 : vector<8x8xf32>
    %17 = math.exp %16 : vector<8x8xf32>
    %cst_7 = arith.constant dense<0.000000e+00> : vector<8xf32>
    %18 = vector.multi_reduction <add>, %17, %cst_7 [1] : vector<8x8xf32> to vector<8xf32>
    %19 = vector.shape_cast %18 : vector<8xf32> to vector<8x1xf32>
    %20 = tpu.reciprocal %19 : vector<8x1xf32> -> vector<8x1xf32>
    %21 = vector.broadcast %20 : vector<8x1xf32> to vector<8x8xf32>
    %22 = arith.mulf %17, %21 : vector<8x8xf32>
    %23 = arith.truncf %22 : vector<8x8xf32> to vector<8x8xbf16>
    %cst_8 = arith.constant dense<0.000000e+00> : vector<8x128xf32>
    %24 = tpu.matmul %23, %10, %cst_8 {dimension_numbers = #tpu.dot_dimension_numbers<[1], [0], [0], [1], [0, 0, 1, 1], [], []>} : vector<8x8xbf16>, vector<8x128xbf16>, vector<8x128xf32> -> vector<8x128xf32>
    %c0_9 = arith.constant 0 : index
    %c0_10 = arith.constant 0 : index
    %25 = vector.load %arg3[%c0_9, %c0_10] : memref<256x256xbf16, #tpu.memory_space<vmem>>, vector<128x256xbf16>
    %26 = arith.truncf %24 : vector<8x128xf32> to vector<8x128xbf16>
    %cst_11 = arith.constant dense<0.000000e+00> : vector<8x256xf32>
    %27 = tpu.matmul %26, %25, %cst_11 {dimension_numbers = #tpu.dot_dimension_numbers<[1], [0], [0], [1], [0, 0, 1, 1], [], []>} : vector<8x128xbf16>, vector<128x256xbf16>, vector<8x256xf32> -> vector<8x256xf32>
    %28 = arith.addf %3, %27 : vector<8x256xf32>
    %29 = vector.extract_strided_slice %1 {offsets = [0, 128], sizes = [8, 128], strides = [1, 1]} : vector<8x768xbf16> to vector<8x128xbf16>
    %30 = arith.extf %29 : vector<8x128xbf16> to vector<8x128xf32>
    %cst_12 = arith.constant 0.0883883461 : f32
    %31 = vector.broadcast %cst_12 : f32 to vector<8x128xf32>
    %32 = arith.mulf %30, %31 : vector<8x128xf32>
    %33 = arith.truncf %32 : vector<8x128xf32> to vector<8x128xbf16>
    %34 = vector.extract_strided_slice %1 {offsets = [0, 384], sizes = [8, 128], strides = [1, 1]} : vector<8x768xbf16> to vector<8x128xbf16>
    %35 = vector.extract_strided_slice %1 {offsets = [0, 640], sizes = [8, 128], strides = [1, 1]} : vector<8x768xbf16> to vector<8x128xbf16>
    %cst_13 = arith.constant dense<0.000000e+00> : vector<8x8xf32>
    %36 = tpu.matmul %33, %34, %cst_13 {dimension_numbers = #tpu.dot_dimension_numbers<[1], [1], [0], [0], [0, 0, 1, 0], [], []>} : vector<8x128xbf16>, vector<8x128xbf16>, vector<8x8xf32> -> vector<8x8xf32>
    %37 = arith.addf %36, %2 : vector<8x8xf32>
    %cst_14 = arith.constant dense<0xFF800000> : vector<8xf32>
    %38 = vector.multi_reduction <maximumf>, %37, %cst_14 [1] : vector<8x8xf32> to vector<8xf32>
    %39 = vector.shape_cast %38 : vector<8xf32> to vector<8x1xf32>
    %40 = vector.broadcast %39 : vector<8x1xf32> to vector<8x8xf32>
    %41 = arith.subf %37, %40 : vector<8x8xf32>
    %42 = math.exp %41 : vector<8x8xf32>
    %cst_15 = arith.constant dense<0.000000e+00> : vector<8xf32>
    %43 = vector.multi_reduction <add>, %42, %cst_15 [1] : vector<8x8xf32> to vector<8xf32>
    %44 = vector.shape_cast %43 : vector<8xf32> to vector<8x1xf32>
    %45 = tpu.reciprocal %44 : vector<8x1xf32> -> vector<8x1xf32>
    %46 = vector.broadcast %45 : vector<8x1xf32> to vector<8x8xf32>
    %47 = arith.mulf %42, %46 : vector<8x8xf32>
    %48 = arith.truncf %47 : vector<8x8xf32> to vector<8x8xbf16>
    %cst_16 = arith.constant dense<0.000000e+00> : vector<8x128xf32>
    %49 = tpu.matmul %48, %35, %cst_16 {dimension_numbers = #tpu.dot_dimension_numbers<[1], [0], [0], [1], [0, 0, 1, 1], [], []>} : vector<8x8xbf16>, vector<8x128xbf16>, vector<8x128xf32> -> vector<8x128xf32>
    %c128 = arith.constant 128 : index
    %c0_17 = arith.constant 0 : index
    %50 = vector.load %arg3[%c128, %c0_17] : memref<256x256xbf16, #tpu.memory_space<vmem>>, vector<128x256xbf16>
    %51 = arith.truncf %49 : vector<8x128xf32> to vector<8x128xbf16>
    %cst_18 = arith.constant dense<0.000000e+00> : vector<8x256xf32>
    %52 = tpu.matmul %51, %50, %cst_18 {dimension_numbers = #tpu.dot_dimension_numbers<[1], [0], [0], [1], [0, 0, 1, 1], [], []>} : vector<8x128xbf16>, vector<128x256xbf16>, vector<8x256xf32> -> vector<8x256xf32>
    %53 = arith.addf %28, %52 : vector<8x256xf32>
    %c0_19 = arith.constant 0 : index
    %c0_20 = arith.constant 0 : index
    %c0_21 = arith.constant 0 : index
    %54 = vector.load %arg5[%c0_19, %c0_20, %c0_21] : memref<1x8x256xf32, #tpu.memory_space<vmem>>, vector<1x8x256xf32>
    %55 = vector.shape_cast %54 : vector<1x8x256xf32> to vector<8x256xf32>
    %56 = arith.addf %55, %53 : vector<8x256xf32>
    %c0_22 = arith.constant 0 : index
    %c0_23 = arith.constant 0 : index
    %57 = vector.load %arg4[%c0_22, %c0_23] : memref<1x256xf32, #tpu.memory_space<vmem>>, vector<1x256xf32>
    %58 = vector.broadcast %57 : vector<1x256xf32> to vector<8x256xf32>
    %59 = arith.addf %56, %58 : vector<8x256xf32>
    %c0_24 = arith.constant 0 : index
    %c0_25 = arith.constant 0 : index
    %c0_26 = arith.constant 0 : index
    %60 = vector.load %arg6[%c0_24, %c0_25, %c0_26] : memref<1x8x256xf32, #tpu.memory_space<vmem>>, vector<1x8x256xf32>
    %61 = vector.shape_cast %60 : vector<1x8x256xf32> to vector<8x256xf32>
    %62 = vector.shape_cast %59 : vector<8x256xf32> to vector<1x8x256xf32>
    tpu.vector_store %arg6[%c0_24, %c0_25, %c0_26], %62 {strides = array<i32>} : memref<1x8x256xf32, #tpu.memory_space<vmem>>, vector<1x8x256xf32>,
    return
  }
  func.func @transform_0(%arg0: i32) -> (i32, i32, i32) {
    %c0_i32 = arith.constant 0 : i32
    %c0_i32_0 = arith.constant 0 : i32
    %c0_i32_1 = arith.constant 0 : i32
    return %arg0, %c0_i32, %c0_i32_0 : i32, i32, i32
  }
  func.func @transform_1(%arg0: i32) -> (i32, i32) {
    %c0_i32 = arith.constant 0 : i32
    %c0_i32_0 = arith.constant 0 : i32
    %c0_i32_1 = arith.constant 0 : i32
    return %c0_i32, %c0_i32_0 : i32, i32
  }
  func.func @transform_2(%arg0: i32) -> (i32, i32) {
    %c0_i32 = arith.constant 0 : i32
    %c0_i32_0 = arith.constant 0 : i32
    %c0_i32_1 = arith.constant 0 : i32
    return %c0_i32, %c0_i32_0 : i32, i32
  }
  func.func @transform_3(%arg0: i32) -> (i32, i32) {
    %c0_i32 = arith.constant 0 : i32
    %c0_i32_0 = arith.constant 0 : i32
    %c0_i32_1 = arith.constant 0 : i32
    return %c0_i32, %c0_i32_0 : i32, i32
  }
  func.func @transform_4(%arg0: i32) -> (i32, i32, i32) {
    %c0_i32 = arith.constant 0 : i32
    %c0_i32_0 = arith.constant 0 : i32
    %c0_i32_1 = arith.constant 0 : i32
    return %arg0, %c0_i32, %c0_i32_0 : i32, i32, i32
  }
  func.func @transform_5(%arg0: i32) -> (i32, i32, i32) {
    %c0_i32 = arith.constant 0 : i32
    %c0_i32_0 = arith.constant 0 : i32
    %c0_i32_1 = arith.constant 0 : i32
    return %arg0, %c0_i32, %c0_i32_0 : i32, i32, i32
  }
}

module attributes {stable_mosaic.version = 11 : i64} {
  func.func @_ln_mlp_residual_kernel(%arg0: i32, %arg1: memref<16x256xf32, #tpu.memory_space<vmem>>, %arg2: memref<1x256xf32, #tpu.memory_space<vmem>>, %arg3: memref<1x256xf32, #tpu.memory_space<vmem>>, %arg4: memref<256x1024xbf16, #tpu.memory_space<vmem>>, %arg5: memref<1x1024xf32, #tpu.memory_space<vmem>>, %arg6: memref<1024x256xbf16, #tpu.memory_space<vmem>>, %arg7: memref<1x256xf32, #tpu.memory_space<vmem>>, %arg8: memref<16x256xf32, #tpu.memory_space<vmem>>) attributes {dimension_semantics = [#tpu.dimension_semantics<parallel>], iteration_bounds = array<i64: 1>, scalar_prefetch = 0 : i64, scratch_operands = 0 : i64, tpu.core_type = #tpu.core_type<tc>, window_params = [{transform_indices = @transform_0, window_bounds = array<i64: 16, 256>}, {pipeline_mode = #tpu.pipeline_mode<synchronous>, transform_indices = @transform_1, window_bounds = array<i64: 1, 256>}, {pipeline_mode = #tpu.pipeline_mode<synchronous>, transform_indices = @transform_2, window_bounds = array<i64: 1, 256>}, {pipeline_mode = #tpu.pipeline_mode<synchronous>, transform_indices = @transform_3, window_bounds = array<i64: 256, 1024>}, {pipeline_mode = #tpu.pipeline_mode<synchronous>, transform_indices = @transform_4, window_bounds = array<i64: 1, 1024>}, {pipeline_mode = #tpu.pipeline_mode<synchronous>, transform_indices = @transform_5, window_bounds = array<i64: 1024, 256>}, {pipeline_mode = #tpu.pipeline_mode<synchronous>, transform_indices = @transform_6, window_bounds = array<i64: 1, 256>}, {transform_indices = @transform_7, window_bounds = array<i64: 16, 256>}]} {
    %c0 = arith.constant 0 : index
    %c0_0 = arith.constant 0 : index
    %0 = vector.load %arg1[%c0, %c0_0] : memref<16x256xf32, #tpu.memory_space<vmem>>, vector<16x256xf32>
    %cst = arith.constant dense<0.000000e+00> : vector<16xf32>
    %1 = vector.multi_reduction <add>, %0, %cst [1] : vector<16x256xf32> to vector<16xf32>
    %2 = vector.shape_cast %1 : vector<16xf32> to vector<16x1xf32>
    %cst_1 = arith.constant 2.560000e+02 : f32
    %3 = vector.broadcast %cst_1 : f32 to vector<16x1xf32>
    %4 = arith.divf %2, %3 : vector<16x1xf32>
    %5 = vector.broadcast %4 : vector<16x1xf32> to vector<16x256xf32>
    %6 = arith.subf %0, %5 : vector<16x256xf32>
    %7 = arith.mulf %6, %6 : vector<16x256xf32>
    %cst_2 = arith.constant dense<0.000000e+00> : vector<16xf32>
    %8 = vector.multi_reduction <add>, %7, %cst_2 [1] : vector<16x256xf32> to vector<16xf32>
    %9 = vector.shape_cast %8 : vector<16xf32> to vector<16x1xf32>
    %cst_3 = arith.constant 2.560000e+02 : f32
    %10 = vector.broadcast %cst_3 : f32 to vector<16x1xf32>
    %11 = arith.divf %9, %10 : vector<16x1xf32>
    %12 = vector.broadcast %4 : vector<16x1xf32> to vector<16x256xf32>
    %13 = arith.subf %0, %12 : vector<16x256xf32>
    %cst_4 = arith.constant 9.99999974E-6 : f32
    %14 = vector.broadcast %cst_4 : f32 to vector<16x1xf32>
    %15 = arith.addf %11, %14 : vector<16x1xf32>
    %16 = math.rsqrt %15 : vector<16x1xf32>
    %17 = vector.broadcast %16 : vector<16x1xf32> to vector<16x256xf32>
    %18 = arith.mulf %13, %17 : vector<16x256xf32>
    %c0_5 = arith.constant 0 : index
    %c0_6 = arith.constant 0 : index
    %19 = vector.load %arg2[%c0_5, %c0_6] : memref<1x256xf32, #tpu.memory_space<vmem>>, vector<1x256xf32>
    %20 = vector.broadcast %19 : vector<1x256xf32> to vector<16x256xf32>
    %21 = arith.mulf %18, %20 : vector<16x256xf32>
    %c0_7 = arith.constant 0 : index
    %c0_8 = arith.constant 0 : index
    %22 = vector.load %arg3[%c0_7, %c0_8] : memref<1x256xf32, #tpu.memory_space<vmem>>, vector<1x256xf32>
    %23 = vector.broadcast %22 : vector<1x256xf32> to vector<16x256xf32>
    %24 = arith.addf %21, %23 : vector<16x256xf32>
    %25 = arith.truncf %24 : vector<16x256xf32> to vector<16x256xbf16>
    %c0_9 = arith.constant 0 : index
    %c0_10 = arith.constant 0 : index
    %26 = vector.load %arg4[%c0_9, %c0_10] : memref<256x1024xbf16, #tpu.memory_space<vmem>>, vector<256x1024xbf16>
    %cst_11 = arith.constant dense<0.000000e+00> : vector<16x1024xf32>
    %27 = tpu.matmul %25, %26, %cst_11 {dimension_numbers = #tpu.dot_dimension_numbers<[1], [0], [0], [1], [0, 0, 1, 1], [], []>} : vector<16x256xbf16>, vector<256x1024xbf16>, vector<16x1024xf32> -> vector<16x1024xf32>
    %c0_12 = arith.constant 0 : index
    %c0_13 = arith.constant 0 : index
    %28 = vector.load %arg5[%c0_12, %c0_13] : memref<1x1024xf32, #tpu.memory_space<vmem>>, vector<1x1024xf32>
    %29 = vector.broadcast %28 : vector<1x1024xf32> to vector<16x1024xf32>
    %30 = arith.addf %27, %29 : vector<16x1024xf32>
    %cst_14 = arith.constant 1.702000e+00 : f32
    %31 = vector.broadcast %cst_14 : f32 to vector<16x1024xf32>
    %32 = arith.mulf %31, %30 : vector<16x1024xf32>
    %33 = arith.negf %32 : vector<16x1024xf32>
    %34 = math.exp %33 : vector<16x1024xf32>
    %cst_15 = arith.constant 1.000000e+00 : f32
    %35 = vector.broadcast %cst_15 : f32 to vector<16x1024xf32>
    %36 = arith.addf %35, %34 : vector<16x1024xf32>
    %37 = arith.divf %35, %36 : vector<16x1024xf32>
    %38 = arith.mulf %30, %37 : vector<16x1024xf32>
    %39 = arith.truncf %38 : vector<16x1024xf32> to vector<16x1024xbf16>
    %c0_16 = arith.constant 0 : index
    %c0_17 = arith.constant 0 : index
    %40 = vector.load %arg6[%c0_16, %c0_17] : memref<1024x256xbf16, #tpu.memory_space<vmem>>, vector<1024x256xbf16>
    %cst_18 = arith.constant dense<0.000000e+00> : vector<16x256xf32>
    %41 = tpu.matmul %39, %40, %cst_18 {dimension_numbers = #tpu.dot_dimension_numbers<[1], [0], [0], [1], [0, 0, 1, 1], [], []>} : vector<16x1024xbf16>, vector<1024x256xbf16>, vector<16x256xf32> -> vector<16x256xf32>
    %42 = arith.addf %0, %41 : vector<16x256xf32>
    %c0_19 = arith.constant 0 : index
    %c0_20 = arith.constant 0 : index
    %43 = vector.load %arg7[%c0_19, %c0_20] : memref<1x256xf32, #tpu.memory_space<vmem>>, vector<1x256xf32>
    %44 = vector.broadcast %43 : vector<1x256xf32> to vector<16x256xf32>
    %45 = arith.addf %42, %44 : vector<16x256xf32>
    %c0_21 = arith.constant 0 : index
    %c0_22 = arith.constant 0 : index
    %46 = vector.load %arg8[%c0_21, %c0_22] : memref<16x256xf32, #tpu.memory_space<vmem>>, vector<16x256xf32>
    tpu.vector_store %arg8[%c0_21, %c0_22], %45 {strides = array<i32>} : memref<16x256xf32, #tpu.memory_space<vmem>>, vector<16x256xf32>,
    return
  }
  func.func @transform_0(%arg0: i32) -> (i32, i32) {
    %c0_i32 = arith.constant 0 : i32
    %c0_i32_0 = arith.constant 0 : i32
    return %arg0, %c0_i32 : i32, i32
  }
  func.func @transform_1(%arg0: i32) -> (i32, i32) {
    %c0_i32 = arith.constant 0 : i32
    %c0_i32_0 = arith.constant 0 : i32
    %c0_i32_1 = arith.constant 0 : i32
    return %c0_i32, %c0_i32_0 : i32, i32
  }
  func.func @transform_2(%arg0: i32) -> (i32, i32) {
    %c0_i32 = arith.constant 0 : i32
    %c0_i32_0 = arith.constant 0 : i32
    %c0_i32_1 = arith.constant 0 : i32
    return %c0_i32, %c0_i32_0 : i32, i32
  }
  func.func @transform_3(%arg0: i32) -> (i32, i32) {
    %c0_i32 = arith.constant 0 : i32
    %c0_i32_0 = arith.constant 0 : i32
    %c0_i32_1 = arith.constant 0 : i32
    return %c0_i32, %c0_i32_0 : i32, i32
  }
  func.func @transform_4(%arg0: i32) -> (i32, i32) {
    %c0_i32 = arith.constant 0 : i32
    %c0_i32_0 = arith.constant 0 : i32
    %c0_i32_1 = arith.constant 0 : i32
    return %c0_i32, %c0_i32_0 : i32, i32
  }
  func.func @transform_5(%arg0: i32) -> (i32, i32) {
    %c0_i32 = arith.constant 0 : i32
    %c0_i32_0 = arith.constant 0 : i32
    %c0_i32_1 = arith.constant 0 : i32
    return %c0_i32, %c0_i32_0 : i32, i32
  }
  func.func @transform_6(%arg0: i32) -> (i32, i32) {
    %c0_i32 = arith.constant 0 : i32
    %c0_i32_0 = arith.constant 0 : i32
    %c0_i32_1 = arith.constant 0 : i32
    return %c0_i32, %c0_i32_0 : i32, i32
  }
  func.func @transform_7(%arg0: i32) -> (i32, i32) {
    %c0_i32 = arith.constant 0 : i32
    %c0_i32_0 = arith.constant 0 : i32
    return %arg0, %c0_i32 : i32, i32
  }
}

</mosaic_0001>

<bundles_post_ra>
// kernel: run.7
= control target key start
LH: loop header
LB: loop body
LE: loop exit
PB: predicated region body
PF: predicated region fallthrough
CT: control target
= control target key end

     0   :  { %10 = vsyncpa [#allocation3], 0  ;;  %s1091_s18 = smov 0   ;;  %s1267_s0 = inlined_call_operand.vmem [shape: bf16[2,8,768], index: 0, kind: input, shape index: {}]   ;;  %s1268_s1 = inlined_call_operand.vmem [shape: f32[8,8], index: 1, kind: input, shape index: {}]   ;;  %s1269_s2 = inlined_call_operand.vmem [shape: bf16[256,256], index: 2, kind: input, shape index: {}]   ;;  %s1270_s3 = inlined_call_operand.hbm [shape: f32[1,256], index: 3, kind: input, shape index: {}]   ;;  %s1271_s4 = inlined_call_operand.vmem [shape: f32[2,8,256], index: 4, kind: input, shape index: {}]   ;;  %s1272_s5 = inlined_call_operand.vmem [shape: f32[2,8,256], index: 5, kind: output, shape index: {}]  }
   0x1 LB: > { %s1097_s19 = sadd.s32 4294967295, %s1055_s18   ;;  %p854_p0 = scmp.ge.s32.totalorder %s1055_s18, 1  ;;  %s1055_s18 = sphi %s1091_s18, %s16_s18  }
   0x2   : > { %p162_p1 = scmp.lt.s32.totalorder %s1055_s18, 3  ;;  %p1273_p3 = scmp.eq.s32.totalorder %s1097_s19, 0 }
   0x3   : > { %s1057_s21 = smov [#allocation2]   ;;  %s1017_s26 = scalar_lea.hbm %s1270_s3, 32 }
   0x4   : > { %p1101_p2 = pnand %p854_p0, %p162_p1  ;;  %s181_s22 = sshll.u32 %s1057_s21, 4  ;;  %s182_s22 = int_to_ptr.vmem [resolvable:$true] %s181_s22 }
   0x5   : > { %p1018_p6 = scmp.ne.s32.totalorder %s1270_s3, %s1017_s26  ;;  %p1024_p10 = scmp.lt.u32.totalorder %s1017_s26, %s1270_s3 }
   0x6   : > { %s1275_s20 = scalar_select %p1101_p2, 1, 0 }
   0x7   : > { %p941_p4 = pneg %p1101_p2 }
   0x9   : > { %p1110_p5 = pnand %p1273_p3, %p941_p4 }
   0xb   : > { %p1019_p7 = pneg %p1110_p5 }
   0xd   : > { %p1020_p8 = pnand %p1019_p7, %p1018_p6 }
   0xf   : > { %p1021_p9 = pneg %p1020_p8 }
  0x11   : > { %p1026_p11 = pnand %p1024_p10, %p1021_p9 }
  0x13   : > { %1029 = shalt.err (!%p1026_p11)
}
  0x14   : > { %s1030_s6 = scalar_lea.vmem %s182_s22, 32  ;;  %p1038_p1 = scmp.lt.s32.totalorder %s182_s22, %s182_s22 }
  0x15   : > { %p1031_p12 = scmp.ne.s32.totalorder %s182_s22, %s1030_s6  ;;  %p1039_p4 = scmp.lt.s32.totalorder %s1030_s6, %s1030_s6 }
  0x17   : > { %p1033_p13 = pnand %p1031_p12, %p1019_p7  ;;  %p1040_p3 = por %p1039_p4, %p1038_p1 }
  0x19   : > { %p1034_p0 = pneg %p1033_p13 }
  0x1b   : > { %p1041_p2 = pnand %p1040_p3, %p1034_p0 }
  0x1d   : > { %1044 = shalt.err (!%p1041_p2)
}
  0x1e   : > { %944 = dma.hbm_to_vmem [thread:$0]  (!%p1110_p5), %s1270_s3, 32, %s182_s22, [#allocation3]  }
  0x1f   : > { %p1277_p6 = scmp.ne.s32.totalorder %s1275_s20, 0 }
  0x20   : > { %p1278_p8 = scmp.eq.s32.totalorder (!%p1277_p6), %s1097_s19, 0 }
  0x21   : > { %210 = sbr.rel (%p1277_p6) target bundleno = 1557 (0x615), region = 40 }
  0x28   : > { %1050 = dma.done.wait (%p1278_p8), [#allocation3], 32   ;;  %p1279_p7 = pmov %p1278_p8 }
  0x29   : > { %p243_p9 = scmp.lt.s32.totalorder %s1097_s19, 1  ;;  %v1058_v0 = vmov 0.0   ;;  %vm1059_vm0 = vmmov 0   ;;  %v262_v6 = vld [vmem:[%s1268_s1] sm:$0xff]  ;;  %vm306_vm1 = vcmask 64512   ;;  %vm322_vm2 = vcmask 1043456  }
  0x2a   : > { %1052 = vsyncadd (%p1279_p7), [#allocation3], 4294967264  ;;  %912 = vmatprep.subr.bf16.mxu0 %v1058_v0  ;;  %914 = vmatprep.mubr.msk.bf16.mxu0 %vm1059_vm0, %v1058_v0  ;;  %v963_v46 = vld [vmem:[%s1269_s2 + $0x4] ss:$8 sps:$4 sm:$0xff]   ;;  %v1060_v47 = vmov 0  }
  0x2b   : > { %s1281_s19 = smov (!%p243_p9, %s1097_s19), 1  ;;  %918 = vmatprep.subr.bf16.mxu1 %v1058_v0  ;;  %920 = vmatprep.mubr.msk.bf16.mxu1 %vm1059_vm0, %v1058_v0  ;;  %v985_v48 = vld [vmem:[%s1269_s2 + $0x80] ss:$8 sps:$4 sm:$0xff]   ;;  %v987_v49 = vld [vmem:[%s1269_s2 + $0x84] ss:$8 sps:$4 sm:$0xff]  }
  0x2c   : > { %s936_s9 = smul.u32 24, %s1281_s19  ;;  %v990_v50 = vld [vmem:[%s1269_s2 + $0x94] ss:$8 sps:$4 sm:$0xff]   ;;  %v988_v51 = vld [vmem:[%s1269_s2 + $0x90] ss:$8 sps:$4 sm:$0xff]   ;;  %s902_s10 = sshll.u32 %s1281_s19, 4 }
  0x2d   : > { %v993_v52 = vld [vmem:[%s1269_s2 + $0xa4] ss:$8 sps:$4 sm:$0xff]   ;;  %v991_v53 = vld [vmem:[%s1269_s2 + $0xa0] ss:$8 sps:$4 sm:$0xff]   ;;  %v996_v54 = vld [vmem:[%s1269_s2 + $0xb4] ss:$8 sps:$4 sm:$0xff]   ;;  %s252_s13 = scalar_lea.vmem %s1271_s4, %s902_s10  ;;  %s257_s15 = scalar_lea.vmem %s1272_s5, %s902_s10 }
  0x2e   : > { %s247_s12 = scalar_lea.vmem %s1267_s0, %s936_s9  ;;  %v994_v55 = vld [vmem:[%s1269_s2 + $0xb0] ss:$8 sps:$4 sm:$0xff]   ;;  %v999_v56 = vld [vmem:[%s1269_s2 + $0xc4] ss:$8 sps:$4 sm:$0xff]   ;;  %v997_v57 = vld [vmem:[%s1269_s2 + $0xc0] ss:$8 sps:$4 sm:$0xff]  }
  0x2f   : > { %v259_v1 = vld [vmem:[%s247_s12] sm:$0xff]  ;;  %v260_v2 = vld [vmem:[%s247_s12 + $0x8] sm:$0xff]  ;;  %v261_v18 = vld [vmem:[%s247_s12 + $0x10] sm:$0xff] }
  0x30   : > { %913 = vmatpush3.bf16.xpose.msra.mxu0 %v260_v2  ;;  %v263_v3 = vunpack.c.l.bf16 %v259_v1  ;;  %v324_v19 = vsel %vm322_vm2, %v261_v18, 0  ;;  %v866_v20 = vcombine.high %v261_v18, %v261_v18  ;;  %v384_v23 = vrot.slane %v259_v1, 4  ;;  %v1002_v58 = vld [vmem:[%s1269_s2 + $0xd4] ss:$8 sps:$4 sm:$0xff]   ;;  %v1000_v59 = vld [vmem:[%s1269_s2 + $0xd0] ss:$8 sps:$4 sm:$0xff]  }
  0x31   : > { %930 = vmatprep.subr.bf16.mxu0 %v1058_v0  ;;  %919 = vmatpush3.bf16.msra.mxu1 %v324_v19  ;;  %v865_v27 = vcombine.high %v260_v2, %v260_v2  ;;  %v1005_v60 = vld [vmem:[%s1269_s2 + $0xe4] ss:$8 sps:$4 sm:$0xff]   ;;  %v1003_v61 = vld [vmem:[%s1269_s2 + $0xe0] ss:$8 sps:$4 sm:$0xff]   ;;  %v1008_v62 = vld [vmem:[%s1269_s2 + $0xf4] ss:$8 sps:$4 sm:$0xff]  }
  0x32   : > { %v264_v4 = vmul.f32 0.088388346, %v263_v3  ;;  %v452_v21 = vsel %vm322_vm2, %v866_v20, 0  ;;  %924 = vmatprep.subr.bf16.mxu1 %v1058_v0  ;;  %v386_v25 = vunpack.c.l.bf16 %v384_v23  ;;  %v1006_v63 = vld [vmem:[%s1269_s2 + $0xf0] ss:$8 sps:$4 sm:$0xff]  }
  0x33   : > { %v961_v3 = vld [vmem:[%s1269_s2] ss:$8 sps:$4 sm:$0xff]   ;;  %v982_v18 = vld [vmem:[%s1269_s2 + $0x70] ss:$8 sps:$4 sm:$0xff]  }
  0x34   : > { %v265_v5 = vpack.c.bf16 %v264_v4, %v264_v4  ;;  %v387_v29 = vmul.f32 0.088388346, %v386_v25 }
  0x36   : > { %v388_v30 = vpack.c.bf16 %v387_v29, %v387_v29  ;;  %v759_v29 = vlaneseq }
  0x37   : > { %915 = vmatmul.mubr.bf16.vlgmr.msra.gmra.mrb[0].mxu0 %v265_v5  ;;  %v966_v5 = vld [vmem:[%s1269_s2 + $0x14] ss:$8 sps:$4 sm:$0xff]  }
  0x38   : > { %932 = vmatprep.mubr.msk.bf16.mxu0 %vm1059_vm0, %v1058_v0  ;;  %931 = vmatpush3.bf16.msra.mxu0 %v452_v21 }
  0x39   : > { %712 = vmatprep.subr.bf16.mxu0 %v963_v46 }
 0x10a   : > { %v300_v7 = vpop.f32.mrb[0].mxu0 }
 0x10b   : > { %v301_v8 = vadd.f32 %v300_v7, %v262_v6  ;;  %v916_v9 = vpop.f32.mrb[1].mxu0  ;;  %v969_v7 = vld [vmem:[%s1269_s2 + $0x24] ss:$8 sps:$4 sm:$0xff]  }
 0x10c   : > { %v303_v10 = vpop.f32.mrb[2].mxu0  ;;  %v972_v9 = vld [vmem:[%s1269_s2 + $0x34] ss:$8 sps:$4 sm:$0xff]  }
 0x10d   : > { %v917_v11 = vpop.f32.mrb[3].mxu0  ;;  %v307_v12 = vsel %vm306_vm1, %v301_v8, -inf  ;;  %v970_v10 = vld [vmem:[%s1269_s2 + $0x30] ss:$8 sps:$4 sm:$0xff]  }
 0x10e   : > { %308 = vmax.xlane.f32.xlu0 %v307_v12  ;;  %v975_v11 = vld [vmem:[%s1269_s2 + $0x44] ss:$8 sps:$4 sm:$0xff]   ;;  %v973_v12 = vld [vmem:[%s1269_s2 + $0x40] ss:$8 sps:$4 sm:$0xff]  }
 0x19b   : > { %v309_v13 = vpop.xlane.xlu0 %308 }
 0x19c   : > { %v310_v14 = vsub.f32 %v301_v8, %v309_v13  ;;  %v967_v8 = vld [vmem:[%s1269_s2 + $0x20] ss:$8 sps:$4 sm:$0xff]   ;;  %v978_v13 = vld [vmem:[%s1269_s2 + $0x54] ss:$8 sps:$4 sm:$0xff]  }
 0x19e   : > { %v311_v15 = vmul.f32 1.442695, %v310_v14  ;;  %v976_v14 = vld [vmem:[%s1269_s2 + $0x50] ss:$8 sps:$4 sm:$0xff]  }
 0x1a0   : > { %1009 = vpow2.f32 %v311_v15  ;;  %v981_v15 = vld [vmem:[%s1269_s2 + $0x64] ss:$8 sps:$4 sm:$0xff]  }
 0x1aa   : > { %v1010_v16 = vpop.eup %1009 }
 0x1ab   : > { %v313_v17 = vsel %vm306_vm1, %v1010_v16, 0.0 }
 0x1ac   : > { %314 = vadd.xlane.f32.xlu0 %v313_v17  ;;  %v984_v17 = vld [vmem:[%s1269_s2 + $0x74] ss:$8 sps:$4 sm:$0xff]  }
 0x239   : > { %v315_v22 = vpop.xlane.xlu0 %314 }
 0x23a   : > { %1011 = vrcp.f32 %v315_v22 }
 0x244   : > { %v1012_v24 = vpop.eup %1011 }
 0x245   : > { %v317_v26 = vmul.f32 %v1012_v24, %v1010_v16  ;;  %v979_v16 = vld [vmem:[%s1269_s2 + $0x60] ss:$8 sps:$4 sm:$0xff]  }
 0x247   : > { %v318_v28 = vpack.c.bf16 %v317_v26, %v317_v26 }
 0x249   : > { %921 = vmatmul.mubr.msk.bf16.vlgmr.msra.gmra.mrb[0].mxu1 %vm306_vm1, %v318_v28 }
 0x24a   : > { %925 = vmatpush3.bf16.xpose.msra.mxu1 %v865_v27  ;;  %926 = vmatprep.mubr.msk.bf16.mxu1 %vm1059_vm0, %v1058_v0 }
 0x24b   : > { %591 = vmatprep.subr.bf16.mxu1 %v987_v49 }
 0x251   : > { %927 = vmatmul.mubr.bf16.vlgmr.msra.gmra.mrb[4].mxu1 %v388_v30  ;;  %v760_v30 = vshrl.u32 %v759_v29, 7 }
 0x252   : > { %623 = vmatprep.mubr.bf16.mxu1 %v1060_v47  ;;  %592 = vmatpush1.bf16.msra.mxu1 %v985_v48 }
 0x253   : > { %593 = vmatprep.subr.bf16.mxu1 %v990_v50 }
 0x256   : > { %594 = vmatpush1.bf16.msra.mxu1 %v988_v51 }
 0x257   : > { %595 = vmatprep.subr.bf16.mxu1 %v993_v52 }
 0x25a   : > { %596 = vmatpush1.bf16.msra.mxu1 %v991_v53 }
 0x25b   : > { %597 = vmatprep.subr.bf16.mxu1 %v996_v54 }
 0x25e   : > { %598 = vmatpush1.bf16.msra.mxu1 %v994_v55 }
 0x25f   : > { %599 = vmatprep.subr.bf16.mxu1 %v999_v56 }
 0x262   : > { %600 = vmatpush1.bf16.msra.mxu1 %v997_v57 }
 0x263   : > { %601 = vmatprep.subr.bf16.mxu1 %v1002_v58 }
 0x266   : > { %602 = vmatpush1.bf16.msra.mxu1 %v1000_v59 }
 0x267   : > { %603 = vmatprep.subr.bf16.mxu1 %v1005_v60 }
 0x26a   : > { %604 = vmatpush1.bf16.msra.mxu1 %v1003_v61 }
 0x26b   : > { %605 = vmatprep.subr.bf16.mxu1 %v1008_v62 }
 0x26e   : > { %606 = vmatpush1.bf16.msra.mxu1 %v1006_v63 }
 0x31c   : > { %v1154_v31 = vpop.f32.mrb[0].mxu1 }
 0x31d   : > { %v922_v32 = vpop.f32.mrb[1].mxu1  ;;  %v382_v19 = vpack.c.bf16 %v1154_v31, %v1154_v31  ;;  %v757_v31 = vld [vmem:[#allocation2] sm:$0x3] }
 0x31e   : > { %v363_v33 = vpop.f32.mrb[2].mxu1  ;;  %v761_v32 = vsub.s32 0, %v760_v30 }
 0x31f   : > { %v923_v34 = vpop.f32.mrb[3].mxu1  ;;  %v765_v33 = vsub.s32 1, %v760_v30 }
 0x324   : > { %v427_v35 = vpop.f32.mrb[4].mxu1 }
 0x325   : > { %v428_v36 = vadd.f32 %v427_v35, %v262_v6  ;;  %v928_v37 = vpop.f32.mrb[5].mxu1  ;;  %v964_v6 = vld [vmem:[%s1269_s2 + $0x10] ss:$8 sps:$4 sm:$0xff]   ;;  %v753_v35 = vld [vmem:[%s252_s13] sm:$0xff] }
 0x326   : > { %v430_v38 = vpop.f32.mrb[6].mxu1  ;;  %v762_v37 = vrot.slane %v757_v31, %v761_v32 }
 0x327   : > { %v929_v39 = vpop.f32.mrb[7].mxu1  ;;  %v433_v40 = vsel %vm306_vm1, %v428_v36, -inf }
 0x328   : > { %434 = vmax.xlane.f32.xlu1 %v433_v40  ;;  %v754_v39 = vld [vmem:[%s252_s13 + $0x8] sm:$0xff] }
 0x3b5   : > { %v435_v41 = vpop.xlane.xlu1 %434 }
 0x3b6   : > { %v436_v42 = vsub.f32 %v428_v36, %v435_v41  ;;  %v766_v41 = vrot.slane %v757_v31, %v765_v33 }
 0x3b8   : > { %v437_v43 = vmul.f32 1.442695, %v436_v42 }
 0x3ba   : > { %1013 = vpow2.f32 %v437_v43 }
 0x3c4   : > { %v1014_v44 = vpop.eup %1013 }
 0x3c5   : > { %v439_v45 = vsel %vm306_vm1, %v1014_v44, 0.0 }
 0x3c6   : > { %440 = vadd.xlane.f32.xlu1 %v439_v45 }
 0x453   : > { %v441_v0 = vpop.xlane.xlu1 %440 }
 0x454   : > { %1015 = vrcp.f32 %v441_v0 }
 0x45e   : > { %v1016_v1 = vpop.eup %1015 }
 0x45f   : > { %v443_v2 = vmul.f32 %v1016_v1, %v1014_v44 }
 0x461   : > { %v444_v4 = vpack.c.bf16 %v443_v2, %v443_v2 }
 0x463   : > { %933 = vmatmul.mubr.msk.bf16.vlgmr.msra.gmra.mrb[4].mxu0 %vm306_vm1, %v444_v4 }
 0x464   : > { %713 = vmatpush1.bf16.msra.mxu0 %v961_v3  ;;  %744 = vmatprep.mubr.bf16.mxu0 %v1060_v47 }
 0x465   : > { %714 = vmatprep.subr.bf16.mxu0 %v966_v5 }
 0x468   : > { %715 = vmatpush1.bf16.msra.mxu0 %v964_v6 }
 0x469   : > { %716 = vmatprep.subr.bf16.mxu0 %v969_v7 }
 0x46c   : > { %717 = vmatpush1.bf16.msra.mxu0 %v967_v8 }
 0x46d   : > { %718 = vmatprep.subr.bf16.mxu0 %v972_v9 }
 0x470   : > { %719 = vmatpush1.bf16.msra.mxu0 %v970_v10 }
 0x471   : > { %720 = vmatprep.subr.bf16.mxu0 %v975_v11 }
 0x474   : > { %721 = vmatpush1.bf16.msra.mxu0 %v973_v12 }
 0x475   : > { %722 = vmatprep.subr.bf16.mxu0 %v978_v13 }
 0x478   : > { %723 = vmatpush1.bf16.msra.mxu0 %v976_v14 }
 0x479   : > { %724 = vmatprep.subr.bf16.mxu0 %v981_v15 }
 0x47c   : > { %725 = vmatpush1.bf16.msra.mxu0 %v979_v16 }
 0x47d   : > { %726 = vmatprep.subr.bf16.mxu0 %v984_v17 }
 0x480   : > { %727 = vmatpush1.bf16.msra.mxu0 %v982_v18 }
 0x483   : > { %745 = vmatmul.mubr.bf16.vlgmr.msra.gmra.mrb[8].mxu0 %v382_v19 }
 0x536   : > { %v488_v20 = vpop.f32.mrb[4].mxu0 }
 0x537   : > { %v510_v21 = vpack.c.bf16 %v488_v20, %v488_v20  ;;  %v934_v22 = vpop.f32.mrb[5].mxu0 }
 0x538   : > { %v491_v23 = vpop.f32.mrb[6].mxu0 }
 0x539   : > { %v935_v24 = vpop.f32.mrb[7].mxu0  ;;  %624 = vmatmul.mubr.bf16.vlgmr.msra.gmra.mrb[8].mxu1 %v510_v21 }
 0x556   : > { %v746_v25 = vpop.f32.mrb[8].mxu0 }
 0x557   : > { %v748_v26 = vpop.f32.mrb[9].mxu0 }
 0x558   : > { %v750_v27 = vpop.f32.mrb[10].mxu0 }
 0x559   : > { %v751_v28 = vpop.f32.mrb[11].mxu0 }
 0x60c   : > { %v625_v34 = vpop.f32.mrb[8].mxu1 }
 0x60d   : > { %v747_v36 = vadd.f32 %v746_v25, %v625_v34  ;;  %v627_v38 = vpop.f32.mrb[9].mxu1 }
 0x60e   : > { %v749_v40 = vadd.f32 %v748_v26, %v627_v38  ;;  %v629_v42 = vpop.f32.mrb[10].mxu1 }
 0x60f   : > { %v755_v43 = vadd.f32 %v753_v35, %v747_v36  ;;  %v630_v44 = vpop.f32.mrb[11].mxu1 }
 0x610   : > { %v756_v45 = vadd.f32 %v754_v39, %v749_v40 }
 0x611   : > { %v769_v46 = vadd.f32 %v762_v37, %v755_v43 }
 0x612   : > { %v770_v47 = vadd.f32 %v766_v41, %v756_v45 }
 0x613   : > { %771 = vst [vmem:[%s257_s15] sm:$0xff] %v769_v46 }
 0x614   : > { %772 = vst [vmem:[%s257_s15 + $0x8] sm:$0xff] %v770_v47 }
 0x615 PF: > { %s16_s18 = sadd.s32 1, %s1055_s18  }
 0x616   : > { %p13_p2 = scmp.ge.s32.totalorder %s16_s18, 4  }
 0x618   :  { %15 = sbr.rel (!%p13_p2) target bundleno = 1 (0x1), region = 78 }
 0x61f   :  { %794 = vsyncpa [#allocation3], 1 }
 0x620   :  { %796 = vsyncpa [#allocation3 + $0x1], 1 }

// kernel: run.9
= control target key start
LH: loop header
LB: loop body
LE: loop exit
PB: predicated region body
PF: predicated region fallthrough
CT: control target
= control target key end

     0   :  { %s1546_s0 = inlined_call_operand.vmem [shape: f32[16,256], index: 0, kind: input, shape index: {}]   ;;  %s1547_s3 = inlined_call_operand.vmem [shape: bf16[256,768], index: 3, kind: input, shape index: {}]   ;;  %s1548_s1 = inlined_call_operand.vmem [shape: f32[1,256], index: 1, kind: input, shape index: {}]   ;;  %s1549_s2 = inlined_call_operand.vmem [shape: f32[1,256], index: 2, kind: input, shape index: {}]   ;;  %s1550_s4 = inlined_call_operand.vmem [shape: f32[1,768], index: 4, kind: input, shape index: {}]   ;;  %s1551_s5 = inlined_call_operand.vmem [shape: bf16[16,768], index: 5, kind: output, shape index: {}]  }
   0x1   :  { %v1163_v0 = vld [vmem:[%s1546_s0] sm:$0xff]  ;;  %v1168_v1 = vld [vmem:[%s1546_s0 + $0x8] sm:$0xff]  ;;  %v1173_v2 = vld [vmem:[%s1546_s0 + $0x10] sm:$0xff] }
   0x2   :  { %v24_v3 = vadd.f32 %v1168_v1, %v1163_v0  ;;  %v1180_v4 = vld [vmem:[%s1546_s0 + $0x18] sm:$0xff]  ;;  %v985_v8 = vld [vmem:[%s1547_s3 + $0xc] ss:$24 sps:$4 sm:$0xff]   ;;  %v987_v9 = vld [vmem:[%s1547_s3 + $0x8] ss:$24 sps:$4 sm:$0xff]  }
   0x3   :  { %v27_v5 = vadd.f32 %v1180_v4, %v1173_v2  ;;  %v982_v6 = vld [vmem:[%s1547_s3 + $0x4] ss:$24 sps:$4 sm:$0xff]   ;;  %v984_v7 = vld [vmem:[%s1547_s3] ss:$24 sps:$4 sm:$0xff]   ;;  %v988_v10 = vld [vmem:[%s1547_s3 + $0x34] ss:$24 sps:$4 sm:$0xff]   ;;  %742 = vmatprep.subr.bf16.mxu1 %v985_v8 }
   0x4   :  { %25 = vadd.xlane.f32.xlu0 %v24_v3  ;;  %699 = vmatprep.subr.bf16.mxu0 %v982_v6  ;;  %v990_v11 = vld [vmem:[%s1547_s3 + $0x30] ss:$24 sps:$4 sm:$0xff]   ;;  %v991_v12 = vld [vmem:[%s1547_s3 + $0x3c] ss:$24 sps:$4 sm:$0xff]   ;;  %v996_v15 = vld [vmem:[%s1547_s3 + $0x60] ss:$24 sps:$4 sm:$0xff]  }
   0x5   :  { %700 = vmatpush1.bf16.msra.mxu0 %v984_v7  ;;  %743 = vmatpush1.bf16.msra.mxu1 %v987_v9  ;;  %v993_v13 = vld [vmem:[%s1547_s3 + $0x38] ss:$24 sps:$4 sm:$0xff]   ;;  %v994_v14 = vld [vmem:[%s1547_s3 + $0x64] ss:$24 sps:$4 sm:$0xff]   ;;  %v1000_v17 = vld [vmem:[%s1547_s3 + $0x94] ss:$24 sps:$4 sm:$0xff]  }
   0x6   :  { %701 = vmatprep.subr.bf16.mxu0 %v988_v10  ;;  %744 = vmatprep.subr.bf16.mxu1 %v991_v12  ;;  %v997_v16 = vld [vmem:[%s1547_s3 + $0x6c] ss:$24 sps:$4 sm:$0xff]   ;;  %v999_v18 = vld [vmem:[%s1547_s3 + $0x68] ss:$24 sps:$4 sm:$0xff]   ;;  %v1003_v19 = vld [vmem:[%s1547_s3 + $0x9c] ss:$24 sps:$4 sm:$0xff]  }
   0x7   :  { %v1002_v20 = vld [vmem:[%s1547_s3 + $0x90] ss:$24 sps:$4 sm:$0xff]   ;;  %v1006_v21 = vld [vmem:[%s1547_s3 + $0xc4] ss:$24 sps:$4 sm:$0xff]   ;;  %v1008_v24 = vld [vmem:[%s1547_s3 + $0xc0] ss:$24 sps:$4 sm:$0xff]  }
   0x8   :  { %28 = vadd.xlane.f32.xlu0 %v27_v5  ;;  %v1005_v22 = vld [vmem:[%s1547_s3 + $0x98] ss:$24 sps:$4 sm:$0xff]   ;;  %v1009_v23 = vld [vmem:[%s1547_s3 + $0xcc] ss:$24 sps:$4 sm:$0xff]   ;;  %v1011_v26 = vld [vmem:[%s1547_s3 + $0xc8] ss:$24 sps:$4 sm:$0xff]  }
   0x9   :  { %702 = vmatpush1.bf16.msra.mxu0 %v990_v11  ;;  %745 = vmatpush1.bf16.msra.mxu1 %v993_v13  ;;  %v1012_v25 = vld [vmem:[%s1547_s3 + $0xf4] ss:$24 sps:$4 sm:$0xff]   ;;  %v1014_v28 = vld [vmem:[%s1547_s3 + $0xf0] ss:$24 sps:$4 sm:$0xff]   ;;  %v1018_v29 = vld [vmem:[%s1547_s3 + $0x124] ss:$24 sps:$4 sm:$0xff]  }
   0xa   :  { %703 = vmatprep.subr.bf16.mxu0 %v994_v14  ;;  %746 = vmatprep.subr.bf16.mxu1 %v997_v16  ;;  %v1015_v27 = vld [vmem:[%s1547_s3 + $0xfc] ss:$24 sps:$4 sm:$0xff]   ;;  %v1017_v30 = vld [vmem:[%s1547_s3 + $0xf8] ss:$24 sps:$4 sm:$0xff]   ;;  %v1021_v32 = vld [vmem:[%s1547_s3 + $0x12c] ss:$24 sps:$4 sm:$0xff]  }
   0xb   :  { %v1020_v31 = vld [vmem:[%s1547_s3 + $0x120] ss:$24 sps:$4 sm:$0xff]   ;;  %v1024_v34 = vld [vmem:[%s1547_s3 + $0x154] ss:$24 sps:$4 sm:$0xff]   ;;  %v1026_v36 = vld [vmem:[%s1547_s3 + $0x150] ss:$24 sps:$4 sm:$0xff]  }
   0xc   :  { %v1023_v33 = vld [vmem:[%s1547_s3 + $0x128] ss:$24 sps:$4 sm:$0xff]   ;;  %v1027_v35 = vld [vmem:[%s1547_s3 + $0x15c] ss:$24 sps:$4 sm:$0xff]   ;;  %v1029_v38 = vld [vmem:[%s1547_s3 + $0x158] ss:$24 sps:$4 sm:$0xff]  }
   0xd   :  { %704 = vmatpush1.bf16.msra.mxu0 %v996_v15  ;;  %747 = vmatpush1.bf16.msra.mxu1 %v999_v18  ;;  %v1030_v37 = vld [vmem:[%s1547_s3 + $0x184] ss:$24 sps:$4 sm:$0xff]   ;;  %v1032_v40 = vld [vmem:[%s1547_s3 + $0x180] ss:$24 sps:$4 sm:$0xff]   ;;  %v1036_v41 = vld [vmem:[%s1547_s3 + $0x1b4] ss:$24 sps:$4 sm:$0xff]  }
   0xe   :  { %705 = vmatprep.subr.bf16.mxu0 %v1000_v17  ;;  %748 = vmatprep.subr.bf16.mxu1 %v1003_v19  ;;  %v1033_v39 = vld [vmem:[%s1547_s3 + $0x18c] ss:$24 sps:$4 sm:$0xff]   ;;  %v1035_v42 = vld [vmem:[%s1547_s3 + $0x188] ss:$24 sps:$4 sm:$0xff]   ;;  %v1039_v58 = vld [vmem:[%s1547_s3 + $0x1bc] ss:$24 sps:$4 sm:$0xff]  }
   0xf   :  { %v1038_v57 = vld [vmem:[%s1547_s3 + $0x1b0] ss:$24 sps:$4 sm:$0xff]   ;;  %v1042_v60 = vld [vmem:[%s1547_s3 + $0x1e4] ss:$24 sps:$4 sm:$0xff]   ;;  %v1044_v61 = vld [vmem:[%s1547_s3 + $0x1e0] ss:$24 sps:$4 sm:$0xff]  }
  0x10   :  { %v1041_v59 = vld [vmem:[%s1547_s3 + $0x1b8] ss:$24 sps:$4 sm:$0xff]   ;;  %v1045_v62 = vld [vmem:[%s1547_s3 + $0x1ec] ss:$24 sps:$4 sm:$0xff]   ;;  %v1047_v63 = vld [vmem:[%s1547_s3 + $0x1e8] ss:$24 sps:$4 sm:$0xff]  }
  0x11   :  { %706 = vmatpush1.bf16.msra.mxu0 %v1002_v20  ;;  %749 = vmatpush1.bf16.msra.mxu1 %v1005_v22  ;;  %v1053_v3 = vld [vmem:[%s1547_s3 + $0x218] ss:$24 sps:$4 sm:$0xff]   ;;  %v1057_v6 = vld [vmem:[%s1547_s3 + $0x24c] ss:$24 sps:$4 sm:$0xff]   ;;  %v1059_v7 = vld [vmem:[%s1547_s3 + $0x248] ss:$24 sps:$4 sm:$0xff]  }
  0x12   :  { %707 = vmatprep.subr.bf16.mxu0 %v1006_v21  ;;  %750 = vmatprep.subr.bf16.mxu1 %v1009_v23  ;;  %v1056_v5 = vld [vmem:[%s1547_s3 + $0x240] ss:$24 sps:$4 sm:$0xff]   ;;  %v1060_v8 = vld [vmem:[%s1547_s3 + $0x274] ss:$24 sps:$4 sm:$0xff]   ;;  %v1062_v10 = vld [vmem:[%s1547_s3 + $0x270] ss:$24 sps:$4 sm:$0xff]  }
  0x13   :  { %v1063_v9 = vld [vmem:[%s1547_s3 + $0x27c] ss:$24 sps:$4 sm:$0xff]   ;;  %v1065_v11 = vld [vmem:[%s1547_s3 + $0x278] ss:$24 sps:$4 sm:$0xff]   ;;  %v1069_v13 = vld [vmem:[%s1547_s3 + $0x2ac] ss:$24 sps:$4 sm:$0xff]  }
  0x14   :  { %v1066_v12 = vld [vmem:[%s1547_s3 + $0x2a4] ss:$24 sps:$4 sm:$0xff]   ;;  %v1068_v14 = vld [vmem:[%s1547_s3 + $0x2a0] ss:$24 sps:$4 sm:$0xff]   ;;  %v1072_v16 = vld [vmem:[%s1547_s3 + $0x2d4] ss:$24 sps:$4 sm:$0xff]  }
  0x15   :  { %708 = vmatpush1.bf16.msra.mxu0 %v1008_v24  ;;  %751 = vmatpush1.bf16.msra.mxu1 %v1011_v26  ;;  %v1071_v15 = vld [vmem:[%s1547_s3 + $0x2a8] ss:$24 sps:$4 sm:$0xff]   ;;  %v1075_v17 = vld [vmem:[%s1547_s3 + $0x2dc] ss:$24 sps:$4 sm:$0xff]   ;;  %v1077_v19 = vld [vmem:[%s1547_s3 + $0x2d8] ss:$24 sps:$4 sm:$0xff]  }
  0x16   :  { %709 = vmatprep.subr.bf16.mxu0 %v1012_v25  ;;  %752 = vmatprep.subr.bf16.mxu1 %v1015_v27  ;;  %v1074_v18 = vld [vmem:[%s1547_s3 + $0x2d0] ss:$24 sps:$4 sm:$0xff]   ;;  %v1080_v20 = vld [vmem:[%s1547_s3 + $0x14] ss:$24 sps:$4 sm:$0xff]   ;;  %v59_v25 = vlaneseq }
  0x19   :  { %710 = vmatpush1.bf16.msra.mxu0 %v1014_v28  ;;  %753 = vmatpush1.bf16.msra.mxu1 %v1017_v30  ;;  %v1399_v28 = vshrl.u32 %v59_v25, 7 }
  0x1a   :  { %711 = vmatprep.subr.bf16.mxu0 %v1018_v29  ;;  %754 = vmatprep.subr.bf16.mxu1 %v1021_v32 }
  0x1b   :  { %v1402_v29 = vsub.s32 1, %v1399_v28  ;;  %v1405_v30 = vsub.s32 0, %v1399_v28 }
  0x1d   :  { %712 = vmatpush1.bf16.msra.mxu0 %v1020_v31  ;;  %755 = vmatpush1.bf16.msra.mxu1 %v1023_v33  ;;  %v57_v31 = vld [vmem:[%s1548_s1] sm:$0x3] }
  0x1e   :  { %713 = vmatprep.subr.bf16.mxu0 %v1024_v34  ;;  %756 = vmatprep.subr.bf16.mxu1 %v1027_v35  ;;  %v66_v34 = vrot.slane %v57_v31, %v1402_v29  ;;  %v73_v35 = vld [vmem:[%s1549_s2] sm:$0x3] }
  0x21   :  { %714 = vmatpush1.bf16.msra.mxu0 %v1026_v36  ;;  %757 = vmatpush1.bf16.msra.mxu1 %v1029_v38 }
  0x22   :  { %715 = vmatprep.subr.bf16.mxu0 %v1030_v37  ;;  %758 = vmatprep.subr.bf16.mxu1 %v1033_v39  ;;  %v62_v37 = vrot.slane %v57_v31, %v1405_v30  ;;  %v82_v39 = vrot.slane %v73_v35, %v1402_v29 }
  0x25   :  { %716 = vmatpush1.bf16.msra.mxu0 %v1032_v40  ;;  %759 = vmatpush1.bf16.msra.mxu1 %v1035_v42  ;;  %v78_v40 = vrot.slane %v73_v35, %v1405_v30 }
  0x26   :  { %717 = vmatprep.subr.bf16.mxu0 %v1036_v41  ;;  %760 = vmatprep.subr.bf16.mxu1 %v1039_v58  ;;  %v1089_v58 = vld [vmem:[%s1547_s3 + $0xa4] ss:$24 sps:$4 sm:$0xff]  }
  0x29   :  { %718 = vmatpush1.bf16.msra.mxu0 %v1038_v57  ;;  %761 = vmatpush1.bf16.msra.mxu1 %v1041_v59  ;;  %v1084_v57 = vld [vmem:[%s1547_s3 + $0x70] ss:$24 sps:$4 sm:$0xff]   ;;  %v1087_v59 = vld [vmem:[%s1547_s3 + $0xa0] ss:$24 sps:$4 sm:$0xff]  }
  0x2a   :  { %719 = vmatprep.subr.bf16.mxu0 %v1042_v60  ;;  %762 = vmatprep.subr.bf16.mxu1 %v1045_v62  ;;  %v1092_v60 = vld [vmem:[%s1547_s3 + $0xd4] ss:$24 sps:$4 sm:$0xff]   ;;  %v1095_v62 = vld [vmem:[%s1547_s3 + $0x104] ss:$24 sps:$4 sm:$0xff]  }
  0x2d   :  { %720 = vmatpush1.bf16.msra.mxu0 %v1044_v61  ;;  %763 = vmatpush1.bf16.msra.mxu1 %v1047_v63  ;;  %v1090_v61 = vld [vmem:[%s1547_s3 + $0xd0] ss:$24 sps:$4 sm:$0xff]   ;;  %v1093_v63 = vld [vmem:[%s1547_s3 + $0x100] ss:$24 sps:$4 sm:$0xff]  }
  0x91   :  { %v26_v43 = vpop.xlane.xlu0 %25 }
  0x92   :  { %v31_v44 = vmul.f32 0.00390625, %v26_v43 }
  0x94   :  { %v1296_v45 = vsub.f32 %v1163_v0, %v31_v44  ;;  %v1299_v46 = vsub.f32 %v1168_v1, %v31_v44  ;;  %v1048_v0 = vld [vmem:[%s1547_s3 + $0x214] ss:$24 sps:$4 sm:$0xff]   ;;  %v1050_v1 = vld [vmem:[%s1547_s3 + $0x210] ss:$24 sps:$4 sm:$0xff]  }
  0x95   :  { %v29_v47 = vpop.xlane.xlu0 %28  ;;  %721 = vmatprep.subr.bf16.mxu0 %v1048_v0  ;;  %v1098_v0 = vld [vmem:[%s1547_s3 + $0x134] ss:$24 sps:$4 sm:$0xff]  }
  0x96   :  { %v32_v48 = vmul.f32 0.00390625, %v29_v47  ;;  %v37_v49 = vmul.f32 %v1296_v45, %v1296_v45  ;;  %v38_v50 = vmul.f32 %v1299_v46, %v1299_v46  ;;  %722 = vmatpush1.bf16.msra.mxu0 %v1050_v1  ;;  %v1096_v1 = vld [vmem:[%s1547_s3 + $0x130] ss:$24 sps:$4 sm:$0xff]  }
  0x98   :  { %v1306_v51 = vsub.f32 %v1173_v2, %v32_v48  ;;  %v1309_v52 = vsub.f32 %v1180_v4, %v32_v48  ;;  %v41_v53 = vadd.f32 %v38_v50, %v37_v49  ;;  %v1051_v2 = vld [vmem:[%s1547_s3 + $0x21c] ss:$24 sps:$4 sm:$0xff]  }
  0x99   :  { %764 = vmatprep.subr.bf16.mxu1 %v1051_v2  ;;  %v1054_v4 = vld [vmem:[%s1547_s3 + $0x244] ss:$24 sps:$4 sm:$0xff]  }
  0x9a   :  { %42 = vadd.xlane.f32.xlu1 %v41_v53  ;;  %v39_v54 = vmul.f32 %v1306_v51, %v1306_v51  ;;  %v40_v55 = vmul.f32 %v1309_v52, %v1309_v52  ;;  %765 = vmatpush1.bf16.msra.mxu1 %v1053_v3  ;;  %v1101_v2 = vld [vmem:[%s1547_s3 + $0x164] ss:$24 sps:$4 sm:$0xff]   ;;  %v1099_v3 = vld [vmem:[%s1547_s3 + $0x160] ss:$24 sps:$4 sm:$0xff]  }
  0x9b   :  { %723 = vmatprep.subr.bf16.mxu0 %v1054_v4  ;;  %766 = vmatprep.subr.bf16.mxu1 %v1057_v6  ;;  %v1104_v4 = vld [vmem:[%s1547_s3 + $0x194] ss:$24 sps:$4 sm:$0xff]   ;;  %v1107_v6 = vld [vmem:[%s1547_s3 + $0x1c4] ss:$24 sps:$4 sm:$0xff]  }
  0x9c   :  { %v44_v56 = vadd.f32 %v40_v55, %v39_v54  ;;  %724 = vmatpush1.bf16.msra.mxu0 %v1056_v5  ;;  %v1078_v54 = vld [vmem:[%s1547_s3 + $0x10] ss:$24 sps:$4 sm:$0xff]  }
  0x9d   :  { %725 = vmatprep.subr.bf16.mxu0 %v1060_v8  ;;  %v1102_v5 = vld [vmem:[%s1547_s3 + $0x190] ss:$24 sps:$4 sm:$0xff]   ;;  %v1110_v8 = vld [vmem:[%s1547_s3 + $0x1f4] ss:$24 sps:$4 sm:$0xff]  }
  0x9e   :  { %45 = vadd.xlane.f32.xlu1 %v44_v56  ;;  %767 = vmatpush1.bf16.msra.mxu1 %v1059_v7  ;;  %v1086_v56 = vld [vmem:[%s1547_s3 + $0x74] ss:$24 sps:$4 sm:$0xff]   ;;  %v1105_v7 = vld [vmem:[%s1547_s3 + $0x1c0] ss:$24 sps:$4 sm:$0xff]  }
  0x9f   :  { %768 = vmatprep.subr.bf16.mxu1 %v1063_v9  ;;  %v1108_v9 = vld [vmem:[%s1547_s3 + $0x1f0] ss:$24 sps:$4 sm:$0xff]  }
  0xa0   :  { %726 = vmatpush1.bf16.msra.mxu0 %v1062_v10  ;;  %v1113_v10 = vld [vmem:[%s1547_s3 + $0x224] ss:$24 sps:$4 sm:$0xff]  }
  0xa1   :  { %727 = vmatprep.subr.bf16.mxu0 %v1066_v12  ;;  %v1116_v12 = vld [vmem:[%s1547_s3 + $0x254] ss:$24 sps:$4 sm:$0xff]  }
  0xa2   :  { %769 = vmatpush1.bf16.msra.mxu1 %v1065_v11  ;;  %v1111_v11 = vld [vmem:[%s1547_s3 + $0x220] ss:$24 sps:$4 sm:$0xff]  }
  0xa3   :  { %770 = vmatprep.subr.bf16.mxu1 %v1069_v13  ;;  %v1114_v13 = vld [vmem:[%s1547_s3 + $0x250] ss:$24 sps:$4 sm:$0xff]  }
  0xa4   :  { %728 = vmatpush1.bf16.msra.mxu0 %v1068_v14  ;;  %v1119_v14 = vld [vmem:[%s1547_s3 + $0x284] ss:$24 sps:$4 sm:$0xff]  }
  0xa5   :  { %729 = vmatprep.subr.bf16.mxu0 %v1072_v16  ;;  %v1122_v16 = vld [vmem:[%s1547_s3 + $0x2b4] ss:$24 sps:$4 sm:$0xff]  }
  0xa6   :  { %771 = vmatpush1.bf16.msra.mxu1 %v1071_v15  ;;  %v1117_v15 = vld [vmem:[%s1547_s3 + $0x280] ss:$24 sps:$4 sm:$0xff]  }
  0xa7   :  { %772 = vmatprep.subr.bf16.mxu1 %v1075_v17  ;;  %v1120_v17 = vld [vmem:[%s1547_s3 + $0x2b0] ss:$24 sps:$4 sm:$0xff]  }
  0xa8   :  { %730 = vmatpush1.bf16.msra.mxu0 %v1074_v18  ;;  %v1125_v18 = vld [vmem:[%s1547_s3 + $0x2e4] ss:$24 sps:$4 sm:$0xff]  }
  0xa9   :  { %785 = vmatprep.subr.bf16.mxu0 %v1080_v20  ;;  %v199_v20 = vsub.s32 2, %v1399_v28 }
  0xaa   :  { %773 = vmatpush1.bf16.msra.mxu1 %v1077_v19  ;;  %v1123_v19 = vld [vmem:[%s1547_s3 + $0x2e0] ss:$24 sps:$4 sm:$0xff]  }
 0x127   :  { %v43_v21 = vpop.xlane.xlu1 %42 }
 0x128   :  { %v47_v22 = vmul.f32 0.00390625, %v43_v21  ;;  %v187_v21 = vld [vmem:[%s1550_s4] sm:$0x3f] }
 0x129   :  { %v196_v25 = vrot.slane %v187_v21, %v1402_v29 }
 0x12a   :  { %v49_v23 = vadd.f32 1e-05, %v47_v22  ;;  %v203_v22 = vsub.s32 3, %v1399_v28 }
 0x12b   :  { %v46_v24 = vpop.xlane.xlu1 %45 }
 0x12c   :  { %1126 = vrsqrt.f32 %v49_v23  ;;  %v48_v26 = vmul.f32 0.00390625, %v46_v24  ;;  %v192_v23 = vrot.slane %v187_v21, %v1405_v30  ;;  %v200_v24 = vrot.slane %v187_v21, %v199_v20 }
 0x12e   :  { %v50_v27 = vadd.f32 1e-05, %v48_v26  ;;  %v204_v26 = vrot.slane %v187_v21, %v203_v22 }
 0x130   :  { %1128 = vrsqrt.f32 %v50_v27 }
 0x136   :  { %v1127_v32 = vpop.eup %1126 }
 0x137   :  { %v54_v33 = vmul.f32 %v1127_v32, %v1299_v46  ;;  %v53_v36 = vmul.f32 %v1127_v32, %v1296_v45 }
 0x139   :  { %v70_v42 = vmul.f32 %v66_v34, %v54_v33  ;;  %v69_v44 = vmul.f32 %v62_v37, %v53_v36 }
 0x13a   :  { %v1129_v38 = vpop.eup %1128 }
 0x13b   :  { %v56_v41 = vmul.f32 %v1129_v38, %v1309_v52  ;;  %v55_v43 = vmul.f32 %v1129_v38, %v1306_v51  ;;  %v86_v48 = vadd.f32 %v82_v39, %v70_v42  ;;  %v85_v50 = vadd.f32 %v78_v40, %v69_v44  ;;  %v1083_v52 = vld [vmem:[%s1547_s3 + $0x44] ss:$24 sps:$4 sm:$0xff]   ;;  %v1081_v51 = vld [vmem:[%s1547_s3 + $0x40] ss:$24 sps:$4 sm:$0xff]  }
 0x13d   :  { %v72_v46 = vmul.f32 %v66_v34, %v56_v41  ;;  %v71_v47 = vmul.f32 %v62_v37, %v55_v43 }
 0x13f   :  { %v88_v49 = vadd.f32 %v82_v39, %v72_v46  ;;  %v87_v53 = vadd.f32 %v78_v40, %v71_v47 }
 0x141   :  { %v90_v45 = vpack.c.bf16 %v88_v49, %v86_v48  ;;  %v1424_v55 = vpack.c.bf16 %v87_v53, %v85_v50  ;;  %v207_v49 = vsub.s32 4, %v1399_v28  ;;  %v211_v50 = vsub.s32 5, %v1399_v28 }
 0x143   :  { %731 = vmatprep.mubr.bf16.mxu0 %v90_v45  ;;  %774 = vmatprep.mubr.bf16.mxu1 %v90_v45  ;;  %v208_v53 = vrot.slane %v187_v21, %v207_v49 }
 0x144   :  { %732 = vmatmul.mubr.bf16.vlgmr.msra.gmra.mrb[0].mxu0 %v1424_v55  ;;  %775 = vmatmul.mubr.bf16.vlgmr.msra.gmra.mrb[0].mxu1 %v1424_v55 }
 0x145   :  { %786 = vmatpush1.bf16.msra.mxu0 %v1078_v54  ;;  %817 = vmatprep.mubr.bf16.mxu0 %v90_v45  ;;  %v212_v45 = vrot.slane %v187_v21, %v211_v50 }
 0x146   :  { %787 = vmatprep.subr.bf16.mxu0 %v1083_v52 }
 0x149   :  { %788 = vmatpush1.bf16.msra.mxu0 %v1081_v51 }
 0x14a   :  { %789 = vmatprep.subr.bf16.mxu0 %v1086_v56 }
 0x14d   :  { %790 = vmatpush1.bf16.msra.mxu0 %v1084_v57 }
 0x14e   :  { %791 = vmatprep.subr.bf16.mxu0 %v1089_v58 }
 0x151   :  { %792 = vmatpush1.bf16.msra.mxu0 %v1087_v59 }
 0x152   :  { %793 = vmatprep.subr.bf16.mxu0 %v1092_v60 }
 0x155   :  { %794 = vmatpush1.bf16.msra.mxu0 %v1090_v61 }
 0x156   :  { %795 = vmatprep.subr.bf16.mxu0 %v1095_v62 }
 0x159   :  { %796 = vmatpush1.bf16.msra.mxu0 %v1093_v63 }
 0x15a   :  { %797 = vmatprep.subr.bf16.mxu0 %v1098_v0 }
 0x15d   :  { %798 = vmatpush1.bf16.msra.mxu0 %v1096_v1 }
 0x15e   :  { %799 = vmatprep.subr.bf16.mxu0 %v1101_v2 }
 0x161   :  { %800 = vmatpush1.bf16.msra.mxu0 %v1099_v3 }
 0x162   :  { %801 = vmatprep.subr.bf16.mxu0 %v1104_v4 }
 0x165   :  { %802 = vmatpush1.bf16.msra.mxu0 %v1102_v5 }
 0x166   :  { %803 = vmatprep.subr.bf16.mxu0 %v1107_v6 }
 0x169   :  { %804 = vmatpush1.bf16.msra.mxu0 %v1105_v7 }
 0x16a   :  { %805 = vmatprep.subr.bf16.mxu0 %v1110_v8 }
 0x16d   :  { %806 = vmatpush1.bf16.msra.mxu0 %v1108_v9 }
 0x16e   :  { %807 = vmatprep.subr.bf16.mxu0 %v1113_v10 }
 0x171   :  { %808 = vmatpush1.bf16.msra.mxu0 %v1111_v11 }
 0x172   :  { %809 = vmatprep.subr.bf16.mxu0 %v1116_v12 }
 0x175   :  { %810 = vmatpush1.bf16.msra.mxu0 %v1114_v13 }
 0x176   :  { %811 = vmatprep.subr.bf16.mxu0 %v1119_v14 }
 0x179   :  { %812 = vmatpush1.bf16.msra.mxu0 %v1117_v15 }
 0x17a   :  { %813 = vmatprep.subr.bf16.mxu0 %v1122_v16 }
 0x17d   :  { %814 = vmatpush1.bf16.msra.mxu0 %v1120_v17 }
 0x17e   :  { %815 = vmatprep.subr.bf16.mxu0 %v1125_v18 }
 0x181   :  { %816 = vmatpush1.bf16.msra.mxu0 %v1123_v19 }
 0x184   :  { %818 = vmatmul.mubr.bf16.vlgmr.msra.gmra.mrb[4].mxu0 %v1424_v55 }
 0x217   :  { %v733_v27 = vpop.f32.mrb[0].mxu0  ;;  %v776_v31 = vpop.f32.mrb[0].mxu1 }
 0x218   :  { %v734_v32 = vadd.f32 %v733_v27, %v192_v23  ;;  %v777_v33 = vadd.f32 %v776_v31, %v200_v24  ;;  %v735_v34 = vpop.f32.mrb[1].mxu0  ;;  %v778_v35 = vpop.f32.mrb[1].mxu1 }
 0x219   :  { %v736_v36 = vadd.f32 %v735_v34, %v196_v25  ;;  %v779_v37 = vadd.f32 %v778_v35, %v204_v26  ;;  %v737_v38 = vpop.f32.mrb[2].mxu0  ;;  %v780_v39 = vpop.f32.mrb[2].mxu1 }
 0x21a   :  { %v738_v40 = vadd.f32 %v737_v38, %v192_v23  ;;  %v781_v41 = vadd.f32 %v780_v39, %v200_v24  ;;  %v739_v42 = vpop.f32.mrb[3].mxu0  ;;  %v782_v43 = vpop.f32.mrb[3].mxu1 }
 0x21b   :  { %v976_v44 = vpack.c.bf16 %v736_v36, %v734_v32  ;;  %v977_v30 = vpack.c.bf16 %v779_v37, %v777_v33  ;;  %v740_v46 = vadd.f32 %v739_v42, %v196_v25  ;;  %v783_v47 = vadd.f32 %v782_v43, %v204_v26 }
 0x21d   :  { %864 = vst [vmem:[%s1551_s5] sm:$0xff] %v976_v44  ;;  %865 = vst [vmem:[%s1551_s5 + $0x8] sm:$0xff] %v977_v30  ;;  %v979_v29 = vpack.c.bf16 %v740_v46, %v738_v40  ;;  %v980_v48 = vpack.c.bf16 %v783_v47, %v781_v41 }
 0x21f   :  { %867 = vst [vmem:[%s1551_s5 + $0x18] sm:$0xff] %v979_v29  ;;  %868 = vst [vmem:[%s1551_s5 + $0x20] sm:$0xff] %v980_v48 }
 0x257   :  { %v819_v54 = vpop.f32.mrb[4].mxu0 }
 0x258   :  { %v820_v55 = vadd.f32 %v819_v54, %v208_v53  ;;  %v821_v52 = vpop.f32.mrb[5].mxu0 }
 0x259   :  { %v822_v51 = vadd.f32 %v821_v52, %v212_v45  ;;  %v823_v56 = vpop.f32.mrb[6].mxu0 }
 0x25a   :  { %v824_v57 = vadd.f32 %v823_v56, %v208_v53  ;;  %v825_v58 = vpop.f32.mrb[7].mxu0 }
 0x25b   :  { %v978_v59 = vpack.c.bf16 %v822_v51, %v820_v55  ;;  %v826_v60 = vadd.f32 %v825_v58, %v212_v45 }
 0x25d   :  { %866 = vst [vmem:[%s1551_s5 + $0x10] sm:$0xff] %v978_v59  ;;  %v981_v61 = vpack.c.bf16 %v826_v60, %v824_v57 }
 0x25f   :  { %869 = vst [vmem:[%s1551_s5 + $0x28] sm:$0xff] %v981_v61 }

// kernel: run.8
= control target key start
LH: loop header
LB: loop body
LE: loop exit
PB: predicated region body
PF: predicated region fallthrough
CT: control target
= control target key end

     0   :  { %12 = vsyncpa [#allocation3], 0  ;;  %s2773_s24 = smov [#allocation2]   ;;  %s3364_s0 = inlined_call_operand.vmem [shape: f32[16,256], index: 0, kind: input, shape index: {}]   ;;  %s3365_s1 = inlined_call_operand.vmem [shape: f32[1,256], index: 1, kind: input, shape index: {}]   ;;  %s3366_s2 = inlined_call_operand.vmem [shape: f32[1,256], index: 2, kind: input, shape index: {}]   ;;  %s3367_s3 = inlined_call_operand.vmem [shape: bf16[256,1024], index: 3, kind: input, shape index: {}]   ;;  %s3368_s4 = inlined_call_operand.vmem [shape: f32[1,1024], index: 4, kind: input, shape index: {}]   ;;  %s3369_s5 = inlined_call_operand.hbm [shape: bf16[1024,256], index: 5, kind: input, shape index: {}]   ;;  %s3370_s6 = inlined_call_operand.vmem [shape: f32[1,256], index: 6, kind: input, shape index: {}]   ;;  %s3371_s7 = inlined_call_operand.vmem [shape: f32[16,256], index: 7, kind: output, shape index: {}]  }
   0x1   :  { %s28_s25 = sshll.u32 %s2773_s24, 4  ;;  %s2749_s28 = scalar_lea.hbm %s3369_s5, 16384  ;;  %s29_s25 = int_to_ptr.vmem [resolvable:$true] %s28_s25 }
   0x2   :  { %p2750_p0 = scmp.ne.s32.totalorder %s3369_s5, %s2749_s28  ;;  %p2753_p1 = scmp.lt.u32.totalorder %s2749_s28, %s3369_s5 }
   0x4   :  { %p2755_p2 = pnand %p2753_p1, %p2750_p0 }
   0x6   :  { %2758 = shalt.err (!%p2755_p2)
}
   0x7   :  { %s2759_s10 = scalar_lea.vmem %s29_s25, 16384  ;;  %p2764_p4 = scmp.lt.s32.totalorder %s29_s25, %s29_s25 }
   0x8   :  { %p2760_p3 = scmp.ne.s32.totalorder %s29_s25, %s2759_s10  ;;  %p2765_p5 = scmp.lt.s32.totalorder %s2759_s10, %s2759_s10 }
   0xa   :  { %p2766_p6 = por %p2765_p5, %p2764_p4 }
   0xc   :  { %p2767_p7 = pnand %p2766_p6, %p2760_p3 }
   0xe   :  { %2770 = shalt.err (!%p2767_p7)
}
   0xf   :  { %s2774_s11 = smov 128   ;;  %s2775_s12 = smov 8  }
  0x10   :  { %34 = dma.hbm_to_vmem [thread:$0]  %s3369_s5, 16384, %s29_s25, [#allocation3], %s2774_s11, %s2774_s11, %s2775_s12  }
  0x11   :  { %2771 = dma.done.wait [#allocation3], 16384  }
  0x12   :  { %2772 = vsyncadd [#allocation3], 4294950912  ;;  %v2831_v0 = vld [vmem:[%s3364_s0] sm:$0xff]  ;;  %v2836_v1 = vld [vmem:[%s3364_s0 + $0x8] sm:$0xff] }
  0x13   :  { %v2841_v2 = vld [vmem:[%s3364_s0 + $0x10] sm:$0xff]  ;;  %v44_v3 = vadd.f32 %v2836_v1, %v2831_v0  ;;  %v2848_v4 = vld [vmem:[%s3364_s0 + $0x18] sm:$0xff]  ;;  %v111_v6 = vld [vmem:[%s3367_s3] sm:$0xff] }
  0x14   :  { %v47_v5 = vadd.f32 %v2848_v4, %v2841_v2  ;;  %v115_v7 = vld [vmem:[%s3367_s3 + $0x20] sm:$0xff] }
  0x15   :  { %45 = vadd.xlane.f32.xlu0 %v44_v3  ;;  %v119_v8 = vld [vmem:[%s3367_s3 + $0x40] sm:$0xff]  ;;  %v2199_v9 = vcombine.high %v111_v6, %v115_v7  ;;  %v2198_v10 = vcombine.low %v111_v6, %v115_v7 }
  0x16   :  { %v123_v11 = vld [vmem:[%s3367_s3 + $0x60] sm:$0xff] }
  0x17   :  { %v2207_v12 = vcombine.high %v119_v8, %v123_v11  ;;  %v127_v13 = vld [vmem:[%s3367_s3 + $0x80] sm:$0xff]  ;;  %921 = vmatprep.subr.bf16.mxu1 %v2199_v9  ;;  %v2206_v15 = vcombine.low %v119_v8, %v123_v11 }
  0x18   :  { %v131_v14 = vld [vmem:[%s3367_s3 + $0xa0] sm:$0xff]  ;;  %922 = vmatpush1.bf16.msra.mxu1 %v2198_v10 }
  0x19   :  { %48 = vadd.xlane.f32.xlu0 %v47_v5  ;;  %923 = vmatprep.subr.bf16.mxu1 %v2207_v12  ;;  %v2215_v16 = vcombine.high %v127_v13, %v131_v14  ;;  %v135_v17 = vld [vmem:[%s3367_s3 + $0xc0] sm:$0xff]  ;;  %v2214_v19 = vcombine.low %v127_v13, %v131_v14 }
  0x1a   :  { %v139_v18 = vld [vmem:[%s3367_s3 + $0xe0] sm:$0xff] }
  0x1b   :  { %v143_v20 = vld [vmem:[%s3367_s3 + $0x100] sm:$0xff]  ;;  %v2223_v22 = vcombine.high %v135_v17, %v139_v18  ;;  %v2222_v23 = vcombine.low %v135_v17, %v139_v18 }
  0x1c   :  { %924 = vmatpush1.bf16.msra.mxu1 %v2206_v15  ;;  %v147_v21 = vld [vmem:[%s3367_s3 + $0x120] sm:$0xff] }
  0x1d   :  { %925 = vmatprep.subr.bf16.mxu1 %v2215_v16  ;;  %v151_v24 = vld [vmem:[%s3367_s3 + $0x140] sm:$0xff]  ;;  %v2231_v26 = vcombine.high %v143_v20, %v147_v21  ;;  %v2230_v27 = vcombine.low %v143_v20, %v147_v21  ;;  %v112_v20 = vld [vmem:[%s3367_s3 + $0x8] sm:$0xff] }
  0x1e   :  { %v155_v25 = vld [vmem:[%s3367_s3 + $0x160] sm:$0xff]  ;;  %v116_v21 = vld [vmem:[%s3367_s3 + $0x28] sm:$0xff] }
  0x1f   :  { %v159_v28 = vld [vmem:[%s3367_s3 + $0x180] sm:$0xff]  ;;  %v2239_v30 = vcombine.high %v151_v24, %v155_v25  ;;  %v2238_v31 = vcombine.low %v151_v24, %v155_v25 }
  0x20   :  { %926 = vmatpush1.bf16.msra.mxu1 %v2214_v19  ;;  %v163_v29 = vld [vmem:[%s3367_s3 + $0x1a0] sm:$0xff] }
  0x21   :  { %927 = vmatprep.subr.bf16.mxu1 %v2223_v22  ;;  %v2247_v32 = vcombine.high %v159_v28, %v163_v29  ;;  %v167_v33 = vld [vmem:[%s3367_s3 + $0x1c0] sm:$0xff]  ;;  %v2246_v35 = vcombine.low %v159_v28, %v163_v29  ;;  %v2201_v22 = vcombine.high %v112_v20, %v116_v21  ;;  %v79_v28 = vlaneseq }
  0x22   :  { %v171_v34 = vld [vmem:[%s3367_s3 + $0x1e0] sm:$0xff] }
  0x23   :  { %v2255_v36 = vcombine.high %v167_v33, %v171_v34  ;;  %v175_v37 = vld [vmem:[%s3367_s3 + $0x200] sm:$0xff]  ;;  %v2254_v39 = vcombine.low %v167_v33, %v171_v34 }
  0x24   :  { %928 = vmatpush1.bf16.msra.mxu1 %v2222_v23  ;;  %v179_v38 = vld [vmem:[%s3367_s3 + $0x220] sm:$0xff]  ;;  %v2200_v23 = vcombine.low %v112_v20, %v116_v21  ;;  %v180_v20 = vld [vmem:[%s3367_s3 + $0x228] sm:$0xff] }
  0x25   :  { %929 = vmatprep.subr.bf16.mxu1 %v2231_v26  ;;  %v2263_v40 = vcombine.high %v175_v37, %v179_v38  ;;  %v183_v41 = vld [vmem:[%s3367_s3 + $0x240] sm:$0xff]  ;;  %v2262_v43 = vcombine.low %v175_v37, %v179_v38 }
  0x26   :  { %v187_v42 = vld [vmem:[%s3367_s3 + $0x260] sm:$0xff] }
  0x27   :  { %v2271_v44 = vcombine.high %v183_v41, %v187_v42  ;;  %v2270_v59 = vcombine.low %v183_v41, %v187_v42  ;;  %v191_v60 = vld [vmem:[%s3367_s3 + $0x280] sm:$0xff] }
  0x28   :  { %930 = vmatpush1.bf16.msra.mxu1 %v2230_v27  ;;  %v195_v61 = vld [vmem:[%s3367_s3 + $0x2a0] sm:$0xff] }
  0x29   :  { %931 = vmatprep.subr.bf16.mxu1 %v2239_v30  ;;  %v2279_v62 = vcombine.high %v191_v60, %v195_v61  ;;  %v2278_v63 = vcombine.low %v191_v60, %v195_v61  ;;  %v211_v5 = vld [vmem:[%s3367_s3 + $0x320] sm:$0xff]  ;;  %v132_v60 = vld [vmem:[%s3367_s3 + $0xa8] sm:$0xff] }
  0x2a   :  { %v215_v8 = vld [vmem:[%s3367_s3 + $0x340] sm:$0xff] }
  0x2b   :  { %v219_v9 = vld [vmem:[%s3367_s3 + $0x360] sm:$0xff] }
  0x2c   :  { %932 = vmatpush1.bf16.msra.mxu1 %v2238_v31  ;;  %v2303_v10 = vcombine.high %v215_v8, %v219_v9  ;;  %v2302_v11 = vcombine.low %v215_v8, %v219_v9  ;;  %v223_v12 = vld [vmem:[%s3367_s3 + $0x380] sm:$0xff]  ;;  %v2974_v31 = vshrl.u32 %v79_v28, 7  ;;  %v156_v8 = vld [vmem:[%s3367_s3 + $0x168] sm:$0xff] }
  0x2d   :  { %933 = vmatprep.subr.bf16.mxu1 %v2247_v32  ;;  %v227_v13 = vld [vmem:[%s3367_s3 + $0x3a0] sm:$0xff]  ;;  %v196_v28 = vld [vmem:[%s3367_s3 + $0x2a8] sm:$0xff] }
  0x2e   :  { %v2311_v14 = vcombine.high %v223_v12, %v227_v13  ;;  %v2310_v15 = vcombine.low %v223_v12, %v227_v13  ;;  %v231_v16 = vld [vmem:[%s3367_s3 + $0x3c0] sm:$0xff]  ;;  %v2977_v32 = vsub.s32 1, %v2974_v31  ;;  %v2980_v33 = vsub.s32 0, %v2974_v31  ;;  %v164_v12 = vld [vmem:[%s3367_s3 + $0x1a8] sm:$0xff] }
  0x2f   :  { %v235_v17 = vld [vmem:[%s3367_s3 + $0x3e0] sm:$0xff] }
  0x30   :  { %934 = vmatpush1.bf16.msra.mxu1 %v2246_v35  ;;  %v2319_v18 = vcombine.high %v231_v16, %v235_v17  ;;  %v2318_v19 = vcombine.low %v231_v16, %v235_v17  ;;  %v77_v34 = vld [vmem:[%s3365_s1] sm:$0x3]  ;;  %v172_v16 = vld [vmem:[%s3367_s3 + $0x1e8] sm:$0xff] }
  0x31   :  { %935 = vmatprep.subr.bf16.mxu1 %v2255_v36  ;;  %v86_v38 = vrot.slane %v77_v34, %v2977_v32 }
  0x34   :  { %936 = vmatpush1.bf16.msra.mxu1 %v2254_v39  ;;  %v93_v39 = vld [vmem:[%s3366_s2] sm:$0x3] }
  0x35   :  { %937 = vmatprep.subr.bf16.mxu1 %v2263_v40  ;;  %v82_v40 = vrot.slane %v77_v34, %v2980_v33  ;;  %v102_v42 = vrot.slane %v93_v39, %v2977_v32  ;;  %v200_v34 = vld [vmem:[%s3367_s3 + $0x2c8] sm:$0xff] }
  0x38   :  { %938 = vmatpush1.bf16.msra.mxu1 %v2262_v43  ;;  %v98_v43 = vrot.slane %v93_v39, %v2980_v33  ;;  %v212_v39 = vld [vmem:[%s3367_s3 + $0x328] sm:$0xff] }
  0x39   :  { %939 = vmatprep.subr.bf16.mxu1 %v2271_v44 }
  0x3c   :  { %940 = vmatpush1.bf16.msra.mxu1 %v2270_v59  ;;  %v128_v59 = vld [vmem:[%s3367_s3 + $0x88] sm:$0xff] }
  0x3d   :  { %941 = vmatprep.subr.bf16.mxu1 %v2279_v62  ;;  %v2217_v62 = vcombine.high %v128_v59, %v132_v60 }
  0x40   :  { %942 = vmatpush1.bf16.msra.mxu1 %v2278_v63  ;;  %v136_v63 = vld [vmem:[%s3367_s3 + $0xc8] sm:$0xff] }
  0xa2   :  { %v46_v45 = vpop.xlane.xlu0 %45 }
  0xa3   :  { %v51_v46 = vmul.f32 0.00390625, %v46_v45 }
  0xa5   :  { %v2913_v47 = vsub.f32 %v2831_v0, %v51_v46  ;;  %v2916_v48 = vsub.f32 %v2836_v1, %v51_v46  ;;  %v199_v0 = vld [vmem:[%s3367_s3 + $0x2c0] sm:$0xff] }
  0xa6   :  { %v49_v49 = vpop.xlane.xlu0 %48  ;;  %v203_v1 = vld [vmem:[%s3367_s3 + $0x2e0] sm:$0xff] }
  0xa7   :  { %v52_v50 = vmul.f32 0.00390625, %v49_v49  ;;  %v57_v51 = vmul.f32 %v2913_v47, %v2913_v47  ;;  %v58_v52 = vmul.f32 %v2916_v48, %v2916_v48  ;;  %v2286_v3 = vcombine.low %v199_v0, %v203_v1 }
  0xa9   :  { %v2923_v53 = vsub.f32 %v2841_v2, %v52_v50  ;;  %v2926_v54 = vsub.f32 %v2848_v4, %v52_v50  ;;  %v61_v55 = vadd.f32 %v58_v52, %v57_v51  ;;  %v2287_v2 = vcombine.high %v199_v0, %v203_v1  ;;  %v207_v4 = vld [vmem:[%s3367_s3 + $0x300] sm:$0xff]  ;;  %v140_v0 = vld [vmem:[%s3367_s3 + $0xe8] sm:$0xff] }
  0xaa   :  { %v2295_v6 = vcombine.high %v207_v4, %v211_v5  ;;  %v2294_v7 = vcombine.low %v207_v4, %v211_v5  ;;  %v2216_v1 = vcombine.low %v128_v59, %v132_v60  ;;  %v148_v4 = vld [vmem:[%s3367_s3 + $0x128] sm:$0xff]  ;;  %v2224_v5 = vcombine.low %v136_v63, %v140_v0 }
  0xab   :  { %62 = vadd.xlane.f32.xlu1 %v61_v55  ;;  %v59_v56 = vmul.f32 %v2923_v53, %v2923_v53  ;;  %v60_v57 = vmul.f32 %v2926_v54, %v2926_v54  ;;  %943 = vmatprep.subr.bf16.mxu1 %v2287_v2  ;;  %v2225_v2 = vcombine.high %v136_v63, %v140_v0  ;;  %v2487_v60 = vld [vmem:[#allocation2] ss:$8 sps:$4 sm:$0xff]   ;;  %v125_v63 = vld [vmem:[%s3367_s3 + $0x70] sm:$0xff] }
  0xac   :  { %944 = vmatpush1.bf16.msra.mxu1 %v2286_v3  ;;  %v144_v3 = vld [vmem:[%s3367_s3 + $0x108] sm:$0xff]  ;;  %v2488_v0 = vld [vmem:[#allocation2 + $0x14] ss:$8 sps:$4 sm:$0xff]  }
  0xad   :  { %v64_v58 = vadd.f32 %v60_v57, %v59_v56  ;;  %945 = vmatprep.subr.bf16.mxu1 %v2295_v6  ;;  %v120_v56 = vld [vmem:[%s3367_s3 + $0x48] sm:$0xff]  ;;  %v2233_v6 = vcombine.high %v144_v3, %v148_v4  ;;  %v2232_v9 = vcombine.low %v144_v3, %v148_v4  ;;  %v129_v4 = vld [vmem:[%s3367_s3 + $0x90] sm:$0xff] }
  0xae   :  { %v124_v57 = vld [vmem:[%s3367_s3 + $0x68] sm:$0xff] }
  0xaf   :  { %65 = vadd.xlane.f32.xlu1 %v64_v58  ;;  %v2208_v61 = vcombine.low %v120_v56, %v124_v57 }
  0xb0   :  { %946 = vmatpush1.bf16.msra.mxu1 %v2294_v7  ;;  %v152_v7 = vld [vmem:[%s3367_s3 + $0x148] sm:$0xff] }
  0xb1   :  { %947 = vmatprep.subr.bf16.mxu1 %v2303_v10  ;;  %v2241_v10 = vcombine.high %v152_v7, %v156_v8  ;;  %v2240_v13 = vcombine.low %v152_v7, %v156_v8  ;;  %v2493_v7 = vld [vmem:[#allocation2 + $0x20] ss:$8 sps:$4 sm:$0xff]   ;;  %v2494_v8 = vld [vmem:[#allocation2 + $0x34] ss:$8 sps:$4 sm:$0xff]  }
  0xb4   :  { %948 = vmatpush1.bf16.msra.mxu1 %v2302_v11  ;;  %v160_v11 = vld [vmem:[%s3367_s3 + $0x188] sm:$0xff] }
  0xb5   :  { %949 = vmatprep.subr.bf16.mxu1 %v2311_v14  ;;  %v2249_v14 = vcombine.high %v160_v11, %v164_v12  ;;  %v2248_v17 = vcombine.low %v160_v11, %v164_v12  ;;  %v137_v11 = vld [vmem:[%s3367_s3 + $0xd0] sm:$0xff] }
  0xb6   :  { %v141_v12 = vld [vmem:[%s3367_s3 + $0xf0] sm:$0xff] }
  0xb8   :  { %950 = vmatpush1.bf16.msra.mxu1 %v2310_v15  ;;  %v168_v15 = vld [vmem:[%s3367_s3 + $0x1c8] sm:$0xff] }
  0xb9   :  { %951 = vmatprep.subr.bf16.mxu1 %v2319_v18  ;;  %v2257_v18 = vcombine.high %v168_v15, %v172_v16  ;;  %v2256_v21 = vcombine.low %v168_v15, %v172_v16  ;;  %v2227_v16 = vcombine.high %v137_v11, %v141_v12 }
  0xbc   :  { %952 = vmatpush1.bf16.msra.mxu1 %v2318_v19  ;;  %v176_v19 = vld [vmem:[%s3367_s3 + $0x208] sm:$0xff] }
  0xbd   :  { %964 = vmatprep.subr.bf16.mxu1 %v2201_v22  ;;  %v2265_v22 = vcombine.high %v176_v19, %v180_v20 }
 0x138   :  { %v63_v24 = vpop.xlane.xlu1 %62 }
 0x139   :  { %v67_v25 = vmul.f32 0.00390625, %v63_v24  ;;  %v188_v24 = vld [vmem:[%s3367_s3 + $0x268] sm:$0xff] }
 0x13b   :  { %v69_v26 = vadd.f32 1e-05, %v67_v25  ;;  %v2264_v25 = vcombine.low %v176_v19, %v180_v20  ;;  %v2499_v19 = vld [vmem:[#allocation2 + $0x40] ss:$8 sps:$4 sm:$0xff]   ;;  %v2500_v20 = vld [vmem:[#allocation2 + $0x54] ss:$8 sps:$4 sm:$0xff]  }
 0x13c   :  { %v66_v27 = vpop.xlane.xlu1 %65 }
 0x13d   :  { %2677 = vrsqrt.f32 %v69_v26  ;;  %v68_v29 = vmul.f32 0.00390625, %v66_v27  ;;  %v192_v27 = vld [vmem:[%s3367_s3 + $0x288] sm:$0xff] }
 0x13f   :  { %v70_v30 = vadd.f32 1e-05, %v68_v29 }
 0x141   :  { %2679 = vrsqrt.f32 %v70_v30  ;;  %v2281_v30 = vcombine.high %v192_v27, %v196_v28 }
 0x147   :  { %v2678_v35 = vpop.eup %2677 }
 0x148   :  { %v73_v36 = vmul.f32 %v2678_v35, %v2913_v47  ;;  %v74_v37 = vmul.f32 %v2678_v35, %v2916_v48  ;;  %v204_v35 = vld [vmem:[%s3367_s3 + $0x2e8] sm:$0xff] }
 0x14a   :  { %v90_v46 = vmul.f32 %v86_v38, %v74_v37  ;;  %v89_v47 = vmul.f32 %v82_v40, %v73_v36  ;;  %v2280_v36 = vcombine.low %v192_v27, %v196_v28  ;;  %v2289_v37 = vcombine.high %v200_v34, %v204_v35 }
 0x14b   :  { %v2680_v41 = vpop.eup %2679 }
 0x14c   :  { %v75_v44 = vmul.f32 %v2680_v41, %v2923_v53  ;;  %v76_v45 = vmul.f32 %v2680_v41, %v2926_v54  ;;  %v106_v50 = vadd.f32 %v102_v42, %v90_v46  ;;  %v105_v52 = vadd.f32 %v98_v43, %v89_v47  ;;  %v224_v46 = vld [vmem:[%s3367_s3 + $0x388] sm:$0xff] }
 0x14d   :  { %v2209_v54 = vcombine.high %v120_v56, %v124_v57  ;;  %v228_v47 = vld [vmem:[%s3367_s3 + $0x3a8] sm:$0xff]  ;;  %v113_v56 = vld [vmem:[%s3367_s3 + $0x10] sm:$0xff] }
 0x14e   :  { %v92_v48 = vmul.f32 %v86_v38, %v76_v45  ;;  %v91_v49 = vmul.f32 %v82_v40, %v75_v44  ;;  %v208_v38 = vld [vmem:[%s3367_s3 + $0x308] sm:$0xff]  ;;  %v2288_v40 = vcombine.low %v200_v34, %v204_v35  ;;  %v117_v57 = vld [vmem:[%s3367_s3 + $0x30] sm:$0xff] }
 0x14f   :  { %v2297_v41 = vcombine.high %v208_v38, %v212_v39  ;;  %v2296_v44 = vcombine.low %v208_v38, %v212_v39  ;;  %v2505_v34 = vld [vmem:[#allocation2 + $0x60] ss:$8 sps:$4 sm:$0xff]   ;;  %v173_v38 = vld [vmem:[%s3367_s3 + $0x1f0] sm:$0xff] }
 0x150   :  { %v108_v51 = vadd.f32 %v102_v42, %v92_v48  ;;  %v107_v55 = vadd.f32 %v98_v43, %v91_v49  ;;  %v216_v42 = vld [vmem:[%s3367_s3 + $0x348] sm:$0xff]  ;;  %v2313_v49 = vcombine.high %v224_v46, %v228_v47  ;;  %v2506_v39 = vld [vmem:[#allocation2 + $0x74] ss:$8 sps:$4 sm:$0xff]  }
 0x151   :  { %v220_v43 = vld [vmem:[%s3367_s3 + $0x368] sm:$0xff] }
 0x152   :  { %v3002_v58 = vpack.c.bf16 %v108_v51, %v106_v50  ;;  %v3004_v53 = vpack.c.bf16 %v107_v55, %v105_v52  ;;  %v2305_v45 = vcombine.high %v216_v42, %v220_v43  ;;  %v2304_v48 = vcombine.low %v216_v42, %v220_v43  ;;  %v232_v50 = vld [vmem:[%s3367_s3 + $0x3c8] sm:$0xff]  ;;  %v177_v43 = vld [vmem:[%s3367_s3 + $0x210] sm:$0xff] }
 0x153   :  { %v236_v51 = vld [vmem:[%s3367_s3 + $0x3e8] sm:$0xff]  ;;  %v2312_v52 = vcombine.low %v224_v46, %v228_v47 }
 0x154   :  { %953 = vmatprep.mubr.bf16.mxu1 %v3002_v58  ;;  %v2321_v55 = vcombine.high %v232_v50, %v236_v51  ;;  %v2320_v59 = vcombine.low %v232_v50, %v236_v51  ;;  %v2511_v47 = vld [vmem:[#allocation2 + $0x80] ss:$8 sps:$4 sm:$0xff]   ;;  %v189_v50 = vld [vmem:[%s3367_s3 + $0x270] sm:$0xff] }
 0x155   :  { %954 = vmatmul.mubr.bf16.vlgmr.msra.gmra.mrb[0].mxu1 %v3004_v53  ;;  %v2512_v51 = vld [vmem:[#allocation2 + $0x94] ss:$8 sps:$4 sm:$0xff]  }
 0x156   :  { %965 = vmatpush1.bf16.msra.mxu1 %v2200_v23  ;;  %996 = vmatprep.mubr.bf16.mxu1 %v3002_v58  ;;  %v184_v23 = vld [vmem:[%s3367_s3 + $0x248] sm:$0xff] }
 0x157   :  { %966 = vmatprep.subr.bf16.mxu1 %v2209_v54  ;;  %v2273_v26 = vcombine.high %v184_v23, %v188_v24  ;;  %v2272_v29 = vcombine.low %v184_v23, %v188_v24  ;;  %v2485_v54 = vld [vmem:[#allocation2 + $0x4] ss:$8 sps:$4 sm:$0xff]   ;;  %v153_v23 = vld [vmem:[%s3367_s3 + $0x150] sm:$0xff] }
 0x158   :  { %1997 = vmatprep.subr.bf16.mxu0 %v2485_v54  ;;  %v157_v24 = vld [vmem:[%s3367_s3 + $0x170] sm:$0xff] }
 0x159   :  { %1998 = vmatpush1.bf16.msra.mxu0 %v2487_v60  ;;  %v2243_v28 = vcombine.high %v153_v23, %v157_v24  ;;  %v2242_v35 = vcombine.low %v153_v23, %v157_v24  ;;  %v197_v54 = vld [vmem:[%s3367_s3 + $0x2b0] sm:$0xff] }
 0x15a   :  { %967 = vmatpush1.bf16.msra.mxu1 %v2208_v61  ;;  %v2203_v61 = vcombine.high %v113_v56, %v117_v57  ;;  %1999 = vmatprep.subr.bf16.mxu0 %v2488_v0  ;;  %v205_v0 = vld [vmem:[%s3367_s3 + $0x2f0] sm:$0xff] }
 0x15b   :  { %968 = vmatprep.subr.bf16.mxu1 %v2217_v62  ;;  %v121_v62 = vld [vmem:[%s3367_s3 + $0x50] sm:$0xff] }
 0x15c   :  { %v2211_v3 = vcombine.high %v121_v62, %v125_v63  ;;  %v233_v23 = vld [vmem:[%s3367_s3 + $0x3d0] sm:$0xff] }
 0x15d   :  { %v237_v24 = vld [vmem:[%s3367_s3 + $0x3f0] sm:$0xff] }
 0x15e   :  { %969 = vmatpush1.bf16.msra.mxu1 %v2216_v1  ;;  %v2202_v1 = vcombine.low %v113_v56, %v117_v57  ;;  %v193_v57 = vld [vmem:[%s3367_s3 + $0x290] sm:$0xff] }
 0x15f   :  { %970 = vmatprep.subr.bf16.mxu1 %v2225_v2  ;;  %v2490_v2 = vld [vmem:[#allocation2 + $0x10] ss:$8 sps:$4 sm:$0xff]  }
 0x160   :  { %2000 = vmatpush1.bf16.msra.mxu0 %v2490_v2  ;;  %v2282_v2 = vcombine.low %v193_v57, %v197_v54 }
 0x162   :  { %971 = vmatpush1.bf16.msra.mxu1 %v2224_v5  ;;  %v133_v5 = vld [vmem:[%s3367_s3 + $0xb0] sm:$0xff] }
 0x163   :  { %972 = vmatprep.subr.bf16.mxu1 %v2233_v6  ;;  %v2491_v6 = vld [vmem:[#allocation2 + $0x24] ss:$8 sps:$4 sm:$0xff]   ;;  %v2218_v15 = vcombine.low %v129_v4, %v133_v5 }
 0x164   :  { %2001 = vmatprep.subr.bf16.mxu0 %v2491_v6  ;;  %v213_v6 = vld [vmem:[%s3367_s3 + $0x330] sm:$0xff] }
 0x165   :  { %2002 = vmatpush1.bf16.msra.mxu0 %v2493_v7  ;;  %v2521_v7 = vld [vmem:[#allocation2 + $0xc4] ss:$8 sps:$4 sm:$0xff]  }
 0x166   :  { %973 = vmatpush1.bf16.msra.mxu1 %v2232_v9  ;;  %v2210_v9 = vcombine.low %v121_v62, %v125_v63  ;;  %2003 = vmatprep.subr.bf16.mxu0 %v2494_v8  ;;  %v2283_v62 = vcombine.high %v193_v57, %v197_v54  ;;  %v201_v63 = vld [vmem:[%s3367_s3 + $0x2d0] sm:$0xff]  ;;  %v162_v54 = vld [vmem:[%s3367_s3 + $0x198] sm:$0xff] }
 0x167   :  { %974 = vmatprep.subr.bf16.mxu1 %v2241_v10  ;;  %v2219_v10 = vcombine.high %v129_v4, %v133_v5  ;;  %v2291_v4 = vcombine.high %v201_v63, %v205_v0  ;;  %v209_v5 = vld [vmem:[%s3367_s3 + $0x310] sm:$0xff]  ;;  %v2290_v8 = vcombine.low %v201_v63, %v205_v0  ;;  %v174_v63 = vld [vmem:[%s3367_s3 + $0x1f8] sm:$0xff] }
 0x16a   :  { %975 = vmatpush1.bf16.msra.mxu1 %v2240_v13  ;;  %v2496_v13 = vld [vmem:[#allocation2 + $0x30] ss:$8 sps:$4 sm:$0xff]  }
 0x16b   :  { %976 = vmatprep.subr.bf16.mxu1 %v2249_v14  ;;  %v2497_v14 = vld [vmem:[#allocation2 + $0x44] ss:$8 sps:$4 sm:$0xff]   ;;  %2004 = vmatpush1.bf16.msra.mxu0 %v2496_v13  ;;  %v2524_v13 = vld [vmem:[#allocation2 + $0xd4] ss:$8 sps:$4 sm:$0xff]  }
 0x16c   :  { %2005 = vmatprep.subr.bf16.mxu0 %v2497_v14  ;;  %v2298_v14 = vcombine.low %v209_v5, %v213_v6 }
 0x16e   :  { %977 = vmatpush1.bf16.msra.mxu1 %v2248_v17  ;;  %v145_v17 = vld [vmem:[%s3367_s3 + $0x110] sm:$0xff] }
 0x16f   :  { %978 = vmatprep.subr.bf16.mxu1 %v2257_v18  ;;  %v149_v18 = vld [vmem:[%s3367_s3 + $0x130] sm:$0xff]  ;;  %2006 = vmatpush1.bf16.msra.mxu0 %v2499_v19  ;;  %v2527_v19 = vld [vmem:[#allocation2 + $0xe4] ss:$8 sps:$4 sm:$0xff]  }
 0x170   :  { %2007 = vmatprep.subr.bf16.mxu0 %v2500_v20  ;;  %v2234_v27 = vcombine.low %v145_v17, %v149_v18 }
 0x172   :  { %979 = vmatpush1.bf16.msra.mxu1 %v2256_v21  ;;  %v2226_v21 = vcombine.low %v137_v11, %v141_v12  ;;  %v217_v11 = vld [vmem:[%s3367_s3 + $0x350] sm:$0xff] }
 0x173   :  { %980 = vmatprep.subr.bf16.mxu1 %v2265_v22  ;;  %v2235_v22 = vcombine.high %v145_v17, %v149_v18  ;;  %v221_v12 = vld [vmem:[%s3367_s3 + $0x370] sm:$0xff] }
 0x174   :  { %v225_v17 = vld [vmem:[%s3367_s3 + $0x390] sm:$0xff]  ;;  %v2306_v20 = vcombine.low %v217_v11, %v221_v12 }
 0x175   :  { %v229_v18 = vld [vmem:[%s3367_s3 + $0x3b0] sm:$0xff] }
 0x176   :  { %981 = vmatpush1.bf16.msra.mxu1 %v2264_v25  ;;  %v2502_v25 = vld [vmem:[#allocation2 + $0x50] ss:$8 sps:$4 sm:$0xff]  }
 0x177   :  { %982 = vmatprep.subr.bf16.mxu1 %v2273_v26  ;;  %v2503_v26 = vld [vmem:[#allocation2 + $0x64] ss:$8 sps:$4 sm:$0xff]   ;;  %2008 = vmatpush1.bf16.msra.mxu0 %v2502_v25  ;;  %v2530_v25 = vld [vmem:[#allocation2 + $0xf4] ss:$8 sps:$4 sm:$0xff]  }
 0x178   :  { %2009 = vmatprep.subr.bf16.mxu0 %v2503_v26  ;;  %v2532_v26 = vld [vmem:[#allocation2 + $0xf0] ss:$8 sps:$4 sm:$0xff]  }
 0x17a   :  { %983 = vmatpush1.bf16.msra.mxu1 %v2272_v29  ;;  %v161_v29 = vld [vmem:[%s3367_s3 + $0x190] sm:$0xff] }
 0x17b   :  { %984 = vmatprep.subr.bf16.mxu1 %v2281_v30  ;;  %v165_v30 = vld [vmem:[%s3367_s3 + $0x1b0] sm:$0xff]  ;;  %2010 = vmatpush1.bf16.msra.mxu0 %v2505_v34  ;;  %v2535_v34 = vld [vmem:[#allocation2 + $0x104] ss:$8 sps:$4 sm:$0xff]  }
 0x17c   :  { %2011 = vmatprep.subr.bf16.mxu0 %v2506_v39 }
 0x17e   :  { %985 = vmatpush1.bf16.msra.mxu1 %v2280_v36  ;;  %v2251_v36 = vcombine.high %v161_v29, %v165_v30 }
 0x17f   :  { %986 = vmatprep.subr.bf16.mxu1 %v2289_v37  ;;  %v169_v37 = vld [vmem:[%s3367_s3 + $0x1d0] sm:$0xff] }
 0x180   :  { %v2259_v42 = vcombine.high %v169_v37, %v173_v38  ;;  %v2258_v46 = vcombine.low %v169_v37, %v173_v38  ;;  %v122_v37 = vld [vmem:[%s3367_s3 + $0x58] sm:$0xff] }
 0x181   :  { %v126_v38 = vld [vmem:[%s3367_s3 + $0x78] sm:$0xff] }
 0x182   :  { %987 = vmatpush1.bf16.msra.mxu1 %v2288_v40  ;;  %v2250_v40 = vcombine.low %v161_v29, %v165_v30  ;;  %v114_v29 = vld [vmem:[%s3367_s3 + $0x18] sm:$0xff] }
 0x183   :  { %988 = vmatprep.subr.bf16.mxu1 %v2297_v41  ;;  %v2508_v41 = vld [vmem:[#allocation2 + $0x70] ss:$8 sps:$4 sm:$0xff]  }
 0x184   :  { %2012 = vmatpush1.bf16.msra.mxu0 %v2508_v41  ;;  %v118_v30 = vld [vmem:[%s3367_s3 + $0x38] sm:$0xff] }
 0x185   :  { %v2204_v39 = vcombine.low %v114_v29, %v118_v30  ;;  %v130_v41 = vld [vmem:[%s3367_s3 + $0x98] sm:$0xff] }
 0x186   :  { %989 = vmatpush1.bf16.msra.mxu1 %v2296_v44  ;;  %v181_v44 = vld [vmem:[%s3367_s3 + $0x230] sm:$0xff] }
 0x187   :  { %990 = vmatprep.subr.bf16.mxu1 %v2305_v45  ;;  %v2509_v45 = vld [vmem:[#allocation2 + $0x84] ss:$8 sps:$4 sm:$0xff]  }
 0x188   :  { %2013 = vmatprep.subr.bf16.mxu0 %v2509_v45  ;;  %v138_v45 = vld [vmem:[%s3367_s3 + $0xd8] sm:$0xff] }
 0x189   :  { %2014 = vmatpush1.bf16.msra.mxu0 %v2511_v47 }
 0x18a   :  { %991 = vmatpush1.bf16.msra.mxu1 %v2304_v48  ;;  %v2267_v48 = vcombine.high %v177_v43, %v181_v44  ;;  %2015 = vmatprep.subr.bf16.mxu0 %v2512_v51 }
 0x18b   :  { %992 = vmatprep.subr.bf16.mxu1 %v2313_v49  ;;  %v185_v49 = vld [vmem:[%s3367_s3 + $0x250] sm:$0xff] }
 0x18c   :  { %v2275_v56 = vcombine.high %v185_v49, %v189_v50  ;;  %v2274_v60 = vcombine.low %v185_v49, %v189_v50  ;;  %v146_v49 = vld [vmem:[%s3367_s3 + $0x118] sm:$0xff] }
 0x18e   :  { %993 = vmatpush1.bf16.msra.mxu1 %v2312_v52  ;;  %v2266_v52 = vcombine.low %v177_v43, %v181_v44  ;;  %v2212_v43 = vcombine.low %v122_v37, %v126_v38 }
 0x18f   :  { %994 = vmatprep.subr.bf16.mxu1 %v2321_v55  ;;  %v2514_v55 = vld [vmem:[#allocation2 + $0x90] ss:$8 sps:$4 sm:$0xff]  }
 0x190   :  { %2016 = vmatpush1.bf16.msra.mxu0 %v2514_v55  ;;  %v158_v55 = vld [vmem:[%s3367_s3 + $0x178] sm:$0xff] }
 0x192   :  { %995 = vmatpush1.bf16.msra.mxu1 %v2320_v59  ;;  %v2515_v59 = vld [vmem:[#allocation2 + $0xa4] ss:$8 sps:$4 sm:$0xff]  }
 0x193   :  { %1007 = vmatprep.subr.bf16.mxu1 %v2203_v61  ;;  %v2517_v61 = vld [vmem:[#allocation2 + $0xa0] ss:$8 sps:$4 sm:$0xff]   ;;  %2017 = vmatprep.subr.bf16.mxu0 %v2515_v59  ;;  %v166_v59 = vld [vmem:[%s3367_s3 + $0x1b8] sm:$0xff] }
 0x194   :  { %2018 = vmatpush1.bf16.msra.mxu0 %v2517_v61  ;;  %v2253_v61 = vcombine.high %v162_v54, %v166_v59  ;;  %v2252_v0 = vcombine.low %v162_v54, %v166_v59 }
 0x195   :  { %997 = vmatmul.mubr.bf16.vlgmr.msra.gmra.mrb[4].mxu1 %v3004_v53 }
 0x196   :  { %1008 = vmatpush1.bf16.msra.mxu1 %v2202_v1  ;;  %1039 = vmatprep.mubr.bf16.mxu1 %v3002_v58  ;;  %v2518_v1 = vld [vmem:[#allocation2 + $0xb4] ss:$8 sps:$4 sm:$0xff]  }
 0x197   :  { %1009 = vmatprep.subr.bf16.mxu1 %v2211_v3  ;;  %v2520_v3 = vld [vmem:[#allocation2 + $0xb0] ss:$8 sps:$4 sm:$0xff]   ;;  %2019 = vmatprep.subr.bf16.mxu0 %v2518_v1 }
 0x198   :  { %2020 = vmatpush1.bf16.msra.mxu0 %v2520_v3  ;;  %v182_v3 = vld [vmem:[%s3367_s3 + $0x238] sm:$0xff] }
 0x199   :  { %2021 = vmatprep.subr.bf16.mxu0 %v2521_v7  ;;  %v190_v7 = vld [vmem:[%s3367_s3 + $0x278] sm:$0xff] }
 0x19a   :  { %1010 = vmatpush1.bf16.msra.mxu1 %v2210_v9  ;;  %v2523_v9 = vld [vmem:[#allocation2 + $0xc0] ss:$8 sps:$4 sm:$0xff]  }
 0x19b   :  { %1011 = vmatprep.subr.bf16.mxu1 %v2219_v10  ;;  %v2299_v10 = vcombine.high %v209_v5, %v213_v6  ;;  %v186_v6 = vld [vmem:[%s3367_s3 + $0x258] sm:$0xff] }
 0x19c   :  { %2022 = vmatpush1.bf16.msra.mxu0 %v2523_v9  ;;  %v2277_v9 = vcombine.high %v186_v6, %v190_v7 }
 0x19d   :  { %2023 = vmatprep.subr.bf16.mxu0 %v2524_v13 }
 0x19e   :  { %1012 = vmatpush1.bf16.msra.mxu1 %v2218_v15  ;;  %v2526_v15 = vld [vmem:[#allocation2 + $0xd0] ss:$8 sps:$4 sm:$0xff]  }
 0x19f   :  { %1013 = vmatprep.subr.bf16.mxu1 %v2227_v16  ;;  %v2307_v16 = vcombine.high %v217_v11, %v221_v12  ;;  %v198_v11 = vld [vmem:[%s3367_s3 + $0x2b8] sm:$0xff]  ;;  %v2276_v12 = vcombine.low %v186_v6, %v190_v7 }
 0x1a0   :  { %2024 = vmatpush1.bf16.msra.mxu0 %v2526_v15  ;;  %v206_v15 = vld [vmem:[%s3367_s3 + $0x2f8] sm:$0xff] }
 0x1a1   :  { %2025 = vmatprep.subr.bf16.mxu0 %v2527_v19  ;;  %v214_v19 = vld [vmem:[%s3367_s3 + $0x338] sm:$0xff] }
 0x1a2   :  { %1014 = vmatpush1.bf16.msra.mxu1 %v2226_v21  ;;  %v2529_v21 = vld [vmem:[#allocation2 + $0xe0] ss:$8 sps:$4 sm:$0xff]  }
 0x1a3   :  { %1015 = vmatprep.subr.bf16.mxu1 %v2235_v22  ;;  %v2315_v22 = vcombine.high %v225_v17, %v229_v18 }
 0x1a4   :  { %2026 = vmatpush1.bf16.msra.mxu0 %v2529_v21 }
 0x1a5   :  { %2027 = vmatprep.subr.bf16.mxu0 %v2530_v25 }
 0x1a6   :  { %1016 = vmatpush1.bf16.msra.mxu1 %v2234_v27  ;;  %v2314_v27 = vcombine.low %v225_v17, %v229_v18  ;;  %v210_v18 = vld [vmem:[%s3367_s3 + $0x318] sm:$0xff] }
 0x1a7   :  { %1017 = vmatprep.subr.bf16.mxu1 %v2243_v28  ;;  %v2323_v28 = vcombine.high %v233_v23, %v237_v24  ;;  %v2301_v21 = vcombine.high %v210_v18, %v214_v19 }
 0x1a8   :  { %2028 = vmatpush1.bf16.msra.mxu0 %v2532_v26  ;;  %v226_v26 = vld [vmem:[%s3367_s3 + $0x398] sm:$0xff] }
 0x1a9   :  { %2040 = vmatprep.subr.bf16.mxu0 %v2535_v34  ;;  %v238_v34 = vld [vmem:[%s3367_s3 + $0x3f8] sm:$0xff] }
 0x1aa   :  { %1018 = vmatpush1.bf16.msra.mxu1 %v2242_v35  ;;  %v2322_v35 = vcombine.low %v233_v23, %v237_v24  ;;  %v222_v23 = vld [vmem:[%s3367_s3 + $0x378] sm:$0xff]  ;;  %v2300_v24 = vcombine.low %v210_v18, %v214_v19  ;;  %v2547_v18 = vld [vmem:[#allocation2 + $0x144] ss:$8 sps:$4 sm:$0xff]   ;;  %v2545_v19 = vld [vmem:[#allocation2 + $0x140] ss:$8 sps:$4 sm:$0xff]  }
 0x1ab   :  { %1019 = vmatprep.subr.bf16.mxu1 %v2251_v36  ;;  %v2205_v36 = vcombine.high %v114_v29, %v118_v30  ;;  %v234_v30 = vld [vmem:[%s3367_s3 + $0x3d8] sm:$0xff] }
 0x1ae   :  { %1020 = vmatpush1.bf16.msra.mxu1 %v2250_v40  ;;  %v2213_v40 = vcombine.high %v122_v37, %v126_v38  ;;  %v2324_v37 = vcombine.low %v234_v30, %v238_v34  ;;  %v3293_v38 = vld [vmem:[%s3368_s4] sm:$0xff] }
 0x1af   :  { %1021 = vmatprep.subr.bf16.mxu1 %v2259_v42  ;;  %v134_v42 = vld [vmem:[%s3367_s3 + $0xb8] sm:$0xff] }
 0x1b0   :  { %v2221_v44 = vcombine.high %v130_v41, %v134_v42  ;;  %v2220_v47 = vcombine.low %v130_v41, %v134_v42 }
 0x1b2   :  { %1022 = vmatpush1.bf16.msra.mxu1 %v2258_v46  ;;  %v142_v46 = vld [vmem:[%s3367_s3 + $0xf8] sm:$0xff] }
 0x1b3   :  { %1023 = vmatprep.subr.bf16.mxu1 %v2267_v48  ;;  %v2229_v48 = vcombine.high %v138_v45, %v142_v46  ;;  %v2228_v50 = vcombine.low %v138_v45, %v142_v46 }
 0x1b6   :  { %1024 = vmatpush1.bf16.msra.mxu1 %v2266_v52  ;;  %v154_v52 = vld [vmem:[%s3367_s3 + $0x158] sm:$0xff] }
 0x1b7   :  { %1025 = vmatprep.subr.bf16.mxu1 %v2275_v56  ;;  %v2245_v57 = vcombine.high %v154_v52, %v158_v55 }
 0x1ba   :  { %1026 = vmatpush1.bf16.msra.mxu1 %v2274_v60  ;;  %v2244_v60 = vcombine.low %v154_v52, %v158_v55 }
 0x1bb   :  { %1027 = vmatprep.subr.bf16.mxu1 %v2283_v62  ;;  %v170_v62 = vld [vmem:[%s3367_s3 + $0x1d8] sm:$0xff] }
 0x1bc   :  { %v2261_v1 = vcombine.high %v170_v62, %v174_v63 }
 0x1be   :  { %1028 = vmatpush1.bf16.msra.mxu1 %v2282_v2  ;;  %v178_v2 = vld [vmem:[%s3367_s3 + $0x218] sm:$0xff] }
 0x1bf   :  { %1029 = vmatprep.subr.bf16.mxu1 %v2291_v4  ;;  %v2260_v4 = vcombine.low %v170_v62, %v174_v63  ;;  %v2269_v5 = vcombine.high %v178_v2, %v182_v3 }
 0x1c2   :  { %1030 = vmatpush1.bf16.msra.mxu1 %v2290_v8  ;;  %v2268_v8 = vcombine.low %v178_v2, %v182_v3 }
 0x1c3   :  { %1031 = vmatprep.subr.bf16.mxu1 %v2299_v10  ;;  %v194_v10 = vld [vmem:[%s3367_s3 + $0x298] sm:$0xff] }
 0x1c4   :  { %v2285_v13 = vcombine.high %v194_v10, %v198_v11 }
 0x1c6   :  { %1032 = vmatpush1.bf16.msra.mxu1 %v2298_v14  ;;  %v202_v14 = vld [vmem:[%s3367_s3 + $0x2d8] sm:$0xff] }
 0x1c7   :  { %1033 = vmatprep.subr.bf16.mxu1 %v2307_v16  ;;  %v2284_v16 = vcombine.low %v194_v10, %v198_v11  ;;  %v2293_v17 = vcombine.high %v202_v14, %v206_v15  ;;  %v2533_v11 = vld [vmem:[#allocation2 + $0x100] ss:$8 sps:$4 sm:$0xff]  }
 0x1ca   :  { %1034 = vmatpush1.bf16.msra.mxu1 %v2306_v20  ;;  %v2292_v20 = vcombine.low %v202_v14, %v206_v15  ;;  %v2541_v14 = vld [vmem:[#allocation2 + $0x124] ss:$8 sps:$4 sm:$0xff]   ;;  %v2539_v15 = vld [vmem:[#allocation2 + $0x120] ss:$8 sps:$4 sm:$0xff]  }
 0x1cb   :  { %1035 = vmatprep.subr.bf16.mxu1 %v2315_v22  ;;  %v218_v22 = vld [vmem:[%s3367_s3 + $0x358] sm:$0xff] }
 0x1cc   :  { %v2309_v25 = vcombine.high %v218_v22, %v222_v23 }
 0x1ce   :  { %1036 = vmatpush1.bf16.msra.mxu1 %v2314_v27  ;;  %v230_v27 = vld [vmem:[%s3367_s3 + $0x3b8] sm:$0xff] }
 0x1cf   :  { %1037 = vmatprep.subr.bf16.mxu1 %v2323_v28  ;;  %v2308_v28 = vcombine.low %v218_v22, %v222_v23  ;;  %v2317_v29 = vcombine.high %v226_v26, %v230_v27  ;;  %v2553_v22 = vld [vmem:[#allocation2 + $0x164] ss:$8 sps:$4 sm:$0xff]   ;;  %v251_v23 = vsub.s32 2, %v2974_v31 }
 0x1d2   :  { %1038 = vmatpush1.bf16.msra.mxu1 %v2322_v35  ;;  %v2316_v35 = vcombine.low %v226_v26, %v230_v27  ;;  %v252_v26 = vrot.slane %v3293_v38, %v251_v23  ;;  %v2556_v27 = vld [vmem:[#allocation2 + $0x174] ss:$8 sps:$4 sm:$0xff]   ;;  %v2584_v23 = vld [vmem:[#allocation2 + $0x210] ss:$8 sps:$4 sm:$0xff]  }
 0x1d3   :  { %1050 = vmatprep.subr.bf16.mxu1 %v2205_v36  ;;  %v2325_v36 = vcombine.high %v234_v30, %v238_v34  ;;  %v2554_v30 = vld [vmem:[#allocation2 + $0x170] ss:$8 sps:$4 sm:$0xff]  }
 0x1d5   :  { %1040 = vmatmul.mubr.bf16.vlgmr.msra.gmra.mrb[8].mxu1 %v3004_v53 }
 0x1d6   :  { %1051 = vmatpush1.bf16.msra.mxu1 %v2204_v39  ;;  %1082 = vmatprep.mubr.bf16.mxu1 %v3002_v58  ;;  %v150_v58 = vld [vmem:[%s3367_s3 + $0x138] sm:$0xff]  ;;  %v244_v39 = vrot.slane %v3293_v38, %v2980_v33 }
 0x1d7   :  { %1052 = vmatprep.subr.bf16.mxu1 %v2213_v40  ;;  %v2237_v51 = vcombine.high %v146_v49, %v150_v58  ;;  %v2236_v56 = vcombine.low %v146_v49, %v150_v58  ;;  %v248_v40 = vrot.slane %v3293_v38, %v2977_v32 }
 0x1da   :  { %1053 = vmatpush1.bf16.msra.mxu1 %v2212_v43 }
 0x1db   :  { %1054 = vmatprep.subr.bf16.mxu1 %v2221_v44 }
 0x1de   :  { %1055 = vmatpush1.bf16.msra.mxu1 %v2220_v47 }
 0x1df   :  { %1056 = vmatprep.subr.bf16.mxu1 %v2229_v48 }
 0x1e2   :  { %1057 = vmatpush1.bf16.msra.mxu1 %v2228_v50 }
 0x1e3   :  { %1058 = vmatprep.subr.bf16.mxu1 %v2237_v51 }
 0x1e6   :  { %1059 = vmatpush1.bf16.msra.mxu1 %v2236_v56 }
 0x1e7   :  { %1060 = vmatprep.subr.bf16.mxu1 %v2245_v57 }
 0x1ea   :  { %1061 = vmatpush1.bf16.msra.mxu1 %v2244_v60 }
 0x1eb   :  { %1062 = vmatprep.subr.bf16.mxu1 %v2253_v61 }
 0x1ee   :  { %1063 = vmatpush1.bf16.msra.mxu1 %v2252_v0 }
 0x1ef   :  { %1064 = vmatprep.subr.bf16.mxu1 %v2261_v1 }
 0x1f2   :  { %1065 = vmatpush1.bf16.msra.mxu1 %v2260_v4 }
 0x1f3   :  { %1066 = vmatprep.subr.bf16.mxu1 %v2269_v5 }
 0x1f6   :  { %1067 = vmatpush1.bf16.msra.mxu1 %v2268_v8 }
 0x1f7   :  { %1068 = vmatprep.subr.bf16.mxu1 %v2277_v9 }
 0x1fa   :  { %1069 = vmatpush1.bf16.msra.mxu1 %v2276_v12  ;;  %v2538_v12 = vld [vmem:[#allocation2 + $0x114] ss:$8 sps:$4 sm:$0xff]  }
 0x1fb   :  { %1070 = vmatprep.subr.bf16.mxu1 %v2285_v13  ;;  %v2536_v13 = vld [vmem:[#allocation2 + $0x110] ss:$8 sps:$4 sm:$0xff]  }
 0x1fe   :  { %1071 = vmatpush1.bf16.msra.mxu1 %v2284_v16  ;;  %v2544_v16 = vld [vmem:[#allocation2 + $0x134] ss:$8 sps:$4 sm:$0xff]  }
 0x1ff   :  { %1072 = vmatprep.subr.bf16.mxu1 %v2293_v17  ;;  %v2542_v17 = vld [vmem:[#allocation2 + $0x130] ss:$8 sps:$4 sm:$0xff]  }
 0x202   :  { %1073 = vmatpush1.bf16.msra.mxu1 %v2292_v20  ;;  %v2550_v20 = vld [vmem:[#allocation2 + $0x154] ss:$8 sps:$4 sm:$0xff]  }
 0x203   :  { %1074 = vmatprep.subr.bf16.mxu1 %v2301_v21  ;;  %v2548_v21 = vld [vmem:[#allocation2 + $0x150] ss:$8 sps:$4 sm:$0xff]  }
 0x206   :  { %1075 = vmatpush1.bf16.msra.mxu1 %v2300_v24  ;;  %v255_v24 = vsub.s32 3, %v2974_v31 }
 0x207   :  { %1076 = vmatprep.subr.bf16.mxu1 %v2309_v25  ;;  %v2551_v25 = vld [vmem:[#allocation2 + $0x160] ss:$8 sps:$4 sm:$0xff]  }
 0x20a   :  { %1077 = vmatpush1.bf16.msra.mxu1 %v2308_v28  ;;  %v256_v28 = vrot.slane %v3293_v38, %v255_v24  ;;  %v2589_v24 = vld [vmem:[#allocation2 + $0x224] ss:$8 sps:$4 sm:$0xff]  }
 0x20b   :  { %1078 = vmatprep.subr.bf16.mxu1 %v2317_v29 }
 0x20e   :  { %1079 = vmatpush1.bf16.msra.mxu1 %v2316_v35 }
 0x20f   :  { %1080 = vmatprep.subr.bf16.mxu1 %v2325_v36  ;;  %v2559_v36 = vld [vmem:[#allocation2 + $0x184] ss:$8 sps:$4 sm:$0xff]  }
 0x212   :  { %1081 = vmatpush1.bf16.msra.mxu1 %v2324_v37 }
 0x215   :  { %1083 = vmatmul.mubr.bf16.vlgmr.msra.gmra.mrb[12].mxu1 %v3004_v53 }
 0x228   :  { %v955_v41 = vpop.f32.mrb[0].mxu1 }
 0x229   :  { %v956_v42 = vadd.f32 %v955_v41, %v244_v39  ;;  %v957_v43 = vpop.f32.mrb[1].mxu1 }
 0x22a   :  { %v958_v44 = vadd.f32 %v957_v43, %v248_v40  ;;  %v959_v45 = vpop.f32.mrb[2].mxu1 }
 0x22b   :  { %v2326_v46 = vmul.f32 -1.702, %v956_v42  ;;  %v960_v47 = vadd.f32 %v959_v45, %v244_v39  ;;  %v961_v48 = vpop.f32.mrb[3].mxu1  ;;  %v2557_v45 = vld [vmem:[#allocation2 + $0x180] ss:$8 sps:$4 sm:$0xff]  }
 0x22c   :  { %v2327_v53 = vmul.f32 -1.702, %v958_v44  ;;  %v962_v49 = vadd.f32 %v961_v48, %v248_v40  ;;  %v2562_v48 = vld [vmem:[#allocation2 + $0x194] ss:$8 sps:$4 sm:$0xff]  }
 0x22d   :  { %v1125_v58 = vmul.f32 1.442695, %v2326_v46  ;;  %v2334_v50 = vmul.f32 -1.702, %v960_v47 }
 0x22e   :  { %v1127_v51 = vmul.f32 1.442695, %v2327_v53  ;;  %v2335_v52 = vmul.f32 -1.702, %v962_v49 }
 0x22f   :  { %2681 = vpow2.f32 %v1125_v58  ;;  %v1141_v55 = vmul.f32 1.442695, %v2334_v50 }
 0x230   :  { %2683 = vpow2.f32 %v1127_v51  ;;  %v1143_v56 = vmul.f32 1.442695, %v2335_v52  ;;  %v2560_v51 = vld [vmem:[#allocation2 + $0x190] ss:$8 sps:$4 sm:$0xff]   ;;  %v2565_v52 = vld [vmem:[#allocation2 + $0x1a4] ss:$8 sps:$4 sm:$0xff]  }
 0x231   :  { %2685 = vpow2.f32 %v1141_v55  ;;  %v2563_v55 = vld [vmem:[#allocation2 + $0x1a0] ss:$8 sps:$4 sm:$0xff]  }
 0x232   :  { %2687 = vpow2.f32 %v1143_v56  ;;  %v2568_v56 = vld [vmem:[#allocation2 + $0x1b4] ss:$8 sps:$4 sm:$0xff]  }
 0x239   :  { %v2682_v57 = vpop.eup %2681 }
 0x23a   :  { %v2684_v54 = vpop.eup %2683  ;;  %v1157_v59 = vadd.f32 1.0, %v2682_v57  ;;  %v2566_v57 = vld [vmem:[#allocation2 + $0x1b0] ss:$8 sps:$4 sm:$0xff]  }
 0x23b   :  { %v2686_v60 = vpop.eup %2685  ;;  %v1158_v61 = vadd.f32 1.0, %v2684_v54 }
 0x23c   :  { %v2688_v62 = vpop.eup %2687  ;;  %2689 = vrcp.f32 %v1157_v59  ;;  %v1165_v63 = vadd.f32 1.0, %v2686_v60  ;;  %v2571_v59 = vld [vmem:[#allocation2 + $0x1c4] ss:$8 sps:$4 sm:$0xff]  }
 0x23d   :  { %2691 = vrcp.f32 %v1158_v61  ;;  %v1166_v0 = vadd.f32 1.0, %v2688_v62 }
 0x23e   :  { %2693 = vrcp.f32 %v1165_v63 }
 0x23f   :  { %2695 = vrcp.f32 %v1166_v0 }
 0x246   :  { %v2690_v1 = vpop.eup %2689 }
 0x247   :  { %v2692_v2 = vpop.eup %2691  ;;  %v1205_v5 = vmul.f32 %v2690_v1, %v956_v42 }
 0x248   :  { %v2694_v3 = vpop.eup %2693  ;;  %v1206_v7 = vmul.f32 %v2692_v2, %v958_v44  ;;  %v2569_v2 = vld [vmem:[#allocation2 + $0x1c0] ss:$8 sps:$4 sm:$0xff]  }
 0x249   :  { %v2696_v4 = vpop.eup %2695  ;;  %v1213_v6 = vmul.f32 %v2694_v3, %v960_v47 }
 0x24a   :  { %v1214_v8 = vmul.f32 %v2696_v4, %v962_v49  ;;  %v2574_v4 = vld [vmem:[#allocation2 + $0x1d4] ss:$8 sps:$4 sm:$0xff]  }
 0x24b   :  { %v1221_v9 = vpack.c.bf16 %v1213_v6, %v1205_v5  ;;  %v2572_v5 = vld [vmem:[#allocation2 + $0x1d0] ss:$8 sps:$4 sm:$0xff]   ;;  %v2577_v6 = vld [vmem:[#allocation2 + $0x1e4] ss:$8 sps:$4 sm:$0xff]  }
 0x24c   :  { %v1222_v10 = vpack.c.bf16 %v1214_v8, %v1206_v7  ;;  %v2575_v7 = vld [vmem:[#allocation2 + $0x1e0] ss:$8 sps:$4 sm:$0xff]   ;;  %v2580_v8 = vld [vmem:[#allocation2 + $0x1f4] ss:$8 sps:$4 sm:$0xff]  }
 0x24e   :  { %2029 = vmatprep.mubr.bf16.mxu0 %v1222_v10 }
 0x24f   :  { %2030 = vmatmul.mubr.bf16.vlgmr.msra.gmra.mrb[0].mxu0 %v1221_v9 }
 0x250   :  { %2041 = vmatpush1.bf16.msra.mxu0 %v2533_v11 }
 0x251   :  { %2042 = vmatprep.subr.bf16.mxu0 %v2538_v12  ;;  %v2578_v12 = vld [vmem:[#allocation2 + $0x1f0] ss:$8 sps:$4 sm:$0xff]  }
 0x254   :  { %2043 = vmatpush1.bf16.msra.mxu0 %v2536_v13 }
 0x255   :  { %2044 = vmatprep.subr.bf16.mxu0 %v2541_v14 }
 0x258   :  { %2045 = vmatpush1.bf16.msra.mxu0 %v2539_v15 }
 0x259   :  { %2046 = vmatprep.subr.bf16.mxu0 %v2544_v16  ;;  %v2583_v16 = vld [vmem:[#allocation2 + $0x204] ss:$8 sps:$4 sm:$0xff]  }
 0x25c   :  { %2047 = vmatpush1.bf16.msra.mxu0 %v2542_v17 }
 0x25d   :  { %2048 = vmatprep.subr.bf16.mxu0 %v2547_v18 }
 0x260   :  { %2049 = vmatpush1.bf16.msra.mxu0 %v2545_v19 }
 0x261   :  { %2050 = vmatprep.subr.bf16.mxu0 %v2550_v20 }
 0x264   :  { %2051 = vmatpush1.bf16.msra.mxu0 %v2548_v21  ;;  %v2581_v21 = vld [vmem:[#allocation2 + $0x200] ss:$8 sps:$4 sm:$0xff]  }
 0x265   :  { %2052 = vmatprep.subr.bf16.mxu0 %v2553_v22  ;;  %v2586_v22 = vld [vmem:[#allocation2 + $0x214] ss:$8 sps:$4 sm:$0xff]  }
 0x268   :  { %v998_v29 = vpop.f32.mrb[4].mxu1  ;;  %2053 = vmatpush1.bf16.msra.mxu0 %v2551_v25  ;;  %v2587_v25 = vld [vmem:[#allocation2 + $0x220] ss:$8 sps:$4 sm:$0xff]  }
 0x269   :  { %v3303_v34 = vadd.f32 %v998_v29, %v252_v26  ;;  %v1000_v35 = vpop.f32.mrb[5].mxu1  ;;  %2054 = vmatprep.subr.bf16.mxu0 %v2556_v27  ;;  %v2590_v27 = vld [vmem:[#allocation2 + $0x230] ss:$8 sps:$4 sm:$0xff]   ;;  %v2593_v29 = vld [vmem:[#allocation2 + $0x240] ss:$8 sps:$4 sm:$0xff]  }
 0x26a   :  { %v3305_v37 = vadd.f32 %v1000_v35, %v256_v28  ;;  %v1002_v39 = vpop.f32.mrb[6].mxu1  ;;  %v2601_v35 = vld [vmem:[#allocation2 + $0x264] ss:$8 sps:$4 sm:$0xff]  }
 0x26b   :  { %v2328_v40 = vmul.f32 -1.702, %v3303_v34  ;;  %v1003_v41 = vadd.f32 %v1002_v39, %v252_v26  ;;  %v1004_v42 = vpop.f32.mrb[7].mxu1  ;;  %v2592_v26 = vld [vmem:[#allocation2 + $0x234] ss:$8 sps:$4 sm:$0xff]  }
 0x26c   :  { %v2329_v43 = vmul.f32 -1.702, %v3305_v37  ;;  %v1005_v44 = vadd.f32 %v1004_v42, %v256_v28  ;;  %2055 = vmatpush1.bf16.msra.mxu0 %v2554_v30  ;;  %v2595_v28 = vld [vmem:[#allocation2 + $0x244] ss:$8 sps:$4 sm:$0xff]   ;;  %v2598_v30 = vld [vmem:[#allocation2 + $0x254] ss:$8 sps:$4 sm:$0xff]  }
 0x26d   :  { %v1129_v46 = vmul.f32 1.442695, %v2328_v40  ;;  %v2336_v47 = vmul.f32 -1.702, %v1003_v41  ;;  %2056 = vmatprep.subr.bf16.mxu0 %v2559_v36  ;;  %v259_v36 = vsub.s32 4, %v2974_v31 }
 0x26e   :  { %v1131_v53 = vmul.f32 1.442695, %v2329_v43  ;;  %v2337_v49 = vmul.f32 -1.702, %v1005_v44  ;;  %v2599_v39 = vld [vmem:[#allocation2 + $0x260] ss:$8 sps:$4 sm:$0xff]  }
 0x26f   :  { %2697 = vpow2.f32 %v1129_v46  ;;  %v1145_v58 = vmul.f32 1.442695, %v2336_v47  ;;  %v260_v40 = vrot.slane %v3293_v38, %v259_v36  ;;  %v2607_v47 = vld [vmem:[#allocation2 + $0x284] ss:$8 sps:$4 sm:$0xff]   ;;  %v2632_v36 = vld [vmem:[#allocation2 + $0x310] ss:$8 sps:$4 sm:$0xff]  }
 0x270   :  { %2699 = vpow2.f32 %v1131_v53  ;;  %v1147_v50 = vmul.f32 1.442695, %v2337_v49  ;;  %2057 = vmatpush1.bf16.msra.mxu0 %v2557_v45 }
 0x271   :  { %2701 = vpow2.f32 %v1145_v58  ;;  %2058 = vmatprep.subr.bf16.mxu0 %v2562_v48 }
 0x272   :  { %2703 = vpow2.f32 %v1147_v50 }
 0x274   :  { %2059 = vmatpush1.bf16.msra.mxu0 %v2560_v51 }
 0x275   :  { %2060 = vmatprep.subr.bf16.mxu0 %v2565_v52 }
 0x278   :  { %2061 = vmatpush1.bf16.msra.mxu0 %v2563_v55  ;;  %v2605_v55 = vld [vmem:[#allocation2 + $0x280] ss:$8 sps:$4 sm:$0xff]  }
 0x279   :  { %v2698_v54 = vpop.eup %2697  ;;  %2062 = vmatprep.subr.bf16.mxu0 %v2568_v56 }
 0x27a   :  { %v2700_v60 = vpop.eup %2699  ;;  %v1159_v61 = vadd.f32 1.0, %v2698_v54  ;;  %v2610_v54 = vld [vmem:[#allocation2 + $0x294] ss:$8 sps:$4 sm:$0xff]  }
 0x27b   :  { %v2702_v62 = vpop.eup %2701  ;;  %v1160_v63 = vadd.f32 1.0, %v2700_v60 }
 0x27c   :  { %v2704_v0 = vpop.eup %2703  ;;  %2705 = vrcp.f32 %v1159_v61  ;;  %v1167_v1 = vadd.f32 1.0, %v2702_v62  ;;  %2063 = vmatpush1.bf16.msra.mxu0 %v2566_v57 }
 0x27d   :  { %2707 = vrcp.f32 %v1160_v63  ;;  %v1168_v3 = vadd.f32 1.0, %v2704_v0  ;;  %2064 = vmatprep.subr.bf16.mxu0 %v2571_v59  ;;  %v2608_v63 = vld [vmem:[#allocation2 + $0x290] ss:$8 sps:$4 sm:$0xff]   ;;  %v2613_v0 = vld [vmem:[#allocation2 + $0x2a4] ss:$8 sps:$4 sm:$0xff]  }
 0x27e   :  { %2709 = vrcp.f32 %v1167_v1  ;;  %v2611_v1 = vld [vmem:[#allocation2 + $0x2a0] ss:$8 sps:$4 sm:$0xff]  }
 0x27f   :  { %2711 = vrcp.f32 %v1168_v3  ;;  %v2614_v3 = vld [vmem:[#allocation2 + $0x2b0] ss:$8 sps:$4 sm:$0xff]  }
 0x280   :  { %2065 = vmatpush1.bf16.msra.mxu0 %v2569_v2  ;;  %v2616_v2 = vld [vmem:[#allocation2 + $0x2b4] ss:$8 sps:$4 sm:$0xff]  }
 0x281   :  { %2066 = vmatprep.subr.bf16.mxu0 %v2574_v4 }
 0x284   :  { %2067 = vmatpush1.bf16.msra.mxu0 %v2572_v5  ;;  %v2619_v5 = vld [vmem:[#allocation2 + $0x2c4] ss:$8 sps:$4 sm:$0xff]  }
 0x285   :  { %2068 = vmatprep.subr.bf16.mxu0 %v2577_v6 }
 0x286   :  { %v2706_v9 = vpop.eup %2705 }
 0x287   :  { %v2708_v10 = vpop.eup %2707  ;;  %v1207_v14 = vmul.f32 %v2706_v9, %v3303_v34  ;;  %v2596_v34 = vld [vmem:[#allocation2 + $0x250] ss:$8 sps:$4 sm:$0xff]  }
 0x288   :  { %v2710_v11 = vpop.eup %2709  ;;  %2069 = vmatpush1.bf16.msra.mxu0 %v2575_v7  ;;  %v1208_v17 = vmul.f32 %v2708_v10, %v3305_v37  ;;  %v263_v37 = vsub.s32 5, %v2974_v31 }
 0x289   :  { %v2712_v13 = vpop.eup %2711  ;;  %v1215_v15 = vmul.f32 %v2710_v11, %v1003_v41  ;;  %2070 = vmatprep.subr.bf16.mxu0 %v2580_v8  ;;  %v2604_v41 = vld [vmem:[#allocation2 + $0x274] ss:$8 sps:$4 sm:$0xff]  }
 0x28a   :  { %v1216_v18 = vmul.f32 %v2712_v13, %v1005_v44  ;;  %v264_v42 = vrot.slane %v3293_v38, %v263_v37  ;;  %v2602_v44 = vld [vmem:[#allocation2 + $0x270] ss:$8 sps:$4 sm:$0xff]   ;;  %v2637_v37 = vld [vmem:[#allocation2 + $0x324] ss:$8 sps:$4 sm:$0xff]  }
 0x28b   :  { %v1223_v19 = vpack.c.bf16 %v1215_v15, %v1207_v14  ;;  %v2622_v14 = vld [vmem:[#allocation2 + $0x2d4] ss:$8 sps:$4 sm:$0xff]   ;;  %v2620_v15 = vld [vmem:[#allocation2 + $0x2d0] ss:$8 sps:$4 sm:$0xff]  }
 0x28c   :  { %2071 = vmatpush1.bf16.msra.mxu0 %v2578_v12  ;;  %v1224_v20 = vpack.c.bf16 %v1216_v18, %v1208_v17  ;;  %v2617_v12 = vld [vmem:[#allocation2 + $0x2c0] ss:$8 sps:$4 sm:$0xff]   ;;  %v2628_v18 = vld [vmem:[#allocation2 + $0x2f4] ss:$8 sps:$4 sm:$0xff]  }
 0x28d   :  { %2083 = vmatprep.subr.bf16.mxu0 %v2583_v16  ;;  %v2625_v16 = vld [vmem:[#allocation2 + $0x2e4] ss:$8 sps:$4 sm:$0xff]   ;;  %v2623_v17 = vld [vmem:[#allocation2 + $0x2e0] ss:$8 sps:$4 sm:$0xff]  }
 0x28e   :  { %2072 = vmatprep.mubr.bf16.mxu0 %v1224_v20 }
 0x28f   :  { %2073 = vmatmul.mubr.bf16.vlgmr.msra.gmra.mrb[0].mxu0 %v1223_v19 }
 0x290   :  { %2084 = vmatpush1.bf16.msra.mxu0 %v2581_v21 }
 0x291   :  { %2085 = vmatprep.subr.bf16.mxu0 %v2586_v22  ;;  %v2626_v22 = vld [vmem:[#allocation2 + $0x2f0] ss:$8 sps:$4 sm:$0xff]  }
 0x294   :  { %2086 = vmatpush1.bf16.msra.mxu0 %v2584_v23 }
 0x295   :  { %2087 = vmatprep.subr.bf16.mxu0 %v2589_v24 }
 0x298   :  { %2088 = vmatpush1.bf16.msra.mxu0 %v2587_v25 }
 0x299   :  { %2089 = vmatprep.subr.bf16.mxu0 %v2592_v26  ;;  %v2631_v26 = vld [vmem:[#allocation2 + $0x304] ss:$8 sps:$4 sm:$0xff]  }
 0x29c   :  { %2090 = vmatpush1.bf16.msra.mxu0 %v2590_v27 }
 0x29d   :  { %2091 = vmatprep.subr.bf16.mxu0 %v2595_v28 }
 0x2a0   :  { %2092 = vmatpush1.bf16.msra.mxu0 %v2593_v29 }
 0x2a1   :  { %2093 = vmatprep.subr.bf16.mxu0 %v2598_v30 }
 0x2a4   :  { %2094 = vmatpush1.bf16.msra.mxu0 %v2596_v34  ;;  %v2629_v34 = vld [vmem:[#allocation2 + $0x300] ss:$8 sps:$4 sm:$0xff]  }
 0x2a5   :  { %2095 = vmatprep.subr.bf16.mxu0 %v2601_v35  ;;  %v2634_v35 = vld [vmem:[#allocation2 + $0x314] ss:$8 sps:$4 sm:$0xff]  }
 0x2a8   :  { %v1041_v43 = vpop.f32.mrb[8].mxu1  ;;  %2096 = vmatpush1.bf16.msra.mxu0 %v2599_v39  ;;  %v2635_v39 = vld [vmem:[#allocation2 + $0x320] ss:$8 sps:$4 sm:$0xff]  }
 0x2a9   :  { %v3315_v45 = vadd.f32 %v1041_v43, %v260_v40  ;;  %v1043_v46 = vpop.f32.mrb[9].mxu1  ;;  %2097 = vmatprep.subr.bf16.mxu0 %v2604_v41  ;;  %v2638_v41 = vld [vmem:[#allocation2 + $0x330] ss:$8 sps:$4 sm:$0xff]   ;;  %v2641_v43 = vld [vmem:[#allocation2 + $0x340] ss:$8 sps:$4 sm:$0xff]  }
 0x2aa   :  { %v3317_v48 = vadd.f32 %v1043_v46, %v264_v42  ;;  %v1045_v53 = vpop.f32.mrb[10].mxu1  ;;  %v2649_v46 = vld [vmem:[#allocation2 + $0x364] ss:$8 sps:$4 sm:$0xff]  }
 0x2ab   :  { %v2330_v49 = vmul.f32 -1.702, %v3315_v45  ;;  %v1046_v58 = vadd.f32 %v1045_v53, %v260_v40  ;;  %v1047_v50 = vpop.f32.mrb[11].mxu1  ;;  %v2640_v40 = vld [vmem:[#allocation2 + $0x334] ss:$8 sps:$4 sm:$0xff]  }
 0x2ac   :  { %v2331_v51 = vmul.f32 -1.702, %v3317_v48  ;;  %v1048_v52 = vadd.f32 %v1047_v50, %v264_v42  ;;  %2098 = vmatpush1.bf16.msra.mxu0 %v2602_v44  ;;  %v2643_v42 = vld [vmem:[#allocation2 + $0x344] ss:$8 sps:$4 sm:$0xff]   ;;  %v2646_v44 = vld [vmem:[#allocation2 + $0x354] ss:$8 sps:$4 sm:$0xff]  }
 0x2ad   :  { %v1133_v56 = vmul.f32 1.442695, %v2330_v49  ;;  %v2338_v57 = vmul.f32 -1.702, %v1046_v58  ;;  %2099 = vmatprep.subr.bf16.mxu0 %v2607_v47  ;;  %v267_v47 = vsub.s32 6, %v2974_v31 }
 0x2ae   :  { %v1135_v59 = vmul.f32 1.442695, %v2331_v51  ;;  %v2339_v60 = vmul.f32 -1.702, %v1048_v52  ;;  %v2647_v53 = vld [vmem:[#allocation2 + $0x360] ss:$8 sps:$4 sm:$0xff]  }
 0x2af   :  { %2713 = vpow2.f32 %v1133_v56  ;;  %v1149_v61 = vmul.f32 1.442695, %v2338_v57  ;;  %v268_v49 = vrot.slane %v3293_v38, %v267_v47  ;;  %v2655_v57 = vld [vmem:[#allocation2 + $0x384] ss:$8 sps:$4 sm:$0xff]  }
 0x2b0   :  { %2715 = vpow2.f32 %v1135_v59  ;;  %v1151_v62 = vmul.f32 1.442695, %v2339_v60  ;;  %2100 = vmatpush1.bf16.msra.mxu0 %v2605_v55 }
 0x2b1   :  { %2717 = vpow2.f32 %v1149_v61  ;;  %2101 = vmatprep.subr.bf16.mxu0 %v2610_v54 }
 0x2b2   :  { %2719 = vpow2.f32 %v1151_v62 }
 0x2b4   :  { %2102 = vmatpush1.bf16.msra.mxu0 %v2608_v63 }
 0x2b5   :  { %2103 = vmatprep.subr.bf16.mxu0 %v2613_v0 }
 0x2b8   :  { %2104 = vmatpush1.bf16.msra.mxu0 %v2611_v1 }
 0x2b9   :  { %v2714_v4 = vpop.eup %2713  ;;  %2105 = vmatprep.subr.bf16.mxu0 %v2616_v2  ;;  %v2658_v2 = vld [vmem:[#allocation2 + $0x394] ss:$8 sps:$4 sm:$0xff]  }
 0x2ba   :  { %v2716_v6 = vpop.eup %2715  ;;  %v1161_v7 = vadd.f32 1.0, %v2714_v4 }
 0x2bb   :  { %v2718_v8 = vpop.eup %2717  ;;  %v1162_v9 = vadd.f32 1.0, %v2716_v6 }
 0x2bc   :  { %v2720_v10 = vpop.eup %2719  ;;  %2721 = vrcp.f32 %v1161_v7  ;;  %v1169_v11 = vadd.f32 1.0, %v2718_v8  ;;  %2106 = vmatpush1.bf16.msra.mxu0 %v2614_v3  ;;  %v2656_v7 = vld [vmem:[#allocation2 + $0x390] ss:$8 sps:$4 sm:$0xff]   ;;  %v2661_v8 = vld [vmem:[#allocation2 + $0x3a4] ss:$8 sps:$4 sm:$0xff]  }
 0x2bd   :  { %2723 = vrcp.f32 %v1162_v9  ;;  %v1170_v13 = vadd.f32 1.0, %v2720_v10  ;;  %2107 = vmatprep.subr.bf16.mxu0 %v2619_v5  ;;  %v2659_v9 = vld [vmem:[#allocation2 + $0x3a0] ss:$8 sps:$4 sm:$0xff]   ;;  %v2664_v10 = vld [vmem:[#allocation2 + $0x3b4] ss:$8 sps:$4 sm:$0xff]  }
 0x2be   :  { %2725 = vrcp.f32 %v1169_v11  ;;  %v2662_v11 = vld [vmem:[#allocation2 + $0x3b0] ss:$8 sps:$4 sm:$0xff]  }
 0x2bf   :  { %2727 = vrcp.f32 %v1170_v13  ;;  %v2667_v13 = vld [vmem:[#allocation2 + $0x3c4] ss:$8 sps:$4 sm:$0xff]  }
 0x2c0   :  { %2108 = vmatpush1.bf16.msra.mxu0 %v2617_v12 }
 0x2c1   :  { %2109 = vmatprep.subr.bf16.mxu0 %v2622_v14 }
 0x2c4   :  { %2110 = vmatpush1.bf16.msra.mxu0 %v2620_v15 }
 0x2c5   :  { %2111 = vmatprep.subr.bf16.mxu0 %v2625_v16 }
 0x2c6   :  { %v2722_v19 = vpop.eup %2721 }
 0x2c7   :  { %v2724_v20 = vpop.eup %2723  ;;  %v1209_v24 = vmul.f32 %v2722_v19, %v3315_v45  ;;  %v2644_v45 = vld [vmem:[#allocation2 + $0x350] ss:$8 sps:$4 sm:$0xff]  }
 0x2c8   :  { %v2726_v21 = vpop.eup %2725  ;;  %2112 = vmatpush1.bf16.msra.mxu0 %v2623_v17  ;;  %v1210_v27 = vmul.f32 %v2724_v20, %v3317_v48  ;;  %v271_v48 = vsub.s32 7, %v2974_v31  ;;  %v2665_v20 = vld [vmem:[#allocation2 + $0x3c0] ss:$8 sps:$4 sm:$0xff]  }
 0x2c9   :  { %v2728_v23 = vpop.eup %2727  ;;  %v1217_v25 = vmul.f32 %v2726_v21, %v1046_v58  ;;  %2113 = vmatprep.subr.bf16.mxu0 %v2628_v18  ;;  %v2652_v58 = vld [vmem:[#allocation2 + $0x374] ss:$8 sps:$4 sm:$0xff]  }
 0x2ca   :  { %v1218_v28 = vmul.f32 %v2728_v23, %v1048_v52  ;;  %v272_v50 = vrot.slane %v3293_v38, %v271_v48  ;;  %v2650_v52 = vld [vmem:[#allocation2 + $0x370] ss:$8 sps:$4 sm:$0xff]   ;;  %v2653_v38 = vld [vmem:[#allocation2 + $0x380] ss:$8 sps:$4 sm:$0xff]  }
 0x2cb   :  { %v1225_v29 = vpack.c.bf16 %v1217_v25, %v1209_v24  ;;  %v2668_v23 = vld [vmem:[#allocation2 + $0x3d0] ss:$8 sps:$4 sm:$0xff]   ;;  %v2673_v24 = vld [vmem:[#allocation2 + $0x3e4] ss:$8 sps:$4 sm:$0xff]   ;;  %v2671_v25 = vld [vmem:[#allocation2 + $0x3e0] ss:$8 sps:$4 sm:$0xff]  }
 0x2cc   :  { %2114 = vmatpush1.bf16.msra.mxu0 %v2626_v22  ;;  %v1226_v30 = vpack.c.bf16 %v1218_v28, %v1210_v27  ;;  %v2670_v22 = vld [vmem:[#allocation2 + $0x3d4] ss:$8 sps:$4 sm:$0xff]  }
 0x2cd   :  { %2126 = vmatprep.subr.bf16.mxu0 %v2631_v26  ;;  %v2676_v26 = vld [vmem:[#allocation2 + $0x3f4] ss:$8 sps:$4 sm:$0xff]  }
 0x2ce   :  { %2115 = vmatprep.mubr.bf16.mxu0 %v1226_v30  ;;  %v2674_v30 = vld [vmem:[#allocation2 + $0x3f0] ss:$8 sps:$4 sm:$0xff]  }
 0x2cf   :  { %2116 = vmatmul.mubr.bf16.vlgmr.msra.gmra.mrb[0].mxu0 %v1225_v29 }
 0x2d0   :  { %2127 = vmatpush1.bf16.msra.mxu0 %v2629_v34 }
 0x2d1   :  { %2128 = vmatprep.subr.bf16.mxu0 %v2634_v35 }
 0x2d4   :  { %2129 = vmatpush1.bf16.msra.mxu0 %v2632_v36 }
 0x2d5   :  { %2130 = vmatprep.subr.bf16.mxu0 %v2637_v37 }
 0x2d8   :  { %2131 = vmatpush1.bf16.msra.mxu0 %v2635_v39 }
 0x2d9   :  { %2132 = vmatprep.subr.bf16.mxu0 %v2640_v40 }
 0x2dc   :  { %2133 = vmatpush1.bf16.msra.mxu0 %v2638_v41 }
 0x2dd   :  { %2134 = vmatprep.subr.bf16.mxu0 %v2643_v42  ;;  %v2173_v42 = vld [vmem:[%s3370_s6] sm:$0x3] }
 0x2e0   :  { %2135 = vmatpush1.bf16.msra.mxu0 %v2641_v43  ;;  %v2178_v43 = vrot.slane %v2173_v42, %v2980_v33  ;;  %v2747_v33 = vld [vmem:[%s3364_s0 + $0x10] sm:$0xff] }
 0x2e1   :  { %2136 = vmatprep.subr.bf16.mxu0 %v2646_v44 }
 0x2e4   :  { %2137 = vmatpush1.bf16.msra.mxu0 %v2644_v45  ;;  %v2182_v45 = vrot.slane %v2173_v42, %v2977_v32 }
 0x2e5   :  { %2138 = vmatprep.subr.bf16.mxu0 %v2649_v46  ;;  %v2745_v46 = vld [vmem:[%s3364_s0] sm:$0xff] }
 0x2e8   :  { %v1084_v51 = vpop.f32.mrb[12].mxu1  ;;  %2139 = vmatpush1.bf16.msra.mxu0 %v2647_v53  ;;  %v2746_v53 = vld [vmem:[%s3364_s0 + $0x8] sm:$0xff] }
 0x2e9   :  { %v3327_v55 = vadd.f32 %v1084_v51, %v268_v49  ;;  %v1086_v56 = vpop.f32.mrb[13].mxu1  ;;  %2140 = vmatprep.subr.bf16.mxu0 %v2652_v58 }
 0x2ea   :  { %v3329_v54 = vadd.f32 %v1086_v56, %v272_v50  ;;  %v1088_v59 = vpop.f32.mrb[14].mxu1 }
 0x2eb   :  { %v2332_v31 = vmul.f32 -1.702, %v3327_v55  ;;  %v1089_v60 = vadd.f32 %v1088_v59, %v268_v49  ;;  %v1090_v61 = vpop.f32.mrb[15].mxu1 }
 0x2ec   :  { %v2333_v62 = vmul.f32 -1.702, %v3329_v54  ;;  %v1091_v63 = vadd.f32 %v1090_v61, %v272_v50  ;;  %2141 = vmatpush1.bf16.msra.mxu0 %v2650_v52 }
 0x2ed   :  { %v1137_v0 = vmul.f32 1.442695, %v2332_v31  ;;  %v2340_v1 = vmul.f32 -1.702, %v1089_v60  ;;  %2142 = vmatprep.subr.bf16.mxu0 %v2655_v57 }
 0x2ee   :  { %v1139_v3 = vmul.f32 1.442695, %v2333_v62  ;;  %v2341_v4 = vmul.f32 -1.702, %v1091_v63 }
 0x2ef   :  { %2729 = vpow2.f32 %v1137_v0  ;;  %v1153_v5 = vmul.f32 1.442695, %v2340_v1 }
 0x2f0   :  { %2731 = vpow2.f32 %v1139_v3  ;;  %v1155_v6 = vmul.f32 1.442695, %v2341_v4  ;;  %2143 = vmatpush1.bf16.msra.mxu0 %v2653_v38 }
 0x2f1   :  { %2733 = vpow2.f32 %v1153_v5  ;;  %2144 = vmatprep.subr.bf16.mxu0 %v2658_v2 }
 0x2f2   :  { %2735 = vpow2.f32 %v1155_v6 }
 0x2f4   :  { %2145 = vmatpush1.bf16.msra.mxu0 %v2656_v7 }
 0x2f5   :  { %2146 = vmatprep.subr.bf16.mxu0 %v2661_v8 }
 0x2f8   :  { %2147 = vmatpush1.bf16.msra.mxu0 %v2659_v9 }
 0x2f9   :  { %v2730_v12 = vpop.eup %2729  ;;  %2148 = vmatprep.subr.bf16.mxu0 %v2664_v10 }
 0x2fa   :  { %v2732_v14 = vpop.eup %2731  ;;  %v1163_v15 = vadd.f32 1.0, %v2730_v12 }
 0x2fb   :  { %v2734_v16 = vpop.eup %2733  ;;  %v1164_v17 = vadd.f32 1.0, %v2732_v14 }
 0x2fc   :  { %v2736_v18 = vpop.eup %2735  ;;  %2737 = vrcp.f32 %v1163_v15  ;;  %v1171_v19 = vadd.f32 1.0, %v2734_v16  ;;  %2149 = vmatpush1.bf16.msra.mxu0 %v2662_v11 }
 0x2fd   :  { %2739 = vrcp.f32 %v1164_v17  ;;  %v1172_v21 = vadd.f32 1.0, %v2736_v18  ;;  %2150 = vmatprep.subr.bf16.mxu0 %v2667_v13 }
 0x2fe   :  { %2741 = vrcp.f32 %v1171_v19 }
 0x2ff   :  { %2743 = vrcp.f32 %v1172_v21 }
 0x300   :  { %2151 = vmatpush1.bf16.msra.mxu0 %v2665_v20 }
 0x301   :  { %2152 = vmatprep.subr.bf16.mxu0 %v2670_v22 }
 0x304   :  { %2153 = vmatpush1.bf16.msra.mxu0 %v2668_v23 }
 0x305   :  { %2154 = vmatprep.subr.bf16.mxu0 %v2673_v24 }
 0x306   :  { %v2738_v27 = vpop.eup %2737 }
 0x307   :  { %v2740_v28 = vpop.eup %2739  ;;  %v1211_v35 = vmul.f32 %v2738_v27, %v3327_v55  ;;  %v2748_v55 = vld [vmem:[%s3364_s0 + $0x18] sm:$0xff] }
 0x308   :  { %v2742_v29 = vpop.eup %2741  ;;  %2155 = vmatpush1.bf16.msra.mxu0 %v2671_v25  ;;  %v1212_v37 = vmul.f32 %v2740_v28, %v3329_v54 }
 0x309   :  { %v2744_v34 = vpop.eup %2743  ;;  %v1219_v36 = vmul.f32 %v2742_v29, %v1089_v60  ;;  %2156 = vmatprep.subr.bf16.mxu0 %v2676_v26 }
 0x30a   :  { %v1220_v39 = vmul.f32 %v2744_v34, %v1091_v63 }
 0x30b   :  { %v1227_v40 = vpack.c.bf16 %v1219_v36, %v1211_v35 }
 0x30c   :  { %2157 = vmatpush1.bf16.msra.mxu0 %v2674_v30  ;;  %v1228_v41 = vpack.c.bf16 %v1220_v39, %v1212_v37 }
 0x30e   :  { %2158 = vmatprep.mubr.bf16.mxu0 %v1228_v41 }
 0x30f   :  { %2159 = vmatmul.mubr.bf16.vlgmr.msra.gmra.mrb[0].mxu0 %v1227_v40 }
 0x3e2   :  { %v2160_v44 = vpop.f32.mrb[0].mxu0 }
 0x3e3   :  { %v2169_v47 = vadd.f32 %v2745_v46, %v2160_v44  ;;  %v2162_v48 = vpop.f32.mrb[1].mxu0 }
 0x3e4   :  { %v2170_v49 = vadd.f32 %v2746_v53, %v2162_v48  ;;  %v2164_v58 = vpop.f32.mrb[2].mxu0 }
 0x3e5   :  { %v2185_v50 = vadd.f32 %v2178_v43, %v2169_v47  ;;  %v2171_v51 = vadd.f32 %v2747_v33, %v2164_v58  ;;  %v2166_v52 = vpop.f32.mrb[3].mxu0 }
 0x3e6   :  { %v2186_v32 = vadd.f32 %v2182_v45, %v2170_v49  ;;  %v2172_v56 = vadd.f32 %v2748_v55, %v2166_v52 }
 0x3e7   :  { %2189 = vst [vmem:[%s3371_s7] sm:$0xff] %v2185_v50  ;;  %v2187_v57 = vadd.f32 %v2178_v43, %v2171_v51 }
 0x3e8   :  { %2190 = vst [vmem:[%s3371_s7 + $0x8] sm:$0xff] %v2186_v32  ;;  %v2188_v54 = vadd.f32 %v2182_v45, %v2172_v56 }
 0x3e9   :  { %2191 = vst [vmem:[%s3371_s7 + $0x10] sm:$0xff] %v2187_v57 }
 0x3ea   :  { %2192 = vst [vmem:[%s3371_s7 + $0x18] sm:$0xff] %v2188_v54 }
 0x3eb   :  { %2197 = vsyncpa [#allocation3], 1 }

// kernel: run.6
= control target key start
LH: loop header
LB: loop body
LE: loop exit
PB: predicated region body
PF: predicated region fallthrough
CT: control target
= control target key end

     0   :  { %10 = vsyncpa [#allocation3], 0  ;;  %s1455_s0 = inlined_call_operand.vmem [shape: f32[16,256], index: 0, kind: input, shape index: {}]   ;;  %s1456_s1 = inlined_call_operand.hbm [shape: f32[1,256], index: 1, kind: input, shape index: {}]   ;;  %s1457_s2 = inlined_call_operand.hbm [shape: f32[1,256], index: 2, kind: input, shape index: {}]   ;;  %s1458_s3 = inlined_call_operand.hbm [shape: bf16[256,768], index: 3, kind: input, shape index: {}]   ;;  %s1459_s4 = inlined_call_operand.hbm [shape: f32[1,768], index: 4, kind: input, shape index: {}]   ;;  %s1460_s5 = inlined_call_operand.vmem [shape: bf16[16,768], index: 5, kind: output, shape index: {}]  }
   0x1   :  { %11 = vsyncpa [#allocation5], 0 }
   0x2   :  { %12 = vsyncpa [#allocation8], 0  ;;  %s1282_s18 = smov [#allocation4]   ;;  %s1283_s20 = smov [#allocation2]  }
   0x3   :  { %s31_s19 = sshll.u32 %s1282_s18, 4  ;;  %s21_s21 = sshll.u32 %s1283_s20, 4  ;;  %s32_s19 = int_to_ptr.vmem [resolvable:$true] %s31_s19  ;;  %s22_s21 = int_to_ptr.vmem [resolvable:$true] %s21_s21 }
   0x4   :  { %s1188_s24 = scalar_lea.hbm %s1457_s2, 32 }
   0x5   :  { %p1189_p0 = scmp.ne.s32.totalorder %s1457_s2, %s1188_s24  ;;  %p1192_p1 = scmp.lt.u32.totalorder %s1188_s24, %s1457_s2 }
   0x7   :  { %p1194_p2 = pnand %p1192_p1, %p1189_p0 }
   0x9   :  { %1197 = shalt.err (!%p1194_p2)
}
   0xa   :  { %s1198_s29 = scalar_lea.vmem %s32_s19, 32  ;;  %p1203_p4 = scmp.lt.s32.totalorder %s32_s19, %s32_s19 }
   0xb   :  { %p1199_p3 = scmp.ne.s32.totalorder %s32_s19, %s1198_s29  ;;  %p1204_p5 = scmp.lt.s32.totalorder %s1198_s29, %s1198_s29 }
   0xd   :  { %p1205_p6 = por %p1204_p5, %p1203_p4 }
   0xf   :  { %p1206_p7 = pnand %p1205_p6, %p1199_p3 }
  0x11   :  { %1209 = shalt.err (!%p1206_p7)
}
  0x12   :  { %34 = dma.hbm_to_vmem [thread:$0]  %s1457_s2, 32, %s32_s19, [#allocation5]  }
  0x13   :  { %s1210_s9 = scalar_lea.hbm %s1456_s1, 32 }
  0x14   :  { %p1211_p8 = scmp.ne.s32.totalorder %s1456_s1, %s1210_s9  ;;  %p1214_p9 = scmp.lt.u32.totalorder %s1210_s9, %s1456_s1 }
  0x16   :  { %p1216_p10 = pnand %p1214_p9, %p1211_p8 }
  0x18   :  { %1219 = shalt.err (!%p1216_p10)
}
  0x19   :  { %s1220_s14 = scalar_lea.vmem %s22_s21, 32  ;;  %p1225_p12 = scmp.lt.s32.totalorder %s22_s21, %s22_s21 }
  0x1a   :  { %p1221_p11 = scmp.ne.s32.totalorder %s22_s21, %s1220_s14  ;;  %p1226_p13 = scmp.lt.s32.totalorder %s1220_s14, %s1220_s14 }
  0x1c   :  { %p1227_p0 = por %p1226_p13, %p1225_p12 }
  0x1e   :  { %p1228_p1 = pnand %p1227_p0, %p1221_p11 }
  0x20   :  { %1231 = shalt.err (!%p1228_p1)
}
  0x21   :  { %24 = dma.hbm_to_vmem [thread:$0]  %s1456_s1, 32, %s22_s21, [#allocation3]  }
  0x22   :  { %s1284_s16 = smov [#allocation6]   ;;  %s1232_s20 = scalar_lea.hbm %s1458_s3, 12288 }
  0x23   :  { %s40_s17 = sshll.u32 %s1284_s16, 4  ;;  %p1233_p2 = scmp.ne.s32.totalorder %s1458_s3, %s1232_s20  ;;  %s41_s17 = int_to_ptr.vmem [resolvable:$true] %s40_s17 }
  0x24   :  { %p1236_p3 = scmp.lt.u32.totalorder %s1232_s20, %s1458_s3 }
  0x26   :  { %p1238_p4 = pnand %p1236_p3, %p1233_p2 }
  0x28   :  { %1241 = shalt.err (!%p1238_p4)
}
  0x29   :  { %s1242_s26 = scalar_lea.vmem %s41_s17, 12288  ;;  %p1247_p6 = scmp.lt.s32.totalorder %s41_s17, %s41_s17 }
  0x2a   :  { %p1243_p5 = scmp.ne.s32.totalorder %s41_s17, %s1242_s26  ;;  %p1248_p7 = scmp.lt.s32.totalorder %s1242_s26, %s1242_s26 }
  0x2c   :  { %p1249_p8 = por %p1248_p7, %p1247_p6 }
  0x2e   :  { %p1250_p9 = pnand %p1249_p8, %p1243_p5 }
  0x30   :  { %1253 = shalt.err (!%p1250_p9)
}
  0x31   :  { %s1285_s1 = smov 384   ;;  %s1286_s21 = smov 24  }
  0x32   :  { %46 = dma.hbm_to_vmem [thread:$0]  %s1458_s3, 12288, %s41_s17, [#allocation5], %s1285_s1, %s1285_s1, %s1286_s21  }
  0x33   :  { %s1287_s29 = smov [#allocation7]   ;;  %s1254_s8 = scalar_lea.hbm %s1459_s4, 96 }
  0x34   :  { %s53_s30 = sshll.u32 %s1287_s29, 4  ;;  %p1255_p10 = scmp.ne.s32.totalorder %s1459_s4, %s1254_s8  ;;  %s54_s30 = int_to_ptr.vmem [resolvable:$true] %s53_s30 }
  0x35   :  { %p1258_p11 = scmp.lt.u32.totalorder %s1254_s8, %s1459_s4 }
  0x37   :  { %p1260_p12 = pnand %p1258_p11, %p1255_p10 }
  0x39   :  { %1263 = shalt.err (!%p1260_p12)
}
  0x3a   :  { %s1264_s13 = scalar_lea.vmem %s54_s30, 96  ;;  %p1269_p0 = scmp.lt.s32.totalorder %s54_s30, %s54_s30 }
  0x3b   :  { %p1265_p13 = scmp.ne.s32.totalorder %s54_s30, %s1264_s13  ;;  %p1270_p1 = scmp.lt.s32.totalorder %s1264_s13, %s1264_s13 }
  0x3d   :  { %p1271_p2 = por %p1270_p1, %p1269_p0 }
  0x3f   :  { %p1272_p3 = pnand %p1271_p2, %p1265_p13 }
  0x41   :  { %1275 = shalt.err (!%p1272_p3)
}
  0x42   :  { %56 = dma.hbm_to_vmem [thread:$0]  %s1459_s4, 96, %s54_s30, [#allocation8]  }
  0x43   :  { %1276 = dma.done.wait [#allocation3], 32  }
  0x44   :  { %1277 = vsyncadd [#allocation3], 4294967264 }
  0x45   :  { %1278 = dma.done.wait [#allocation5], 12320  }
  0x46   :  { %1279 = vsyncadd [#allocation5], 4294954976 }
  0x47   :  { %1280 = dma.done.wait [#allocation8], 96  }
  0x48   :  { %1281 = vsyncadd [#allocation8], 4294967200  ;;  %v1369_v0 = vld [vmem:[%s1455_s0] sm:$0xff]  ;;  %v1374_v1 = vld [vmem:[%s1455_s0 + $0x8] sm:$0xff] }
  0x49   :  { %v1379_v2 = vld [vmem:[%s1455_s0 + $0x10] sm:$0xff]  ;;  %v73_v3 = vadd.f32 %v1374_v1, %v1369_v0  ;;  %v1386_v4 = vld [vmem:[%s1455_s0 + $0x18] sm:$0xff]  ;;  %v1040_v6 = vld [vmem:[#allocation6 + $0x4] ss:$24 sps:$4 sm:$0xff]  }
  0x4a   :  { %v76_v5 = vadd.f32 %v1386_v4, %v1379_v2  ;;  %v1042_v7 = vld [vmem:[#allocation6] ss:$24 sps:$4 sm:$0xff]   ;;  %v1043_v8 = vld [vmem:[#allocation6 + $0xc] ss:$24 sps:$4 sm:$0xff]   ;;  %748 = vmatprep.subr.bf16.mxu0 %v1040_v6  ;;  %v1049_v11 = vld [vmem:[#allocation6 + $0x3c] ss:$24 sps:$4 sm:$0xff]  }
  0x4b   :  { %74 = vadd.xlane.f32.xlu0 %v73_v3  ;;  %v1045_v9 = vld [vmem:[#allocation6 + $0x8] ss:$24 sps:$4 sm:$0xff]   ;;  %v1046_v10 = vld [vmem:[#allocation6 + $0x34] ss:$24 sps:$4 sm:$0xff]   ;;  %791 = vmatprep.subr.bf16.mxu1 %v1043_v8  ;;  %v1051_v13 = vld [vmem:[#allocation6 + $0x38] ss:$24 sps:$4 sm:$0xff]  }
  0x4c   :  { %749 = vmatpush1.bf16.msra.mxu0 %v1042_v7  ;;  %792 = vmatpush1.bf16.msra.mxu1 %v1045_v9  ;;  %v1048_v12 = vld [vmem:[#allocation6 + $0x30] ss:$24 sps:$4 sm:$0xff]   ;;  %v1052_v14 = vld [vmem:[#allocation6 + $0x64] ss:$24 sps:$4 sm:$0xff]   ;;  %v1054_v16 = vld [vmem:[#allocation6 + $0x60] ss:$24 sps:$4 sm:$0xff]  }
  0x4d   :  { %750 = vmatprep.subr.bf16.mxu0 %v1046_v10  ;;  %793 = vmatprep.subr.bf16.mxu1 %v1049_v11  ;;  %v1055_v15 = vld [vmem:[#allocation6 + $0x6c] ss:$24 sps:$4 sm:$0xff]   ;;  %v1057_v17 = vld [vmem:[#allocation6 + $0x68] ss:$24 sps:$4 sm:$0xff]   ;;  %v1061_v19 = vld [vmem:[#allocation6 + $0x9c] ss:$24 sps:$4 sm:$0xff]  }
  0x4e   :  { %v1058_v18 = vld [vmem:[#allocation6 + $0x94] ss:$24 sps:$4 sm:$0xff]   ;;  %v1060_v20 = vld [vmem:[#allocation6 + $0x90] ss:$24 sps:$4 sm:$0xff]   ;;  %v1064_v22 = vld [vmem:[#allocation6 + $0xc4] ss:$24 sps:$4 sm:$0xff]  }
  0x4f   :  { %77 = vadd.xlane.f32.xlu0 %v76_v5  ;;  %v1063_v21 = vld [vmem:[#allocation6 + $0x98] ss:$24 sps:$4 sm:$0xff]   ;;  %v1067_v23 = vld [vmem:[#allocation6 + $0xcc] ss:$24 sps:$4 sm:$0xff]   ;;  %v1069_v25 = vld [vmem:[#allocation6 + $0xc8] ss:$24 sps:$4 sm:$0xff]  }
  0x50   :  { %751 = vmatpush1.bf16.msra.mxu0 %v1048_v12  ;;  %794 = vmatpush1.bf16.msra.mxu1 %v1051_v13  ;;  %v1066_v24 = vld [vmem:[#allocation6 + $0xc0] ss:$24 sps:$4 sm:$0xff]   ;;  %v1070_v26 = vld [vmem:[#allocation6 + $0xf4] ss:$24 sps:$4 sm:$0xff]   ;;  %v1072_v28 = vld [vmem:[#allocation6 + $0xf0] ss:$24 sps:$4 sm:$0xff]  }
  0x51   :  { %752 = vmatprep.subr.bf16.mxu0 %v1052_v14  ;;  %795 = vmatprep.subr.bf16.mxu1 %v1055_v15  ;;  %v1073_v27 = vld [vmem:[#allocation6 + $0xfc] ss:$24 sps:$4 sm:$0xff]   ;;  %v1075_v29 = vld [vmem:[#allocation6 + $0xf8] ss:$24 sps:$4 sm:$0xff]   ;;  %v1079_v31 = vld [vmem:[#allocation6 + $0x12c] ss:$24 sps:$4 sm:$0xff]  }
  0x52   :  { %v1076_v30 = vld [vmem:[#allocation6 + $0x124] ss:$24 sps:$4 sm:$0xff]   ;;  %v1078_v32 = vld [vmem:[#allocation6 + $0x120] ss:$24 sps:$4 sm:$0xff]   ;;  %v1082_v34 = vld [vmem:[#allocation6 + $0x154] ss:$24 sps:$4 sm:$0xff]  }
  0x53   :  { %v1081_v33 = vld [vmem:[#allocation6 + $0x128] ss:$24 sps:$4 sm:$0xff]   ;;  %v1085_v35 = vld [vmem:[#allocation6 + $0x15c] ss:$24 sps:$4 sm:$0xff]   ;;  %v1087_v37 = vld [vmem:[#allocation6 + $0x158] ss:$24 sps:$4 sm:$0xff]  }
  0x54   :  { %753 = vmatpush1.bf16.msra.mxu0 %v1054_v16  ;;  %796 = vmatpush1.bf16.msra.mxu1 %v1057_v17  ;;  %v1084_v36 = vld [vmem:[#allocation6 + $0x150] ss:$24 sps:$4 sm:$0xff]   ;;  %v1088_v38 = vld [vmem:[#allocation6 + $0x184] ss:$24 sps:$4 sm:$0xff]   ;;  %v1090_v40 = vld [vmem:[#allocation6 + $0x180] ss:$24 sps:$4 sm:$0xff]  }
  0x55   :  { %754 = vmatprep.subr.bf16.mxu0 %v1058_v18  ;;  %797 = vmatprep.subr.bf16.mxu1 %v1061_v19  ;;  %v1091_v39 = vld [vmem:[#allocation6 + $0x18c] ss:$24 sps:$4 sm:$0xff]   ;;  %v1093_v41 = vld [vmem:[#allocation6 + $0x188] ss:$24 sps:$4 sm:$0xff]   ;;  %v1097_v58 = vld [vmem:[#allocation6 + $0x1bc] ss:$24 sps:$4 sm:$0xff]  }
  0x56   :  { %v1094_v42 = vld [vmem:[#allocation6 + $0x1b4] ss:$24 sps:$4 sm:$0xff]   ;;  %v1096_v57 = vld [vmem:[#allocation6 + $0x1b0] ss:$24 sps:$4 sm:$0xff]   ;;  %v1100_v60 = vld [vmem:[#allocation6 + $0x1e4] ss:$24 sps:$4 sm:$0xff]  }
  0x57   :  { %v1099_v59 = vld [vmem:[#allocation6 + $0x1b8] ss:$24 sps:$4 sm:$0xff]   ;;  %v1103_v62 = vld [vmem:[#allocation6 + $0x1ec] ss:$24 sps:$4 sm:$0xff]   ;;  %v1105_v63 = vld [vmem:[#allocation6 + $0x1e8] ss:$24 sps:$4 sm:$0xff]  }
  0x58   :  { %755 = vmatpush1.bf16.msra.mxu0 %v1060_v20  ;;  %798 = vmatpush1.bf16.msra.mxu1 %v1063_v21  ;;  %v1102_v61 = vld [vmem:[#allocation6 + $0x1e0] ss:$24 sps:$4 sm:$0xff]   ;;  %v1115_v6 = vld [vmem:[#allocation6 + $0x24c] ss:$24 sps:$4 sm:$0xff]   ;;  %v1121_v9 = vld [vmem:[#allocation6 + $0x27c] ss:$24 sps:$4 sm:$0xff]  }
  0x59   :  { %756 = vmatprep.subr.bf16.mxu0 %v1064_v22  ;;  %799 = vmatprep.subr.bf16.mxu1 %v1067_v23  ;;  %v1111_v3 = vld [vmem:[#allocation6 + $0x218] ss:$24 sps:$4 sm:$0xff]   ;;  %v1117_v7 = vld [vmem:[#allocation6 + $0x248] ss:$24 sps:$4 sm:$0xff]   ;;  %v1118_v8 = vld [vmem:[#allocation6 + $0x274] ss:$24 sps:$4 sm:$0xff]  }
  0x5a   :  { %v1114_v5 = vld [vmem:[#allocation6 + $0x240] ss:$24 sps:$4 sm:$0xff]   ;;  %v1120_v10 = vld [vmem:[#allocation6 + $0x270] ss:$24 sps:$4 sm:$0xff]   ;;  %v1124_v12 = vld [vmem:[#allocation6 + $0x2a4] ss:$24 sps:$4 sm:$0xff]  }
  0x5b   :  { %v1123_v11 = vld [vmem:[#allocation6 + $0x278] ss:$24 sps:$4 sm:$0xff]   ;;  %v1127_v13 = vld [vmem:[#allocation6 + $0x2ac] ss:$24 sps:$4 sm:$0xff]   ;;  %v1129_v15 = vld [vmem:[#allocation6 + $0x2a8] ss:$24 sps:$4 sm:$0xff]  }
  0x5c   :  { %757 = vmatpush1.bf16.msra.mxu0 %v1066_v24  ;;  %800 = vmatpush1.bf16.msra.mxu1 %v1069_v25  ;;  %v1126_v14 = vld [vmem:[#allocation6 + $0x2a0] ss:$24 sps:$4 sm:$0xff]   ;;  %v1130_v16 = vld [vmem:[#allocation6 + $0x2d4] ss:$24 sps:$4 sm:$0xff]   ;;  %v1132_v18 = vld [vmem:[#allocation6 + $0x2d0] ss:$24 sps:$4 sm:$0xff]   ;;  %v108_v25 = vlaneseq }
  0x5d   :  { %758 = vmatprep.subr.bf16.mxu0 %v1070_v26  ;;  %801 = vmatprep.subr.bf16.mxu1 %v1073_v27  ;;  %v1133_v17 = vld [vmem:[#allocation6 + $0x2dc] ss:$24 sps:$4 sm:$0xff]   ;;  %v1135_v19 = vld [vmem:[#allocation6 + $0x2d8] ss:$24 sps:$4 sm:$0xff]  }
  0x5e   :  { %v1138_v20 = vld [vmem:[#allocation6 + $0x14] ss:$24 sps:$4 sm:$0xff]  }
  0x60   :  { %759 = vmatpush1.bf16.msra.mxu0 %v1072_v28  ;;  %802 = vmatpush1.bf16.msra.mxu1 %v1075_v29  ;;  %v1410_v28 = vshrl.u32 %v108_v25, 7 }
  0x61   :  { %760 = vmatprep.subr.bf16.mxu0 %v1076_v30  ;;  %803 = vmatprep.subr.bf16.mxu1 %v1079_v31  ;;  %v106_v31 = vld [vmem:[#allocation2] sm:$0x3] }
  0x62   :  { %v1413_v29 = vsub.s32 1, %v1410_v28  ;;  %v1416_v30 = vsub.s32 0, %v1410_v28 }
  0x64   :  { %761 = vmatpush1.bf16.msra.mxu0 %v1078_v32  ;;  %804 = vmatpush1.bf16.msra.mxu1 %v1081_v33 }
  0x65   :  { %762 = vmatprep.subr.bf16.mxu0 %v1082_v34  ;;  %805 = vmatprep.subr.bf16.mxu1 %v1085_v35  ;;  %v115_v34 = vrot.slane %v106_v31, %v1413_v29  ;;  %v122_v35 = vld [vmem:[#allocation4] sm:$0x3] }
  0x68   :  { %763 = vmatpush1.bf16.msra.mxu0 %v1084_v36  ;;  %806 = vmatpush1.bf16.msra.mxu1 %v1087_v37  ;;  %v111_v37 = vrot.slane %v106_v31, %v1416_v30 }
  0x69   :  { %764 = vmatprep.subr.bf16.mxu0 %v1088_v38  ;;  %807 = vmatprep.subr.bf16.mxu1 %v1091_v39  ;;  %v131_v39 = vrot.slane %v122_v35, %v1413_v29 }
  0x6c   :  { %765 = vmatpush1.bf16.msra.mxu0 %v1090_v40  ;;  %808 = vmatpush1.bf16.msra.mxu1 %v1093_v41  ;;  %v127_v40 = vrot.slane %v122_v35, %v1416_v30 }
  0x6d   :  { %766 = vmatprep.subr.bf16.mxu0 %v1094_v42  ;;  %809 = vmatprep.subr.bf16.mxu1 %v1097_v58  ;;  %v1147_v58 = vld [vmem:[#allocation6 + $0xa4] ss:$24 sps:$4 sm:$0xff]  }
  0x70   :  { %767 = vmatpush1.bf16.msra.mxu0 %v1096_v57  ;;  %810 = vmatpush1.bf16.msra.mxu1 %v1099_v59  ;;  %v1142_v57 = vld [vmem:[#allocation6 + $0x70] ss:$24 sps:$4 sm:$0xff]   ;;  %v1145_v59 = vld [vmem:[#allocation6 + $0xa0] ss:$24 sps:$4 sm:$0xff]  }
  0x71   :  { %768 = vmatprep.subr.bf16.mxu0 %v1100_v60  ;;  %811 = vmatprep.subr.bf16.mxu1 %v1103_v62  ;;  %v1150_v60 = vld [vmem:[#allocation6 + $0xd4] ss:$24 sps:$4 sm:$0xff]   ;;  %v1153_v62 = vld [vmem:[#allocation6 + $0x104] ss:$24 sps:$4 sm:$0xff]  }
  0x74   :  { %769 = vmatpush1.bf16.msra.mxu0 %v1102_v61  ;;  %812 = vmatpush1.bf16.msra.mxu1 %v1105_v63  ;;  %v1148_v61 = vld [vmem:[#allocation6 + $0xd0] ss:$24 sps:$4 sm:$0xff]   ;;  %v1151_v63 = vld [vmem:[#allocation6 + $0x100] ss:$24 sps:$4 sm:$0xff]  }
  0xd8   :  { %v75_v43 = vpop.xlane.xlu0 %74 }
  0xd9   :  { %v80_v44 = vmul.f32 0.00390625, %v75_v43 }
  0xdb   :  { %v1391_v45 = vsub.f32 %v1369_v0, %v80_v44  ;;  %v1394_v46 = vsub.f32 %v1374_v1, %v80_v44  ;;  %v1106_v0 = vld [vmem:[#allocation6 + $0x214] ss:$24 sps:$4 sm:$0xff]   ;;  %v1108_v1 = vld [vmem:[#allocation6 + $0x210] ss:$24 sps:$4 sm:$0xff]  }
  0xdc   :  { %v78_v47 = vpop.xlane.xlu0 %77  ;;  %770 = vmatprep.subr.bf16.mxu0 %v1106_v0  ;;  %v1156_v0 = vld [vmem:[#allocation6 + $0x134] ss:$24 sps:$4 sm:$0xff]  }
  0xdd   :  { %v81_v48 = vmul.f32 0.00390625, %v78_v47  ;;  %v86_v49 = vmul.f32 %v1391_v45, %v1391_v45  ;;  %v87_v50 = vmul.f32 %v1394_v46, %v1394_v46  ;;  %771 = vmatpush1.bf16.msra.mxu0 %v1108_v1  ;;  %v1154_v1 = vld [vmem:[#allocation6 + $0x130] ss:$24 sps:$4 sm:$0xff]  }
  0xdf   :  { %v1401_v51 = vsub.f32 %v1379_v2, %v81_v48  ;;  %v1404_v52 = vsub.f32 %v1386_v4, %v81_v48  ;;  %v90_v53 = vadd.f32 %v87_v50, %v86_v49  ;;  %v1109_v2 = vld [vmem:[#allocation6 + $0x21c] ss:$24 sps:$4 sm:$0xff]  }
  0xe0   :  { %813 = vmatprep.subr.bf16.mxu1 %v1109_v2  ;;  %v1112_v4 = vld [vmem:[#allocation6 + $0x244] ss:$24 sps:$4 sm:$0xff]  }
  0xe1   :  { %91 = vadd.xlane.f32.xlu1 %v90_v53  ;;  %v88_v54 = vmul.f32 %v1401_v51, %v1401_v51  ;;  %v89_v55 = vmul.f32 %v1404_v52, %v1404_v52  ;;  %814 = vmatpush1.bf16.msra.mxu1 %v1111_v3  ;;  %v1159_v2 = vld [vmem:[#allocation6 + $0x164] ss:$24 sps:$4 sm:$0xff]   ;;  %v1157_v3 = vld [vmem:[#allocation6 + $0x160] ss:$24 sps:$4 sm:$0xff]  }
  0xe2   :  { %772 = vmatprep.subr.bf16.mxu0 %v1112_v4  ;;  %815 = vmatprep.subr.bf16.mxu1 %v1115_v6  ;;  %v1162_v4 = vld [vmem:[#allocation6 + $0x194] ss:$24 sps:$4 sm:$0xff]   ;;  %v1165_v6 = vld [vmem:[#allocation6 + $0x1c4] ss:$24 sps:$4 sm:$0xff]  }
  0xe3   :  { %v93_v56 = vadd.f32 %v89_v55, %v88_v54  ;;  %773 = vmatpush1.bf16.msra.mxu0 %v1114_v5  ;;  %v1136_v54 = vld [vmem:[#allocation6 + $0x10] ss:$24 sps:$4 sm:$0xff]  }
  0xe4   :  { %774 = vmatprep.subr.bf16.mxu0 %v1118_v8  ;;  %v1160_v5 = vld [vmem:[#allocation6 + $0x190] ss:$24 sps:$4 sm:$0xff]   ;;  %v1168_v8 = vld [vmem:[#allocation6 + $0x1f4] ss:$24 sps:$4 sm:$0xff]  }
  0xe5   :  { %94 = vadd.xlane.f32.xlu1 %v93_v56  ;;  %816 = vmatpush1.bf16.msra.mxu1 %v1117_v7  ;;  %v1141_v56 = vld [vmem:[#allocation6 + $0x44] ss:$24 sps:$4 sm:$0xff]   ;;  %v1163_v7 = vld [vmem:[#allocation6 + $0x1c0] ss:$24 sps:$4 sm:$0xff]  }
  0xe6   :  { %817 = vmatprep.subr.bf16.mxu1 %v1121_v9  ;;  %v1166_v9 = vld [vmem:[#allocation6 + $0x1f0] ss:$24 sps:$4 sm:$0xff]  }
  0xe7   :  { %775 = vmatpush1.bf16.msra.mxu0 %v1120_v10  ;;  %v1171_v10 = vld [vmem:[#allocation6 + $0x224] ss:$24 sps:$4 sm:$0xff]  }
  0xe8   :  { %776 = vmatprep.subr.bf16.mxu0 %v1124_v12  ;;  %v1174_v12 = vld [vmem:[#allocation6 + $0x254] ss:$24 sps:$4 sm:$0xff]  }
  0xe9   :  { %818 = vmatpush1.bf16.msra.mxu1 %v1123_v11  ;;  %v1169_v11 = vld [vmem:[#allocation6 + $0x220] ss:$24 sps:$4 sm:$0xff]  }
  0xea   :  { %819 = vmatprep.subr.bf16.mxu1 %v1127_v13  ;;  %v1172_v13 = vld [vmem:[#allocation6 + $0x250] ss:$24 sps:$4 sm:$0xff]  }
  0xeb   :  { %777 = vmatpush1.bf16.msra.mxu0 %v1126_v14  ;;  %v1177_v14 = vld [vmem:[#allocation6 + $0x284] ss:$24 sps:$4 sm:$0xff]  }
  0xec   :  { %778 = vmatprep.subr.bf16.mxu0 %v1130_v16  ;;  %v1180_v16 = vld [vmem:[#allocation6 + $0x2b4] ss:$24 sps:$4 sm:$0xff]  }
  0xed   :  { %820 = vmatpush1.bf16.msra.mxu1 %v1129_v15  ;;  %v1175_v15 = vld [vmem:[#allocation6 + $0x280] ss:$24 sps:$4 sm:$0xff]  }
  0xee   :  { %821 = vmatprep.subr.bf16.mxu1 %v1133_v17  ;;  %v1178_v17 = vld [vmem:[#allocation6 + $0x2b0] ss:$24 sps:$4 sm:$0xff]  }
  0xef   :  { %779 = vmatpush1.bf16.msra.mxu0 %v1132_v18  ;;  %v1183_v18 = vld [vmem:[#allocation6 + $0x2e4] ss:$24 sps:$4 sm:$0xff]  }
  0xf0   :  { %834 = vmatprep.subr.bf16.mxu0 %v1138_v20  ;;  %v248_v20 = vsub.s32 2, %v1410_v28 }
  0xf1   :  { %822 = vmatpush1.bf16.msra.mxu1 %v1135_v19  ;;  %v1181_v19 = vld [vmem:[#allocation6 + $0x2e0] ss:$24 sps:$4 sm:$0xff]  }
 0x16e   :  { %v92_v21 = vpop.xlane.xlu1 %91 }
 0x16f   :  { %v96_v22 = vmul.f32 0.00390625, %v92_v21  ;;  %v236_v21 = vld [vmem:[#allocation7] sm:$0x3f] }
 0x170   :  { %v245_v25 = vrot.slane %v236_v21, %v1413_v29 }
 0x171   :  { %v98_v23 = vadd.f32 1e-05, %v96_v22  ;;  %v252_v22 = vsub.s32 3, %v1410_v28 }
 0x172   :  { %v95_v24 = vpop.xlane.xlu1 %94 }
 0x173   :  { %1184 = vrsqrt.f32 %v98_v23  ;;  %v97_v26 = vmul.f32 0.00390625, %v95_v24  ;;  %v241_v23 = vrot.slane %v236_v21, %v1416_v30  ;;  %v249_v24 = vrot.slane %v236_v21, %v248_v20 }
 0x175   :  { %v99_v27 = vadd.f32 1e-05, %v97_v26  ;;  %v253_v26 = vrot.slane %v236_v21, %v252_v22 }
 0x177   :  { %1186 = vrsqrt.f32 %v99_v27 }
 0x17d   :  { %v1185_v32 = vpop.eup %1184 }
 0x17e   :  { %v103_v33 = vmul.f32 %v1185_v32, %v1394_v46  ;;  %v102_v36 = vmul.f32 %v1185_v32, %v1391_v45 }
 0x180   :  { %v119_v42 = vmul.f32 %v115_v34, %v103_v33  ;;  %v118_v44 = vmul.f32 %v111_v37, %v102_v36 }
 0x181   :  { %v1187_v38 = vpop.eup %1186 }
 0x182   :  { %v105_v41 = vmul.f32 %v1187_v38, %v1404_v52  ;;  %v104_v43 = vmul.f32 %v1187_v38, %v1401_v51  ;;  %v135_v48 = vadd.f32 %v131_v39, %v119_v42  ;;  %v134_v50 = vadd.f32 %v127_v40, %v118_v44  ;;  %v1139_v51 = vld [vmem:[#allocation6 + $0x40] ss:$24 sps:$4 sm:$0xff]   ;;  %v1144_v52 = vld [vmem:[#allocation6 + $0x74] ss:$24 sps:$4 sm:$0xff]  }
 0x184   :  { %v121_v47 = vmul.f32 %v115_v34, %v105_v41  ;;  %v120_v46 = vmul.f32 %v111_v37, %v104_v43 }
 0x186   :  { %v137_v49 = vadd.f32 %v131_v39, %v121_v47  ;;  %v136_v53 = vadd.f32 %v127_v40, %v120_v46 }
 0x188   :  { %v139_v45 = vpack.c.bf16 %v137_v49, %v135_v48  ;;  %v1426_v55 = vpack.c.bf16 %v136_v53, %v134_v50  ;;  %v256_v49 = vsub.s32 4, %v1410_v28  ;;  %v260_v50 = vsub.s32 5, %v1410_v28 }
 0x18a   :  { %780 = vmatprep.mubr.bf16.mxu0 %v139_v45  ;;  %823 = vmatprep.mubr.bf16.mxu1 %v139_v45  ;;  %v257_v53 = vrot.slane %v236_v21, %v256_v49 }
 0x18b   :  { %781 = vmatmul.mubr.bf16.vlgmr.msra.gmra.mrb[0].mxu0 %v1426_v55  ;;  %824 = vmatmul.mubr.bf16.vlgmr.msra.gmra.mrb[0].mxu1 %v1426_v55 }
 0x18c   :  { %835 = vmatpush1.bf16.msra.mxu0 %v1136_v54  ;;  %866 = vmatprep.mubr.bf16.mxu0 %v139_v45  ;;  %v261_v45 = vrot.slane %v236_v21, %v260_v50 }
 0x18d   :  { %836 = vmatprep.subr.bf16.mxu0 %v1141_v56 }
 0x190   :  { %837 = vmatpush1.bf16.msra.mxu0 %v1139_v51 }
 0x191   :  { %838 = vmatprep.subr.bf16.mxu0 %v1144_v52 }
 0x194   :  { %839 = vmatpush1.bf16.msra.mxu0 %v1142_v57 }
 0x195   :  { %840 = vmatprep.subr.bf16.mxu0 %v1147_v58 }
 0x198   :  { %841 = vmatpush1.bf16.msra.mxu0 %v1145_v59 }
 0x199   :  { %842 = vmatprep.subr.bf16.mxu0 %v1150_v60 }
 0x19c   :  { %843 = vmatpush1.bf16.msra.mxu0 %v1148_v61 }
 0x19d   :  { %844 = vmatprep.subr.bf16.mxu0 %v1153_v62 }
 0x1a0   :  { %845 = vmatpush1.bf16.msra.mxu0 %v1151_v63 }
 0x1a1   :  { %846 = vmatprep.subr.bf16.mxu0 %v1156_v0 }
 0x1a4   :  { %847 = vmatpush1.bf16.msra.mxu0 %v1154_v1 }
 0x1a5   :  { %848 = vmatprep.subr.bf16.mxu0 %v1159_v2 }
 0x1a8   :  { %849 = vmatpush1.bf16.msra.mxu0 %v1157_v3 }
 0x1a9   :  { %850 = vmatprep.subr.bf16.mxu0 %v1162_v4 }
 0x1ac   :  { %851 = vmatpush1.bf16.msra.mxu0 %v1160_v5 }
 0x1ad   :  { %852 = vmatprep.subr.bf16.mxu0 %v1165_v6 }
 0x1b0   :  { %853 = vmatpush1.bf16.msra.mxu0 %v1163_v7 }
 0x1b1   :  { %854 = vmatprep.subr.bf16.mxu0 %v1168_v8 }
 0x1b4   :  { %855 = vmatpush1.bf16.msra.mxu0 %v1166_v9 }
 0x1b5   :  { %856 = vmatprep.subr.bf16.mxu0 %v1171_v10 }
 0x1b8   :  { %857 = vmatpush1.bf16.msra.mxu0 %v1169_v11 }
 0x1b9   :  { %858 = vmatprep.subr.bf16.mxu0 %v1174_v12 }
 0x1bc   :  { %859 = vmatpush1.bf16.msra.mxu0 %v1172_v13 }
 0x1bd   :  { %860 = vmatprep.subr.bf16.mxu0 %v1177_v14 }
 0x1c0   :  { %861 = vmatpush1.bf16.msra.mxu0 %v1175_v15 }
 0x1c1   :  { %862 = vmatprep.subr.bf16.mxu0 %v1180_v16 }
 0x1c4   :  { %863 = vmatpush1.bf16.msra.mxu0 %v1178_v17 }
 0x1c5   :  { %864 = vmatprep.subr.bf16.mxu0 %v1183_v18 }
 0x1c8   :  { %865 = vmatpush1.bf16.msra.mxu0 %v1181_v19 }
 0x1cb   :  { %867 = vmatmul.mubr.bf16.vlgmr.msra.gmra.mrb[4].mxu0 %v1426_v55 }
 0x25e   :  { %v782_v27 = vpop.f32.mrb[0].mxu0  ;;  %v825_v31 = vpop.f32.mrb[0].mxu1 }
 0x25f   :  { %v783_v32 = vadd.f32 %v782_v27, %v241_v23  ;;  %v826_v33 = vadd.f32 %v825_v31, %v249_v24  ;;  %v784_v34 = vpop.f32.mrb[1].mxu0  ;;  %v827_v35 = vpop.f32.mrb[1].mxu1 }
 0x260   :  { %v785_v36 = vadd.f32 %v784_v34, %v245_v25  ;;  %v828_v37 = vadd.f32 %v827_v35, %v253_v26  ;;  %v786_v38 = vpop.f32.mrb[2].mxu0  ;;  %v829_v39 = vpop.f32.mrb[2].mxu1 }
 0x261   :  { %v787_v40 = vadd.f32 %v786_v38, %v241_v23  ;;  %v830_v41 = vadd.f32 %v829_v39, %v249_v24  ;;  %v788_v42 = vpop.f32.mrb[3].mxu0  ;;  %v831_v43 = vpop.f32.mrb[3].mxu1 }
 0x262   :  { %v1028_v44 = vpack.c.bf16 %v785_v36, %v783_v32  ;;  %v1029_v30 = vpack.c.bf16 %v828_v37, %v826_v33  ;;  %v789_v47 = vadd.f32 %v788_v42, %v245_v25  ;;  %v832_v46 = vadd.f32 %v831_v43, %v253_v26 }
 0x264   :  { %913 = vst [vmem:[%s1460_s5] sm:$0xff] %v1028_v44  ;;  %914 = vst [vmem:[%s1460_s5 + $0x8] sm:$0xff] %v1029_v30  ;;  %v1031_v29 = vpack.c.bf16 %v789_v47, %v787_v40  ;;  %v1032_v48 = vpack.c.bf16 %v832_v46, %v830_v41 }
 0x266   :  { %916 = vst [vmem:[%s1460_s5 + $0x18] sm:$0xff] %v1031_v29  ;;  %917 = vst [vmem:[%s1460_s5 + $0x20] sm:$0xff] %v1032_v48 }
 0x29e   :  { %v868_v54 = vpop.f32.mrb[4].mxu0 }
 0x29f   :  { %v869_v55 = vadd.f32 %v868_v54, %v257_v53  ;;  %v870_v56 = vpop.f32.mrb[5].mxu0 }
 0x2a0   :  { %v871_v51 = vadd.f32 %v870_v56, %v261_v45  ;;  %v872_v52 = vpop.f32.mrb[6].mxu0 }
 0x2a1   :  { %v873_v57 = vadd.f32 %v872_v52, %v257_v53  ;;  %v874_v58 = vpop.f32.mrb[7].mxu0 }
 0x2a2   :  { %v1030_v59 = vpack.c.bf16 %v871_v51, %v869_v55  ;;  %v875_v60 = vadd.f32 %v874_v58, %v261_v45 }
 0x2a4   :  { %915 = vst [vmem:[%s1460_s5 + $0x10] sm:$0xff] %v1030_v59  ;;  %v1033_v61 = vpack.c.bf16 %v875_v60, %v873_v57 }
 0x2a6   :  { %918 = vst [vmem:[%s1460_s5 + $0x28] sm:$0xff] %v1033_v61 }
 0x2a7   :  { %923 = vsyncpa [#allocation3], 1 }
 0x2a8   :  { %924 = vsyncpa [#allocation5], 1 }
 0x2a9   :  { %925 = vsyncpa [#allocation8], 1 }

// kernel: run.10
= control target key start
LH: loop header
LB: loop body
LE: loop exit
PB: predicated region body
PF: predicated region fallthrough
CT: control target
= control target key end

     0   :  { %s1020_s18 = smov 0   ;;  %s1160_s0 = inlined_call_operand.vmem [shape: bf16[2,8,768], index: 0, kind: input, shape index: {}]   ;;  %s1161_s1 = inlined_call_operand.vmem [shape: f32[8,8], index: 1, kind: input, shape index: {}]   ;;  %s1162_s2 = inlined_call_operand.vmem [shape: bf16[256,256], index: 2, kind: input, shape index: {}]   ;;  %s1163_s3 = inlined_call_operand.vmem [shape: f32[1,256], index: 3, kind: input, shape index: {}]   ;;  %s1164_s4 = inlined_call_operand.vmem [shape: f32[2,8,256], index: 4, kind: input, shape index: {}]   ;;  %s1165_s5 = inlined_call_operand.vmem [shape: f32[2,8,256], index: 5, kind: output, shape index: {}]  }
   0x1 LB: > { %s827_s19 = sadd.s32 4294967295, %s985_s18   ;;  %p831_p0 = scmp.ge.s32.totalorder %s985_s18, 1  ;;  %s985_s18 = sphi %s1020_s18, %s15_s18  }
   0x2   : > { %p197_p1 = scmp.lt.s32.totalorder %s985_s18, 3 }
   0x4   : > { %p198_p2 = pnand %p831_p0, %p197_p1 }
   0x5   : > { %p230_p3 = scmp.lt.s32.totalorder (!%p198_p2), %s827_s19, 1  ;;  %v987_v0 = vmov (!%p198_p2), 0.0   ;;  %vm988_vm0 = vmmov (!%p198_p2), 0   ;;  %v249_v6 = vld [vmem:[%s1161_s1] sm:$0xff] (!%p198_p2)  ;;  %vm293_vm1 = vcmask (!%p198_p2), 64512   ;;  %vm309_vm2 = vcmask (!%p198_p2), 1043456  }
   0x6   : > { %201 = sbr.rel (%p198_p2) target bundleno = 1527 (0x5f7), region = 40  ;;  %885 = vmatprep.subr.bf16.mxu0 (!%p198_p2), %v987_v0  ;;  %887 = vmatprep.mubr.msk.bf16.mxu0 (!%p198_p2), %vm988_vm0, %v987_v0  ;;  %v925_v46 = vld [vmem:[%s1162_s2 + $0x4] ss:$8 sps:$4 sm:$0xff] (!%p198_p2)   ;;  %v989_v47 = vmov (!%p198_p2), 0   ;;  %v947_v48 = vld [vmem:[%s1162_s2 + $0x80] ss:$8 sps:$4 sm:$0xff] (!%p198_p2)  }
   0x7   : > { %891 = vmatprep.subr.bf16.mxu1 (!%p198_p2), %v987_v0  ;;  %893 = vmatprep.mubr.msk.bf16.mxu1 (!%p198_p2), %vm988_vm0, %v987_v0  ;;  %v949_v49 = vld [vmem:[%s1162_s2 + $0x84] ss:$8 sps:$4 sm:$0xff] (!%p198_p2)   ;;  %v952_v50 = vld [vmem:[%s1162_s2 + $0x94] ss:$8 sps:$4 sm:$0xff] (!%p198_p2)   ;;  %v950_v51 = vld [vmem:[%s1162_s2 + $0x90] ss:$8 sps:$4 sm:$0xff] (!%p198_p2)  }
   0x8   : > { %v955_v52 = vld [vmem:[%s1162_s2 + $0xa4] ss:$8 sps:$4 sm:$0xff] (!%p198_p2)   ;;  %v953_v53 = vld [vmem:[%s1162_s2 + $0xa0] ss:$8 sps:$4 sm:$0xff] (!%p198_p2)   ;;  %v958_v54 = vld [vmem:[%s1162_s2 + $0xb4] ss:$8 sps:$4 sm:$0xff] (!%p198_p2)  }
   0x9   : > { %v956_v55 = vld [vmem:[%s1162_s2 + $0xb0] ss:$8 sps:$4 sm:$0xff] (!%p198_p2)   ;;  %v961_v56 = vld [vmem:[%s1162_s2 + $0xc4] ss:$8 sps:$4 sm:$0xff] (!%p198_p2)   ;;  %v959_v57 = vld [vmem:[%s1162_s2 + $0xc0] ss:$8 sps:$4 sm:$0xff] (!%p198_p2)  }
   0xa   : > { %v964_v58 = vld [vmem:[%s1162_s2 + $0xd4] ss:$8 sps:$4 sm:$0xff] (!%p198_p2)   ;;  %v962_v59 = vld [vmem:[%s1162_s2 + $0xd0] ss:$8 sps:$4 sm:$0xff] (!%p198_p2)   ;;  %v967_v60 = vld [vmem:[%s1162_s2 + $0xe4] ss:$8 sps:$4 sm:$0xff] (!%p198_p2)  }
   0xb   : > { %v965_v61 = vld [vmem:[%s1162_s2 + $0xe0] ss:$8 sps:$4 sm:$0xff] (!%p198_p2)   ;;  %v970_v62 = vld [vmem:[%s1162_s2 + $0xf4] ss:$8 sps:$4 sm:$0xff] (!%p198_p2)   ;;  %v968_v63 = vld [vmem:[%s1162_s2 + $0xf0] ss:$8 sps:$4 sm:$0xff] (!%p198_p2)  }
   0xd   : > { %s1167_s19 = smov (!%p230_p3, %s827_s19), 1 }
   0xe   : > { %s909_s20 = smul.u32 24, %s1167_s19  ;;  %s875_s21 = sshll.u32 %s1167_s19, 4 }
   0xf   : > { %s239_s24 = scalar_lea.vmem %s1164_s4, %s875_s21  ;;  %s244_s28 = scalar_lea.vmem %s1165_s5, %s875_s21 }
  0x10   : > { %s234_s23 = scalar_lea.vmem %s1160_s0, %s909_s20 }
  0x11   : > { %v246_v1 = vld [vmem:[%s234_s23] sm:$0xff]  ;;  %v247_v2 = vld [vmem:[%s234_s23 + $0x8] sm:$0xff]  ;;  %v248_v18 = vld [vmem:[%s234_s23 + $0x10] sm:$0xff] }
  0x12   : > { %886 = vmatpush3.bf16.xpose.msra.mxu0 %v247_v2  ;;  %v250_v3 = vunpack.c.l.bf16 %v246_v1  ;;  %v311_v19 = vsel %vm309_vm2, %v248_v18, 0  ;;  %v839_v20 = vcombine.high %v248_v18, %v248_v18  ;;  %v371_v23 = vrot.slane %v246_v1, 4  ;;  %v944_v18 = vld [vmem:[%s1162_s2 + $0x70] ss:$8 sps:$4 sm:$0xff]  }
  0x13   : > { %903 = vmatprep.subr.bf16.mxu0 %v987_v0  ;;  %892 = vmatpush3.bf16.msra.mxu1 %v311_v19  ;;  %v838_v27 = vcombine.high %v247_v2, %v247_v2 }
  0x14   : > { %v251_v4 = vmul.f32 0.088388346, %v250_v3  ;;  %v439_v21 = vsel %vm309_vm2, %v839_v20, 0  ;;  %897 = vmatprep.subr.bf16.mxu1 %v987_v0  ;;  %v373_v25 = vunpack.c.l.bf16 %v371_v23  ;;  %v923_v3 = vld [vmem:[%s1162_s2] ss:$8 sps:$4 sm:$0xff]  }
  0x16   : > { %v252_v5 = vpack.c.bf16 %v251_v4, %v251_v4  ;;  %v374_v29 = vmul.f32 0.088388346, %v373_v25 }
  0x18   : > { %v375_v30 = vpack.c.bf16 %v374_v29, %v374_v29  ;;  %v746_v29 = vlaneseq }
  0x19   : > { %888 = vmatmul.mubr.bf16.vlgmr.msra.gmra.mrb[0].mxu0 %v252_v5  ;;  %v928_v5 = vld [vmem:[%s1162_s2 + $0x14] ss:$8 sps:$4 sm:$0xff]  }
  0x1a   : > { %905 = vmatprep.mubr.msk.bf16.mxu0 %vm988_vm0, %v987_v0  ;;  %904 = vmatpush3.bf16.msra.mxu0 %v439_v21 }
  0x1b   : > { %699 = vmatprep.subr.bf16.mxu0 %v925_v46 }
  0xec   : > { %v287_v7 = vpop.f32.mrb[0].mxu0 }
  0xed   : > { %v288_v8 = vadd.f32 %v287_v7, %v249_v6  ;;  %v889_v9 = vpop.f32.mrb[1].mxu0  ;;  %v931_v7 = vld [vmem:[%s1162_s2 + $0x24] ss:$8 sps:$4 sm:$0xff]  }
  0xee   : > { %v290_v10 = vpop.f32.mrb[2].mxu0  ;;  %v934_v9 = vld [vmem:[%s1162_s2 + $0x34] ss:$8 sps:$4 sm:$0xff]  }
  0xef   : > { %v890_v11 = vpop.f32.mrb[3].mxu0  ;;  %v294_v12 = vsel %vm293_vm1, %v288_v8, -inf  ;;  %v932_v10 = vld [vmem:[%s1162_s2 + $0x30] ss:$8 sps:$4 sm:$0xff]  }
  0xf0   : > { %295 = vmax.xlane.f32.xlu0 %v294_v12  ;;  %v937_v11 = vld [vmem:[%s1162_s2 + $0x44] ss:$8 sps:$4 sm:$0xff]   ;;  %v935_v12 = vld [vmem:[%s1162_s2 + $0x40] ss:$8 sps:$4 sm:$0xff]  }
 0x17d   : > { %v296_v13 = vpop.xlane.xlu0 %295 }
 0x17e   : > { %v297_v14 = vsub.f32 %v288_v8, %v296_v13  ;;  %v929_v8 = vld [vmem:[%s1162_s2 + $0x20] ss:$8 sps:$4 sm:$0xff]   ;;  %v940_v13 = vld [vmem:[%s1162_s2 + $0x54] ss:$8 sps:$4 sm:$0xff]  }
 0x180   : > { %v298_v15 = vmul.f32 1.442695, %v297_v14  ;;  %v938_v14 = vld [vmem:[%s1162_s2 + $0x50] ss:$8 sps:$4 sm:$0xff]  }
 0x182   : > { %971 = vpow2.f32 %v298_v15  ;;  %v943_v15 = vld [vmem:[%s1162_s2 + $0x64] ss:$8 sps:$4 sm:$0xff]  }
 0x18c   : > { %v972_v16 = vpop.eup %971 }
 0x18d   : > { %v300_v17 = vsel %vm293_vm1, %v972_v16, 0.0 }
 0x18e   : > { %301 = vadd.xlane.f32.xlu0 %v300_v17  ;;  %v946_v17 = vld [vmem:[%s1162_s2 + $0x74] ss:$8 sps:$4 sm:$0xff]  }
 0x21b   : > { %v302_v22 = vpop.xlane.xlu0 %301 }
 0x21c   : > { %973 = vrcp.f32 %v302_v22 }
 0x226   : > { %v974_v24 = vpop.eup %973 }
 0x227   : > { %v304_v26 = vmul.f32 %v974_v24, %v972_v16  ;;  %v941_v16 = vld [vmem:[%s1162_s2 + $0x60] ss:$8 sps:$4 sm:$0xff]  }
 0x229   : > { %v305_v28 = vpack.c.bf16 %v304_v26, %v304_v26 }
 0x22b   : > { %894 = vmatmul.mubr.msk.bf16.vlgmr.msra.gmra.mrb[0].mxu1 %vm293_vm1, %v305_v28 }
 0x22c   : > { %898 = vmatpush3.bf16.xpose.msra.mxu1 %v838_v27  ;;  %899 = vmatprep.mubr.msk.bf16.mxu1 %vm988_vm0, %v987_v0 }
 0x22d   : > { %578 = vmatprep.subr.bf16.mxu1 %v949_v49 }
 0x233   : > { %900 = vmatmul.mubr.bf16.vlgmr.msra.gmra.mrb[4].mxu1 %v375_v30  ;;  %v747_v30 = vshrl.u32 %v746_v29, 7 }
 0x234   : > { %610 = vmatprep.mubr.bf16.mxu1 %v989_v47  ;;  %579 = vmatpush1.bf16.msra.mxu1 %v947_v48 }
 0x235   : > { %580 = vmatprep.subr.bf16.mxu1 %v952_v50 }
 0x238   : > { %581 = vmatpush1.bf16.msra.mxu1 %v950_v51 }
 0x239   : > { %582 = vmatprep.subr.bf16.mxu1 %v955_v52 }
 0x23c   : > { %583 = vmatpush1.bf16.msra.mxu1 %v953_v53 }
 0x23d   : > { %584 = vmatprep.subr.bf16.mxu1 %v958_v54 }
 0x240   : > { %585 = vmatpush1.bf16.msra.mxu1 %v956_v55 }
 0x241   : > { %586 = vmatprep.subr.bf16.mxu1 %v961_v56 }
 0x244   : > { %587 = vmatpush1.bf16.msra.mxu1 %v959_v57 }
 0x245   : > { %588 = vmatprep.subr.bf16.mxu1 %v964_v58 }
 0x248   : > { %589 = vmatpush1.bf16.msra.mxu1 %v962_v59 }
 0x249   : > { %590 = vmatprep.subr.bf16.mxu1 %v967_v60 }
 0x24c   : > { %591 = vmatpush1.bf16.msra.mxu1 %v965_v61 }
 0x24d   : > { %592 = vmatprep.subr.bf16.mxu1 %v970_v62 }
 0x250   : > { %593 = vmatpush1.bf16.msra.mxu1 %v968_v63 }
 0x2fe   : > { %v1044_v31 = vpop.f32.mrb[0].mxu1 }
 0x2ff   : > { %v895_v32 = vpop.f32.mrb[1].mxu1  ;;  %v369_v19 = vpack.c.bf16 %v1044_v31, %v1044_v31  ;;  %v744_v31 = vld [vmem:[%s1163_s3] sm:$0x3] }
 0x300   : > { %v350_v33 = vpop.f32.mrb[2].mxu1  ;;  %v748_v32 = vsub.s32 0, %v747_v30 }
 0x301   : > { %v896_v34 = vpop.f32.mrb[3].mxu1  ;;  %v752_v33 = vsub.s32 1, %v747_v30 }
 0x306   : > { %v414_v35 = vpop.f32.mrb[4].mxu1 }
 0x307   : > { %v415_v36 = vadd.f32 %v414_v35, %v249_v6  ;;  %v901_v37 = vpop.f32.mrb[5].mxu1  ;;  %v926_v6 = vld [vmem:[%s1162_s2 + $0x10] ss:$8 sps:$4 sm:$0xff]   ;;  %v740_v35 = vld [vmem:[%s239_s24] sm:$0xff] }
 0x308   : > { %v417_v38 = vpop.f32.mrb[6].mxu1  ;;  %v749_v37 = vrot.slane %v744_v31, %v748_v32 }
 0x309   : > { %v902_v39 = vpop.f32.mrb[7].mxu1  ;;  %v420_v40 = vsel %vm293_vm1, %v415_v36, -inf }
 0x30a   : > { %421 = vmax.xlane.f32.xlu1 %v420_v40  ;;  %v741_v39 = vld [vmem:[%s239_s24 + $0x8] sm:$0xff] }
 0x397   : > { %v422_v41 = vpop.xlane.xlu1 %421 }
 0x398   : > { %v423_v42 = vsub.f32 %v415_v36, %v422_v41  ;;  %v753_v41 = vrot.slane %v744_v31, %v752_v33 }
 0x39a   : > { %v424_v43 = vmul.f32 1.442695, %v423_v42 }
 0x39c   : > { %975 = vpow2.f32 %v424_v43 }
 0x3a6   : > { %v976_v44 = vpop.eup %975 }
 0x3a7   : > { %v426_v45 = vsel %vm293_vm1, %v976_v44, 0.0 }
 0x3a8   : > { %427 = vadd.xlane.f32.xlu1 %v426_v45 }
 0x435   : > { %v428_v0 = vpop.xlane.xlu1 %427 }
 0x436   : > { %977 = vrcp.f32 %v428_v0 }
 0x440   : > { %v978_v1 = vpop.eup %977 }
 0x441   : > { %v430_v2 = vmul.f32 %v978_v1, %v976_v44 }
 0x443   : > { %v431_v4 = vpack.c.bf16 %v430_v2, %v430_v2 }
 0x445   : > { %906 = vmatmul.mubr.msk.bf16.vlgmr.msra.gmra.mrb[4].mxu0 %vm293_vm1, %v431_v4 }
 0x446   : > { %700 = vmatpush1.bf16.msra.mxu0 %v923_v3  ;;  %731 = vmatprep.mubr.bf16.mxu0 %v989_v47 }
 0x447   : > { %701 = vmatprep.subr.bf16.mxu0 %v928_v5 }
 0x44a   : > { %702 = vmatpush1.bf16.msra.mxu0 %v926_v6 }
 0x44b   : > { %703 = vmatprep.subr.bf16.mxu0 %v931_v7 }
 0x44e   : > { %704 = vmatpush1.bf16.msra.mxu0 %v929_v8 }
 0x44f   : > { %705 = vmatprep.subr.bf16.mxu0 %v934_v9 }
 0x452   : > { %706 = vmatpush1.bf16.msra.mxu0 %v932_v10 }
 0x453   : > { %707 = vmatprep.subr.bf16.mxu0 %v937_v11 }
 0x456   : > { %708 = vmatpush1.bf16.msra.mxu0 %v935_v12 }
 0x457   : > { %709 = vmatprep.subr.bf16.mxu0 %v940_v13 }
 0x45a   : > { %710 = vmatpush1.bf16.msra.mxu0 %v938_v14 }
 0x45b   : > { %711 = vmatprep.subr.bf16.mxu0 %v943_v15 }
 0x45e   : > { %712 = vmatpush1.bf16.msra.mxu0 %v941_v16 }
 0x45f   : > { %713 = vmatprep.subr.bf16.mxu0 %v946_v17 }
 0x462   : > { %714 = vmatpush1.bf16.msra.mxu0 %v944_v18 }
 0x465   : > { %732 = vmatmul.mubr.bf16.vlgmr.msra.gmra.mrb[8].mxu0 %v369_v19 }
 0x518   : > { %v475_v20 = vpop.f32.mrb[4].mxu0 }
 0x519   : > { %v497_v21 = vpack.c.bf16 %v475_v20, %v475_v20  ;;  %v907_v22 = vpop.f32.mrb[5].mxu0 }
 0x51a   : > { %v478_v23 = vpop.f32.mrb[6].mxu0 }
 0x51b   : > { %v908_v24 = vpop.f32.mrb[7].mxu0  ;;  %611 = vmatmul.mubr.bf16.vlgmr.msra.gmra.mrb[8].mxu1 %v497_v21 }
 0x538   : > { %v733_v25 = vpop.f32.mrb[8].mxu0 }
 0x539   : > { %v735_v26 = vpop.f32.mrb[9].mxu0 }
 0x53a   : > { %v737_v27 = vpop.f32.mrb[10].mxu0 }
 0x53b   : > { %v738_v28 = vpop.f32.mrb[11].mxu0 }
 0x5ee   : > { %v612_v34 = vpop.f32.mrb[8].mxu1 }
 0x5ef   : > { %v734_v36 = vadd.f32 %v733_v25, %v612_v34  ;;  %v614_v38 = vpop.f32.mrb[9].mxu1 }
 0x5f0   : > { %v736_v40 = vadd.f32 %v735_v26, %v614_v38  ;;  %v616_v42 = vpop.f32.mrb[10].mxu1 }
 0x5f1   : > { %v742_v43 = vadd.f32 %v740_v35, %v734_v36  ;;  %v617_v44 = vpop.f32.mrb[11].mxu1 }
 0x5f2   : > { %v743_v45 = vadd.f32 %v741_v39, %v736_v40 }
 0x5f3   : > { %v756_v46 = vadd.f32 %v749_v37, %v742_v43 }
 0x5f4   : > { %v757_v47 = vadd.f32 %v753_v41, %v743_v45 }
 0x5f5   : > { %758 = vst [vmem:[%s244_s28] sm:$0xff] %v756_v46 }
 0x5f6   : > { %759 = vst [vmem:[%s244_s28 + $0x8] sm:$0xff] %v757_v47 }
 0x5f7 PF: > { %s15_s18 = sadd.s32 1, %s985_s18  }
 0x5f8   : > { %p12_p4 = scmp.ge.s32.totalorder %s15_s18, 4  }
 0x5fa   :  { %14 = sbr.rel (!%p12_p4) target bundleno = 1 (0x1), region = 73 }

// kernel: run.11
= control target key start
LH: loop header
LB: loop body
LE: loop exit
PB: predicated region body
PF: predicated region fallthrough
CT: control target
= control target key end

     0   :  { %s3691_s0 = inlined_call_operand.vmem [shape: f32[16,256], index: 0, kind: input, shape index: {}]   ;;  %s3692_s3 = inlined_call_operand.vmem [shape: bf16[256,1024], index: 3, kind: input, shape index: {}]   ;;  %s3693_s1 = inlined_call_operand.vmem [shape: f32[1,256], index: 1, kind: input, shape index: {}]   ;;  %s3694_s2 = inlined_call_operand.vmem [shape: f32[1,256], index: 2, kind: input, shape index: {}]   ;;  %s3695_s5 = inlined_call_operand.vmem [shape: bf16[1024,256], index: 5, kind: input, shape index: {}]   ;;  %s3696_s4 = inlined_call_operand.vmem [shape: f32[1,1024], index: 4, kind: input, shape index: {}]   ;;  %s3697_s6 = inlined_call_operand.vmem [shape: f32[1,256], index: 6, kind: input, shape index: {}]   ;;  %s3698_s7 = inlined_call_operand.vmem [shape: f32[16,256], index: 7, kind: output, shape index: {}]  }
   0x1   :  { %v2774_v0 = vld [vmem:[%s3691_s0] sm:$0xff]  ;;  %v2779_v1 = vld [vmem:[%s3691_s0 + $0x8] sm:$0xff]  ;;  %v2784_v2 = vld [vmem:[%s3691_s0 + $0x10] sm:$0xff] }
   0x2   :  { %v30_v3 = vadd.f32 %v2779_v1, %v2774_v0  ;;  %v2791_v4 = vld [vmem:[%s3691_s0 + $0x18] sm:$0xff]  ;;  %v97_v6 = vld [vmem:[%s3692_s3] sm:$0xff] }
   0x3   :  { %v33_v5 = vadd.f32 %v2791_v4, %v2784_v2  ;;  %v101_v7 = vld [vmem:[%s3692_s3 + $0x20] sm:$0xff] }
   0x4   :  { %31 = vadd.xlane.f32.xlu0 %v30_v3  ;;  %v105_v8 = vld [vmem:[%s3692_s3 + $0x40] sm:$0xff]  ;;  %v2184_v9 = vcombine.high %v97_v6, %v101_v7  ;;  %v2183_v10 = vcombine.low %v97_v6, %v101_v7 }
   0x5   :  { %v109_v11 = vld [vmem:[%s3692_s3 + $0x60] sm:$0xff] }
   0x6   :  { %v2192_v12 = vcombine.high %v105_v8, %v109_v11  ;;  %v113_v13 = vld [vmem:[%s3692_s3 + $0x80] sm:$0xff]  ;;  %907 = vmatprep.subr.bf16.mxu1 %v2184_v9  ;;  %v2191_v15 = vcombine.low %v105_v8, %v109_v11 }
   0x7   :  { %v117_v14 = vld [vmem:[%s3692_s3 + $0xa0] sm:$0xff]  ;;  %908 = vmatpush1.bf16.msra.mxu1 %v2183_v10 }
   0x8   :  { %34 = vadd.xlane.f32.xlu0 %v33_v5  ;;  %909 = vmatprep.subr.bf16.mxu1 %v2192_v12  ;;  %v2200_v16 = vcombine.high %v113_v13, %v117_v14  ;;  %v121_v17 = vld [vmem:[%s3692_s3 + $0xc0] sm:$0xff]  ;;  %v2199_v19 = vcombine.low %v113_v13, %v117_v14 }
   0x9   :  { %v125_v18 = vld [vmem:[%s3692_s3 + $0xe0] sm:$0xff] }
   0xa   :  { %v2208_v20 = vcombine.high %v121_v17, %v125_v18  ;;  %v129_v21 = vld [vmem:[%s3692_s3 + $0x100] sm:$0xff]  ;;  %v2207_v23 = vcombine.low %v121_v17, %v125_v18 }
   0xb   :  { %910 = vmatpush1.bf16.msra.mxu1 %v2191_v15  ;;  %v133_v22 = vld [vmem:[%s3692_s3 + $0x120] sm:$0xff] }
   0xc   :  { %911 = vmatprep.subr.bf16.mxu1 %v2200_v16  ;;  %v2216_v24 = vcombine.high %v129_v21, %v133_v22  ;;  %v137_v25 = vld [vmem:[%s3692_s3 + $0x140] sm:$0xff]  ;;  %v2215_v27 = vcombine.low %v129_v21, %v133_v22  ;;  %v102_v21 = vld [vmem:[%s3692_s3 + $0x28] sm:$0xff] }
   0xd   :  { %v141_v26 = vld [vmem:[%s3692_s3 + $0x160] sm:$0xff] }
   0xe   :  { %v2224_v28 = vcombine.high %v137_v25, %v141_v26  ;;  %v145_v29 = vld [vmem:[%s3692_s3 + $0x180] sm:$0xff]  ;;  %v2223_v31 = vcombine.low %v137_v25, %v141_v26 }
   0xf   :  { %912 = vmatpush1.bf16.msra.mxu1 %v2199_v19  ;;  %v149_v30 = vld [vmem:[%s3692_s3 + $0x1a0] sm:$0xff] }
  0x10   :  { %913 = vmatprep.subr.bf16.mxu1 %v2208_v20  ;;  %v2232_v32 = vcombine.high %v145_v29, %v149_v30  ;;  %v153_v33 = vld [vmem:[%s3692_s3 + $0x1c0] sm:$0xff]  ;;  %v2231_v35 = vcombine.low %v145_v29, %v149_v30  ;;  %v98_v20 = vld [vmem:[%s3692_s3 + $0x8] sm:$0xff] }
  0x11   :  { %v157_v34 = vld [vmem:[%s3692_s3 + $0x1e0] sm:$0xff]  ;;  %v2186_v22 = vcombine.high %v98_v20, %v102_v21 }
  0x12   :  { %v2240_v36 = vcombine.high %v153_v33, %v157_v34  ;;  %v161_v37 = vld [vmem:[%s3692_s3 + $0x200] sm:$0xff]  ;;  %v2239_v39 = vcombine.low %v153_v33, %v157_v34 }
  0x13   :  { %914 = vmatpush1.bf16.msra.mxu1 %v2207_v23  ;;  %v165_v38 = vld [vmem:[%s3692_s3 + $0x220] sm:$0xff]  ;;  %v2185_v23 = vcombine.low %v98_v20, %v102_v21  ;;  %v166_v20 = vld [vmem:[%s3692_s3 + $0x228] sm:$0xff] }
  0x14   :  { %915 = vmatprep.subr.bf16.mxu1 %v2216_v24  ;;  %v2248_v40 = vcombine.high %v161_v37, %v165_v38  ;;  %v169_v41 = vld [vmem:[%s3692_s3 + $0x240] sm:$0xff]  ;;  %v2247_v43 = vcombine.low %v161_v37, %v165_v38 }
  0x15   :  { %v173_v42 = vld [vmem:[%s3692_s3 + $0x260] sm:$0xff] }
  0x16   :  { %v2256_v44 = vcombine.high %v169_v41, %v173_v42  ;;  %v2255_v59 = vcombine.low %v169_v41, %v173_v42  ;;  %v177_v60 = vld [vmem:[%s3692_s3 + $0x280] sm:$0xff] }
  0x17   :  { %916 = vmatpush1.bf16.msra.mxu1 %v2215_v27  ;;  %v181_v61 = vld [vmem:[%s3692_s3 + $0x2a0] sm:$0xff] }
  0x18   :  { %917 = vmatprep.subr.bf16.mxu1 %v2224_v28  ;;  %v2264_v62 = vcombine.high %v177_v60, %v181_v61  ;;  %v2263_v63 = vcombine.low %v177_v60, %v181_v61  ;;  %v197_v5 = vld [vmem:[%s3692_s3 + $0x320] sm:$0xff]  ;;  %v65_v28 = vlaneseq  ;;  %v118_v60 = vld [vmem:[%s3692_s3 + $0xa8] sm:$0xff] }
  0x19   :  { %v201_v8 = vld [vmem:[%s3692_s3 + $0x340] sm:$0xff] }
  0x1a   :  { %v205_v9 = vld [vmem:[%s3692_s3 + $0x360] sm:$0xff] }
  0x1b   :  { %918 = vmatpush1.bf16.msra.mxu1 %v2223_v31  ;;  %v2288_v10 = vcombine.high %v201_v8, %v205_v9  ;;  %v2287_v11 = vcombine.low %v201_v8, %v205_v9  ;;  %v209_v12 = vld [vmem:[%s3692_s3 + $0x380] sm:$0xff]  ;;  %v2917_v31 = vshrl.u32 %v65_v28, 7  ;;  %v142_v8 = vld [vmem:[%s3692_s3 + $0x168] sm:$0xff] }
  0x1c   :  { %919 = vmatprep.subr.bf16.mxu1 %v2232_v32  ;;  %v213_v13 = vld [vmem:[%s3692_s3 + $0x3a0] sm:$0xff]  ;;  %v182_v28 = vld [vmem:[%s3692_s3 + $0x2a8] sm:$0xff] }
  0x1d   :  { %v2296_v14 = vcombine.high %v209_v12, %v213_v13  ;;  %v2295_v15 = vcombine.low %v209_v12, %v213_v13  ;;  %v217_v16 = vld [vmem:[%s3692_s3 + $0x3c0] sm:$0xff]  ;;  %v2920_v32 = vsub.s32 1, %v2917_v31  ;;  %v2923_v33 = vsub.s32 0, %v2917_v31  ;;  %v150_v12 = vld [vmem:[%s3692_s3 + $0x1a8] sm:$0xff] }
  0x1e   :  { %v221_v17 = vld [vmem:[%s3692_s3 + $0x3e0] sm:$0xff] }
  0x1f   :  { %920 = vmatpush1.bf16.msra.mxu1 %v2231_v35  ;;  %v2304_v18 = vcombine.high %v217_v16, %v221_v17  ;;  %v2303_v19 = vcombine.low %v217_v16, %v221_v17  ;;  %v63_v34 = vld [vmem:[%s3693_s1] sm:$0x3]  ;;  %v158_v16 = vld [vmem:[%s3692_s3 + $0x1e8] sm:$0xff] }
  0x20   :  { %921 = vmatprep.subr.bf16.mxu1 %v2240_v36  ;;  %v72_v38 = vrot.slane %v63_v34, %v2920_v32 }
  0x23   :  { %922 = vmatpush1.bf16.msra.mxu1 %v2239_v39  ;;  %v79_v39 = vld [vmem:[%s3694_s2] sm:$0x3] }
  0x24   :  { %923 = vmatprep.subr.bf16.mxu1 %v2248_v40  ;;  %v68_v40 = vrot.slane %v63_v34, %v2923_v33  ;;  %v88_v42 = vrot.slane %v79_v39, %v2920_v32  ;;  %v186_v34 = vld [vmem:[%s3692_s3 + $0x2c8] sm:$0xff] }
  0x27   :  { %924 = vmatpush1.bf16.msra.mxu1 %v2247_v43  ;;  %v84_v43 = vrot.slane %v79_v39, %v2923_v33  ;;  %v198_v39 = vld [vmem:[%s3692_s3 + $0x328] sm:$0xff] }
  0x28   :  { %925 = vmatprep.subr.bf16.mxu1 %v2256_v44 }
  0x2b   :  { %926 = vmatpush1.bf16.msra.mxu1 %v2255_v59  ;;  %v114_v59 = vld [vmem:[%s3692_s3 + $0x88] sm:$0xff] }
  0x2c   :  { %927 = vmatprep.subr.bf16.mxu1 %v2264_v62  ;;  %v2202_v62 = vcombine.high %v114_v59, %v118_v60 }
  0x2f   :  { %928 = vmatpush1.bf16.msra.mxu1 %v2263_v63  ;;  %v122_v63 = vld [vmem:[%s3692_s3 + $0xc8] sm:$0xff] }
  0x91   :  { %v32_v45 = vpop.xlane.xlu0 %31 }
  0x92   :  { %v37_v46 = vmul.f32 0.00390625, %v32_v45 }
  0x94   :  { %v2856_v47 = vsub.f32 %v2774_v0, %v37_v46  ;;  %v2859_v48 = vsub.f32 %v2779_v1, %v37_v46  ;;  %v185_v0 = vld [vmem:[%s3692_s3 + $0x2c0] sm:$0xff] }
  0x95   :  { %v35_v49 = vpop.xlane.xlu0 %34  ;;  %v189_v1 = vld [vmem:[%s3692_s3 + $0x2e0] sm:$0xff] }
  0x96   :  { %v38_v50 = vmul.f32 0.00390625, %v35_v49  ;;  %v43_v51 = vmul.f32 %v2856_v47, %v2856_v47  ;;  %v44_v52 = vmul.f32 %v2859_v48, %v2859_v48  ;;  %v2271_v3 = vcombine.low %v185_v0, %v189_v1 }
  0x98   :  { %v2866_v53 = vsub.f32 %v2784_v2, %v38_v50  ;;  %v2869_v54 = vsub.f32 %v2791_v4, %v38_v50  ;;  %v47_v55 = vadd.f32 %v44_v52, %v43_v51  ;;  %v2272_v2 = vcombine.high %v185_v0, %v189_v1  ;;  %v193_v4 = vld [vmem:[%s3692_s3 + $0x300] sm:$0xff]  ;;  %v126_v0 = vld [vmem:[%s3692_s3 + $0xe8] sm:$0xff] }
  0x99   :  { %v2280_v6 = vcombine.high %v193_v4, %v197_v5  ;;  %v2279_v7 = vcombine.low %v193_v4, %v197_v5  ;;  %v2201_v1 = vcombine.low %v114_v59, %v118_v60  ;;  %v134_v4 = vld [vmem:[%s3692_s3 + $0x128] sm:$0xff]  ;;  %v2209_v5 = vcombine.low %v122_v63, %v126_v0  ;;  %v107_v60 = vld [vmem:[%s3692_s3 + $0x50] sm:$0xff] }
  0x9a   :  { %48 = vadd.xlane.f32.xlu1 %v47_v55  ;;  %v45_v56 = vmul.f32 %v2866_v53, %v2866_v53  ;;  %v46_v57 = vmul.f32 %v2869_v54, %v2869_v54  ;;  %929 = vmatprep.subr.bf16.mxu1 %v2272_v2  ;;  %v2210_v2 = vcombine.high %v122_v63, %v126_v0  ;;  %v2470_v0 = vld [vmem:[%s3695_s5 + $0x14] ss:$8 sps:$4 sm:$0xff]  }
  0x9b   :  { %930 = vmatpush1.bf16.msra.mxu1 %v2271_v3  ;;  %v130_v3 = vld [vmem:[%s3692_s3 + $0x108] sm:$0xff] }
  0x9c   :  { %v50_v58 = vadd.f32 %v46_v57, %v45_v56  ;;  %931 = vmatprep.subr.bf16.mxu1 %v2280_v6  ;;  %v106_v56 = vld [vmem:[%s3692_s3 + $0x48] sm:$0xff]  ;;  %v2218_v6 = vcombine.high %v130_v3, %v134_v4  ;;  %v2217_v9 = vcombine.low %v130_v3, %v134_v4  ;;  %v119_v3 = vld [vmem:[%s3692_s3 + $0xb0] sm:$0xff] }
  0x9d   :  { %v110_v57 = vld [vmem:[%s3692_s3 + $0x68] sm:$0xff]  ;;  %v2472_v4 = vld [vmem:[%s3695_s5 + $0x10] ss:$8 sps:$4 sm:$0xff]  }
  0x9e   :  { %51 = vadd.xlane.f32.xlu1 %v50_v58  ;;  %v2193_v61 = vcombine.low %v106_v56, %v110_v57 }
  0x9f   :  { %932 = vmatpush1.bf16.msra.mxu1 %v2279_v7  ;;  %v138_v7 = vld [vmem:[%s3692_s3 + $0x148] sm:$0xff] }
  0xa0   :  { %933 = vmatprep.subr.bf16.mxu1 %v2288_v10  ;;  %v2226_v10 = vcombine.high %v138_v7, %v142_v8  ;;  %v2225_v13 = vcombine.low %v138_v7, %v142_v8  ;;  %v2475_v7 = vld [vmem:[%s3695_s5 + $0x20] ss:$8 sps:$4 sm:$0xff]   ;;  %v2476_v8 = vld [vmem:[%s3695_s5 + $0x34] ss:$8 sps:$4 sm:$0xff]  }
  0xa3   :  { %934 = vmatpush1.bf16.msra.mxu1 %v2287_v11  ;;  %v146_v11 = vld [vmem:[%s3692_s3 + $0x188] sm:$0xff] }
  0xa4   :  { %935 = vmatprep.subr.bf16.mxu1 %v2296_v14  ;;  %v2234_v14 = vcombine.high %v146_v11, %v150_v12  ;;  %v2233_v17 = vcombine.low %v146_v11, %v150_v12  ;;  %v123_v11 = vld [vmem:[%s3692_s3 + $0xd0] sm:$0xff] }
  0xa5   :  { %v127_v12 = vld [vmem:[%s3692_s3 + $0xf0] sm:$0xff] }
  0xa7   :  { %936 = vmatpush1.bf16.msra.mxu1 %v2295_v15  ;;  %v154_v15 = vld [vmem:[%s3692_s3 + $0x1c8] sm:$0xff] }
  0xa8   :  { %937 = vmatprep.subr.bf16.mxu1 %v2304_v18  ;;  %v2242_v18 = vcombine.high %v154_v15, %v158_v16  ;;  %v2241_v21 = vcombine.low %v154_v15, %v158_v16  ;;  %v131_v16 = vld [vmem:[%s3692_s3 + $0x110] sm:$0xff] }
  0xab   :  { %938 = vmatpush1.bf16.msra.mxu1 %v2303_v19  ;;  %v162_v19 = vld [vmem:[%s3692_s3 + $0x208] sm:$0xff] }
  0xac   :  { %950 = vmatprep.subr.bf16.mxu1 %v2186_v22  ;;  %v2250_v22 = vcombine.high %v162_v19, %v166_v20 }
 0x127   :  { %v49_v24 = vpop.xlane.xlu1 %48 }
 0x128   :  { %v53_v25 = vmul.f32 0.00390625, %v49_v24  ;;  %v174_v24 = vld [vmem:[%s3692_s3 + $0x268] sm:$0xff] }
 0x12a   :  { %v55_v26 = vadd.f32 1e-05, %v53_v25  ;;  %v2249_v25 = vcombine.low %v162_v19, %v166_v20  ;;  %v2212_v19 = vcombine.high %v123_v11, %v127_v12  ;;  %v2482_v20 = vld [vmem:[%s3695_s5 + $0x54] ss:$8 sps:$4 sm:$0xff]  }
 0x12b   :  { %v52_v27 = vpop.xlane.xlu1 %51 }
 0x12c   :  { %2659 = vrsqrt.f32 %v55_v26  ;;  %v54_v29 = vmul.f32 0.00390625, %v52_v27  ;;  %v178_v27 = vld [vmem:[%s3692_s3 + $0x288] sm:$0xff] }
 0x12e   :  { %v56_v30 = vadd.f32 1e-05, %v54_v29 }
 0x130   :  { %2661 = vrsqrt.f32 %v56_v30  ;;  %v2266_v30 = vcombine.high %v178_v27, %v182_v28 }
 0x136   :  { %v2660_v35 = vpop.eup %2659 }
 0x137   :  { %v59_v36 = vmul.f32 %v2660_v35, %v2856_v47  ;;  %v60_v37 = vmul.f32 %v2660_v35, %v2859_v48  ;;  %v190_v35 = vld [vmem:[%s3692_s3 + $0x2e8] sm:$0xff] }
 0x139   :  { %v76_v46 = vmul.f32 %v72_v38, %v60_v37  ;;  %v75_v47 = vmul.f32 %v68_v40, %v59_v36  ;;  %v2265_v36 = vcombine.low %v178_v27, %v182_v28  ;;  %v2274_v37 = vcombine.high %v186_v34, %v190_v35  ;;  %v147_v28 = vld [vmem:[%s3692_s3 + $0x190] sm:$0xff] }
 0x13a   :  { %v2662_v41 = vpop.eup %2661 }
 0x13b   :  { %v61_v44 = vmul.f32 %v2662_v41, %v2866_v53  ;;  %v62_v45 = vmul.f32 %v2662_v41, %v2869_v54  ;;  %v92_v50 = vadd.f32 %v88_v42, %v76_v46  ;;  %v91_v52 = vadd.f32 %v84_v43, %v75_v47  ;;  %v210_v46 = vld [vmem:[%s3692_s3 + $0x388] sm:$0xff] }
 0x13c   :  { %v2194_v54 = vcombine.high %v106_v56, %v110_v57  ;;  %v214_v47 = vld [vmem:[%s3692_s3 + $0x3a8] sm:$0xff]  ;;  %v99_v56 = vld [vmem:[%s3692_s3 + $0x10] sm:$0xff] }
 0x13d   :  { %v78_v48 = vmul.f32 %v72_v38, %v62_v45  ;;  %v77_v49 = vmul.f32 %v68_v40, %v61_v44  ;;  %v194_v38 = vld [vmem:[%s3692_s3 + $0x308] sm:$0xff]  ;;  %v2273_v40 = vcombine.low %v186_v34, %v190_v35  ;;  %v103_v57 = vld [vmem:[%s3692_s3 + $0x30] sm:$0xff] }
 0x13e   :  { %v2282_v41 = vcombine.high %v194_v38, %v198_v39  ;;  %v2281_v44 = vcombine.low %v194_v38, %v198_v39  ;;  %v2188_v63 = vcombine.high %v99_v56, %v103_v57  ;;  %v2488_v39 = vld [vmem:[%s3695_s5 + $0x74] ss:$8 sps:$4 sm:$0xff]  }
 0x13f   :  { %v94_v51 = vadd.f32 %v88_v42, %v78_v48  ;;  %v93_v55 = vadd.f32 %v84_v43, %v77_v49  ;;  %v202_v42 = vld [vmem:[%s3692_s3 + $0x348] sm:$0xff]  ;;  %v2298_v49 = vcombine.high %v210_v46, %v214_v47 }
 0x140   :  { %v206_v43 = vld [vmem:[%s3692_s3 + $0x368] sm:$0xff] }
 0x141   :  { %v2945_v58 = vpack.c.bf16 %v94_v51, %v92_v50  ;;  %v2947_v53 = vpack.c.bf16 %v93_v55, %v91_v52  ;;  %v2290_v45 = vcombine.high %v202_v42, %v206_v43  ;;  %v2289_v48 = vcombine.low %v202_v42, %v206_v43  ;;  %v218_v50 = vld [vmem:[%s3692_s3 + $0x3c8] sm:$0xff]  ;;  %v167_v42 = vld [vmem:[%s3692_s3 + $0x230] sm:$0xff] }
 0x142   :  { %v222_v51 = vld [vmem:[%s3692_s3 + $0x3e8] sm:$0xff]  ;;  %v2297_v52 = vcombine.low %v210_v46, %v214_v47  ;;  %v2490_v43 = vld [vmem:[%s3695_s5 + $0x70] ss:$8 sps:$4 sm:$0xff]  }
 0x143   :  { %939 = vmatprep.mubr.bf16.mxu1 %v2945_v58  ;;  %v2306_v55 = vcombine.high %v218_v50, %v222_v51  ;;  %v2305_v59 = vcombine.low %v218_v50, %v222_v51  ;;  %v171_v47 = vld [vmem:[%s3692_s3 + $0x250] sm:$0xff] }
 0x144   :  { %940 = vmatmul.mubr.bf16.vlgmr.msra.gmra.mrb[0].mxu1 %v2947_v53  ;;  %v2494_v51 = vld [vmem:[%s3695_s5 + $0x94] ss:$8 sps:$4 sm:$0xff]  }
 0x145   :  { %951 = vmatpush1.bf16.msra.mxu1 %v2185_v23  ;;  %982 = vmatprep.mubr.bf16.mxu1 %v2945_v58  ;;  %v170_v23 = vld [vmem:[%s3692_s3 + $0x248] sm:$0xff] }
 0x146   :  { %952 = vmatprep.subr.bf16.mxu1 %v2194_v54  ;;  %v2258_v26 = vcombine.high %v170_v23, %v174_v24  ;;  %v2257_v29 = vcombine.low %v170_v23, %v174_v24  ;;  %v2467_v54 = vld [vmem:[%s3695_s5 + $0x4] ss:$8 sps:$4 sm:$0xff]   ;;  %v143_v23 = vld [vmem:[%s3692_s3 + $0x170] sm:$0xff] }
 0x147   :  { %1983 = vmatprep.subr.bf16.mxu0 %v2467_v54  ;;  %v2484_v24 = vld [vmem:[%s3695_s5 + $0x50] ss:$8 sps:$4 sm:$0xff]  }
 0x149   :  { %953 = vmatpush1.bf16.msra.mxu1 %v2193_v61  ;;  %v111_v61 = vld [vmem:[%s3692_s3 + $0x70] sm:$0xff] }
 0x14a   :  { %954 = vmatprep.subr.bf16.mxu1 %v2202_v62  ;;  %v2469_v62 = vld [vmem:[%s3695_s5] ss:$8 sps:$4 sm:$0xff]  }
 0x14b   :  { %1984 = vmatpush1.bf16.msra.mxu0 %v2469_v62  ;;  %v191_v62 = vld [vmem:[%s3692_s3 + $0x2f0] sm:$0xff] }
 0x14c   :  { %1985 = vmatprep.subr.bf16.mxu0 %v2470_v0 }
 0x14d   :  { %955 = vmatpush1.bf16.msra.mxu1 %v2201_v1  ;;  %v2187_v1 = vcombine.low %v99_v56, %v103_v57  ;;  %v183_v56 = vld [vmem:[%s3692_s3 + $0x2b0] sm:$0xff] }
 0x14e   :  { %956 = vmatprep.subr.bf16.mxu1 %v2210_v2  ;;  %v115_v2 = vld [vmem:[%s3692_s3 + $0x90] sm:$0xff] }
 0x14f   :  { %1986 = vmatpush1.bf16.msra.mxu0 %v2472_v4  ;;  %v2203_v15 = vcombine.low %v115_v2, %v119_v3  ;;  %v2496_v57 = vld [vmem:[%s3695_s5 + $0x90] ss:$8 sps:$4 sm:$0xff]  }
 0x150   :  { %v199_v4 = vld [vmem:[%s3692_s3 + $0x330] sm:$0xff] }
 0x151   :  { %957 = vmatpush1.bf16.msra.mxu1 %v2209_v5  ;;  %v2196_v5 = vcombine.high %v107_v60, %v111_v61 }
 0x152   :  { %958 = vmatprep.subr.bf16.mxu1 %v2218_v6  ;;  %v2473_v6 = vld [vmem:[%s3695_s5 + $0x24] ss:$8 sps:$4 sm:$0xff]  }
 0x153   :  { %1987 = vmatprep.subr.bf16.mxu0 %v2473_v6 }
 0x154   :  { %1988 = vmatpush1.bf16.msra.mxu0 %v2475_v7  ;;  %v2503_v7 = vld [vmem:[%s3695_s5 + $0xc4] ss:$8 sps:$4 sm:$0xff]  }
 0x155   :  { %959 = vmatpush1.bf16.msra.mxu1 %v2217_v9  ;;  %v2195_v9 = vcombine.low %v107_v60, %v111_v61  ;;  %1989 = vmatprep.subr.bf16.mxu0 %v2476_v8  ;;  %v187_v61 = vld [vmem:[%s3692_s3 + $0x2d0] sm:$0xff] }
 0x156   :  { %960 = vmatprep.subr.bf16.mxu1 %v2226_v10  ;;  %v2204_v10 = vcombine.high %v115_v2, %v119_v3  ;;  %v195_v3 = vld [vmem:[%s3692_s3 + $0x310] sm:$0xff]  ;;  %v2276_v6 = vcombine.high %v187_v61, %v191_v62  ;;  %v2275_v8 = vcombine.low %v187_v61, %v191_v62  ;;  %v156_v62 = vld [vmem:[%s3692_s3 + $0x1d8] sm:$0xff] }
 0x159   :  { %961 = vmatpush1.bf16.msra.mxu1 %v2225_v13  ;;  %v2478_v13 = vld [vmem:[%s3695_s5 + $0x30] ss:$8 sps:$4 sm:$0xff]  }
 0x15a   :  { %962 = vmatprep.subr.bf16.mxu1 %v2234_v14  ;;  %v2479_v14 = vld [vmem:[%s3695_s5 + $0x44] ss:$8 sps:$4 sm:$0xff]   ;;  %1990 = vmatpush1.bf16.msra.mxu0 %v2478_v13  ;;  %v2506_v13 = vld [vmem:[%s3695_s5 + $0xd4] ss:$8 sps:$4 sm:$0xff]  }
 0x15b   :  { %1991 = vmatprep.subr.bf16.mxu0 %v2479_v14  ;;  %v2283_v14 = vcombine.low %v195_v3, %v199_v4 }
 0x15d   :  { %963 = vmatpush1.bf16.msra.mxu1 %v2233_v17  ;;  %v135_v17 = vld [vmem:[%s3692_s3 + $0x130] sm:$0xff] }
 0x15e   :  { %964 = vmatprep.subr.bf16.mxu1 %v2242_v18  ;;  %v2481_v18 = vld [vmem:[%s3695_s5 + $0x40] ss:$8 sps:$4 sm:$0xff]   ;;  %v2219_v27 = vcombine.low %v131_v16, %v135_v17 }
 0x15f   :  { %1992 = vmatpush1.bf16.msra.mxu0 %v2481_v18  ;;  %v215_v18 = vld [vmem:[%s3692_s3 + $0x3b0] sm:$0xff] }
 0x160   :  { %1993 = vmatprep.subr.bf16.mxu0 %v2482_v20 }
 0x161   :  { %965 = vmatpush1.bf16.msra.mxu1 %v2241_v21  ;;  %v2211_v21 = vcombine.low %v123_v11, %v127_v12  ;;  %v2505_v11 = vld [vmem:[%s3695_s5 + $0xc0] ss:$8 sps:$4 sm:$0xff]   ;;  %v2284_v12 = vcombine.high %v195_v3, %v199_v4  ;;  %v168_v3 = vld [vmem:[%s3692_s3 + $0x238] sm:$0xff] }
 0x162   :  { %966 = vmatprep.subr.bf16.mxu1 %v2250_v22  ;;  %v139_v22 = vld [vmem:[%s3692_s3 + $0x150] sm:$0xff] }
 0x163   :  { %v2228_v34 = vcombine.high %v139_v22, %v143_v23  ;;  %1994 = vmatpush1.bf16.msra.mxu0 %v2484_v24  ;;  %v2227_v35 = vcombine.low %v139_v22, %v143_v23  ;;  %v219_v23 = vld [vmem:[%s3692_s3 + $0x3d0] sm:$0xff] }
 0x164   :  { %v223_v24 = vld [vmem:[%s3692_s3 + $0x3f0] sm:$0xff] }
 0x165   :  { %967 = vmatpush1.bf16.msra.mxu1 %v2249_v25  ;;  %v2220_v25 = vcombine.high %v131_v16, %v135_v17  ;;  %v211_v17 = vld [vmem:[%s3692_s3 + $0x390] sm:$0xff] }
 0x166   :  { %968 = vmatprep.subr.bf16.mxu1 %v2258_v26  ;;  %v2485_v26 = vld [vmem:[%s3695_s5 + $0x64] ss:$8 sps:$4 sm:$0xff]   ;;  %v2300_v22 = vcombine.high %v211_v17, %v215_v18 }
 0x167   :  { %1995 = vmatprep.subr.bf16.mxu0 %v2485_v26  ;;  %v2514_v26 = vld [vmem:[%s3695_s5 + $0xf0] ss:$8 sps:$4 sm:$0xff]  }
 0x169   :  { %969 = vmatpush1.bf16.msra.mxu1 %v2257_v29  ;;  %v151_v29 = vld [vmem:[%s3692_s3 + $0x1b0] sm:$0xff] }
 0x16a   :  { %970 = vmatprep.subr.bf16.mxu1 %v2266_v30  ;;  %v2487_v30 = vld [vmem:[%s3695_s5 + $0x60] ss:$8 sps:$4 sm:$0xff]   ;;  %v2236_v38 = vcombine.high %v147_v28, %v151_v29 }
 0x16b   :  { %1996 = vmatpush1.bf16.msra.mxu0 %v2487_v30  ;;  %v104_v30 = vld [vmem:[%s3692_s3 + $0x38] sm:$0xff] }
 0x16c   :  { %1997 = vmatprep.subr.bf16.mxu0 %v2488_v39 }
 0x16d   :  { %971 = vmatpush1.bf16.msra.mxu1 %v2265_v36  ;;  %v155_v36 = vld [vmem:[%s3692_s3 + $0x1d0] sm:$0xff] }
 0x16e   :  { %972 = vmatprep.subr.bf16.mxu1 %v2274_v37  ;;  %v159_v37 = vld [vmem:[%s3692_s3 + $0x1f0] sm:$0xff] }
 0x16f   :  { %1998 = vmatpush1.bf16.msra.mxu0 %v2490_v43  ;;  %v2243_v46 = vcombine.low %v155_v36, %v159_v37 }
 0x171   :  { %973 = vmatpush1.bf16.msra.mxu1 %v2273_v40  ;;  %v2235_v40 = vcombine.low %v147_v28, %v151_v29  ;;  %v2308_v28 = vcombine.high %v219_v23, %v223_v24  ;;  %v100_v29 = vld [vmem:[%s3692_s3 + $0x18] sm:$0xff] }
 0x172   :  { %974 = vmatprep.subr.bf16.mxu1 %v2282_v41  ;;  %v163_v41 = vld [vmem:[%s3692_s3 + $0x210] sm:$0xff]  ;;  %v2189_v39 = vcombine.low %v100_v29, %v104_v30 }
 0x173   :  { %v2252_v50 = vcombine.high %v163_v41, %v167_v42 }
 0x175   :  { %975 = vmatpush1.bf16.msra.mxu1 %v2281_v44  ;;  %v2244_v44 = vcombine.high %v155_v36, %v159_v37  ;;  %v2190_v36 = vcombine.high %v100_v29, %v104_v30  ;;  %v108_v37 = vld [vmem:[%s3692_s3 + $0x58] sm:$0xff] }
 0x176   :  { %976 = vmatprep.subr.bf16.mxu1 %v2290_v45  ;;  %v2491_v45 = vld [vmem:[%s3695_s5 + $0x84] ss:$8 sps:$4 sm:$0xff]   ;;  %v220_v30 = vld [vmem:[%s3692_s3 + $0x3d8] sm:$0xff] }
 0x177   :  { %1999 = vmatprep.subr.bf16.mxu0 %v2491_v45  ;;  %v124_v45 = vld [vmem:[%s3692_s3 + $0xd8] sm:$0xff] }
 0x179   :  { %977 = vmatpush1.bf16.msra.mxu1 %v2289_v48  ;;  %v175_v48 = vld [vmem:[%s3692_s3 + $0x270] sm:$0xff] }
 0x17a   :  { %978 = vmatprep.subr.bf16.mxu1 %v2298_v49  ;;  %v2493_v49 = vld [vmem:[%s3695_s5 + $0x80] ss:$8 sps:$4 sm:$0xff]   ;;  %v2260_v54 = vcombine.high %v171_v47, %v175_v48  ;;  %v2259_v60 = vcombine.low %v171_v47, %v175_v48 }
 0x17b   :  { %2000 = vmatpush1.bf16.msra.mxu0 %v2493_v49  ;;  %v132_v49 = vld [vmem:[%s3692_s3 + $0x118] sm:$0xff] }
 0x17c   :  { %2001 = vmatprep.subr.bf16.mxu0 %v2494_v51 }
 0x17d   :  { %979 = vmatpush1.bf16.msra.mxu1 %v2297_v52  ;;  %v2251_v52 = vcombine.low %v163_v41, %v167_v42  ;;  %v116_v41 = vld [vmem:[%s3692_s3 + $0x98] sm:$0xff] }
 0x17e   :  { %980 = vmatprep.subr.bf16.mxu1 %v2306_v55  ;;  %v179_v55 = vld [vmem:[%s3692_s3 + $0x290] sm:$0xff]  ;;  %v120_v42 = vld [vmem:[%s3692_s3 + $0xb8] sm:$0xff] }
 0x17f   :  { %2002 = vmatpush1.bf16.msra.mxu0 %v2496_v57  ;;  %v2268_v0 = vcombine.high %v179_v55, %v183_v56  ;;  %v2267_v2 = vcombine.low %v179_v55, %v183_v56  ;;  %v2205_v47 = vcombine.low %v116_v41, %v120_v42  ;;  %v144_v55 = vld [vmem:[%s3692_s3 + $0x178] sm:$0xff] }
 0x181   :  { %981 = vmatpush1.bf16.msra.mxu1 %v2305_v59  ;;  %v2497_v59 = vld [vmem:[%s3695_s5 + $0xa4] ss:$8 sps:$4 sm:$0xff]  }
 0x182   :  { %993 = vmatprep.subr.bf16.mxu1 %v2188_v63  ;;  %v2499_v63 = vld [vmem:[%s3695_s5 + $0xa0] ss:$8 sps:$4 sm:$0xff]   ;;  %2003 = vmatprep.subr.bf16.mxu0 %v2497_v59  ;;  %v152_v59 = vld [vmem:[%s3692_s3 + $0x1b8] sm:$0xff] }
 0x183   :  { %2004 = vmatpush1.bf16.msra.mxu0 %v2499_v63  ;;  %v160_v63 = vld [vmem:[%s3692_s3 + $0x1f8] sm:$0xff] }
 0x184   :  { %983 = vmatmul.mubr.bf16.vlgmr.msra.gmra.mrb[4].mxu1 %v2947_v53  ;;  %v2245_v4 = vcombine.low %v156_v62, %v160_v63 }
 0x185   :  { %994 = vmatpush1.bf16.msra.mxu1 %v2187_v1  ;;  %1025 = vmatprep.mubr.bf16.mxu1 %v2945_v58  ;;  %v2500_v1 = vld [vmem:[%s3695_s5 + $0xb4] ss:$8 sps:$4 sm:$0xff]  }
 0x186   :  { %995 = vmatprep.subr.bf16.mxu1 %v2196_v5  ;;  %v2502_v5 = vld [vmem:[%s3695_s5 + $0xb0] ss:$8 sps:$4 sm:$0xff]   ;;  %2005 = vmatprep.subr.bf16.mxu0 %v2500_v1  ;;  %v2246_v1 = vcombine.high %v156_v62, %v160_v63 }
 0x187   :  { %2006 = vmatpush1.bf16.msra.mxu0 %v2502_v5 }
 0x188   :  { %2007 = vmatprep.subr.bf16.mxu0 %v2503_v7  ;;  %v176_v7 = vld [vmem:[%s3692_s3 + $0x278] sm:$0xff] }
 0x189   :  { %996 = vmatpush1.bf16.msra.mxu1 %v2195_v9  ;;  %v203_v9 = vld [vmem:[%s3692_s3 + $0x350] sm:$0xff] }
 0x18a   :  { %997 = vmatprep.subr.bf16.mxu1 %v2204_v10  ;;  %v207_v10 = vld [vmem:[%s3692_s3 + $0x370] sm:$0xff] }
 0x18b   :  { %2008 = vmatpush1.bf16.msra.mxu0 %v2505_v11  ;;  %v2292_v16 = vcombine.high %v203_v9, %v207_v10  ;;  %v2291_v20 = vcombine.low %v203_v9, %v207_v10  ;;  %v180_v10 = vld [vmem:[%s3692_s3 + $0x298] sm:$0xff] }
 0x18c   :  { %2009 = vmatprep.subr.bf16.mxu0 %v2506_v13  ;;  %v184_v11 = vld [vmem:[%s3692_s3 + $0x2b8] sm:$0xff] }
 0x18d   :  { %998 = vmatpush1.bf16.msra.mxu1 %v2203_v15  ;;  %v2508_v15 = vld [vmem:[%s3695_s5 + $0xd0] ss:$8 sps:$4 sm:$0xff]   ;;  %v2270_v13 = vcombine.high %v180_v10, %v184_v11 }
 0x18e   :  { %999 = vmatprep.subr.bf16.mxu1 %v2212_v19  ;;  %v2509_v19 = vld [vmem:[%s3695_s5 + $0xe4] ss:$8 sps:$4 sm:$0xff]  }
 0x18f   :  { %2010 = vmatpush1.bf16.msra.mxu0 %v2508_v15  ;;  %v192_v15 = vld [vmem:[%s3692_s3 + $0x2f8] sm:$0xff] }
 0x190   :  { %2011 = vmatprep.subr.bf16.mxu0 %v2509_v19  ;;  %v200_v19 = vld [vmem:[%s3692_s3 + $0x338] sm:$0xff] }
 0x191   :  { %1000 = vmatpush1.bf16.msra.mxu1 %v2211_v21  ;;  %v2511_v21 = vld [vmem:[%s3695_s5 + $0xe0] ss:$8 sps:$4 sm:$0xff]  }
 0x192   :  { %1001 = vmatprep.subr.bf16.mxu1 %v2220_v25  ;;  %v2512_v25 = vld [vmem:[%s3695_s5 + $0xf4] ss:$8 sps:$4 sm:$0xff]  }
 0x193   :  { %2012 = vmatpush1.bf16.msra.mxu0 %v2511_v21 }
 0x194   :  { %2013 = vmatprep.subr.bf16.mxu0 %v2512_v25 }
 0x195   :  { %1002 = vmatpush1.bf16.msra.mxu1 %v2219_v27  ;;  %v2299_v27 = vcombine.low %v211_v17, %v215_v18  ;;  %v196_v18 = vld [vmem:[%s3692_s3 + $0x318] sm:$0xff] }
 0x196   :  { %1003 = vmatprep.subr.bf16.mxu1 %v2228_v34  ;;  %v2517_v34 = vld [vmem:[%s3695_s5 + $0x104] ss:$8 sps:$4 sm:$0xff]   ;;  %v2286_v21 = vcombine.high %v196_v18, %v200_v19 }
 0x197   :  { %2014 = vmatpush1.bf16.msra.mxu0 %v2514_v26  ;;  %v212_v26 = vld [vmem:[%s3692_s3 + $0x398] sm:$0xff] }
 0x198   :  { %2026 = vmatprep.subr.bf16.mxu0 %v2517_v34  ;;  %v224_v34 = vld [vmem:[%s3692_s3 + $0x3f8] sm:$0xff] }
 0x199   :  { %1004 = vmatpush1.bf16.msra.mxu1 %v2227_v35  ;;  %v2307_v35 = vcombine.low %v219_v23, %v223_v24  ;;  %v208_v23 = vld [vmem:[%s3692_s3 + $0x378] sm:$0xff]  ;;  %v2285_v24 = vcombine.low %v196_v18, %v200_v19  ;;  %v2529_v18 = vld [vmem:[%s3695_s5 + $0x144] ss:$8 sps:$4 sm:$0xff]   ;;  %v2527_v19 = vld [vmem:[%s3695_s5 + $0x140] ss:$8 sps:$4 sm:$0xff]  }
 0x19a   :  { %1005 = vmatprep.subr.bf16.mxu1 %v2236_v38  ;;  %v112_v38 = vld [vmem:[%s3692_s3 + $0x78] sm:$0xff] }
 0x19b   :  { %v2197_v43 = vcombine.low %v108_v37, %v112_v38 }
 0x19d   :  { %1006 = vmatpush1.bf16.msra.mxu1 %v2235_v40  ;;  %v2198_v40 = vcombine.high %v108_v37, %v112_v38  ;;  %v2309_v37 = vcombine.low %v220_v30, %v224_v34  ;;  %v3335_v38 = vld [vmem:[%s3696_s4] sm:$0xff] }
 0x19e   :  { %1007 = vmatprep.subr.bf16.mxu1 %v2244_v44  ;;  %v2206_v44 = vcombine.high %v116_v41, %v120_v42 }
 0x1a1   :  { %1008 = vmatpush1.bf16.msra.mxu1 %v2243_v46  ;;  %v128_v46 = vld [vmem:[%s3692_s3 + $0xf8] sm:$0xff] }
 0x1a2   :  { %1009 = vmatprep.subr.bf16.mxu1 %v2252_v50  ;;  %v2214_v48 = vcombine.high %v124_v45, %v128_v46  ;;  %v2213_v50 = vcombine.low %v124_v45, %v128_v46 }
 0x1a5   :  { %1010 = vmatpush1.bf16.msra.mxu1 %v2251_v52  ;;  %v140_v52 = vld [vmem:[%s3692_s3 + $0x158] sm:$0xff] }
 0x1a6   :  { %1011 = vmatprep.subr.bf16.mxu1 %v2260_v54  ;;  %v2230_v57 = vcombine.high %v140_v52, %v144_v55  ;;  %v148_v54 = vld [vmem:[%s3692_s3 + $0x198] sm:$0xff] }
 0x1a7   :  { %v2238_v61 = vcombine.high %v148_v54, %v152_v59 }
 0x1a9   :  { %1012 = vmatpush1.bf16.msra.mxu1 %v2259_v60  ;;  %v2229_v60 = vcombine.low %v140_v52, %v144_v55 }
 0x1aa   :  { %1013 = vmatprep.subr.bf16.mxu1 %v2268_v0  ;;  %v2237_v0 = vcombine.low %v148_v54, %v152_v59 }
 0x1ad   :  { %1014 = vmatpush1.bf16.msra.mxu1 %v2267_v2  ;;  %v164_v2 = vld [vmem:[%s3692_s3 + $0x218] sm:$0xff] }
 0x1ae   :  { %1015 = vmatprep.subr.bf16.mxu1 %v2276_v6  ;;  %v2254_v5 = vcombine.high %v164_v2, %v168_v3  ;;  %v172_v6 = vld [vmem:[%s3692_s3 + $0x258] sm:$0xff] }
 0x1af   :  { %v2262_v9 = vcombine.high %v172_v6, %v176_v7 }
 0x1b1   :  { %1016 = vmatpush1.bf16.msra.mxu1 %v2275_v8  ;;  %v2253_v8 = vcombine.low %v164_v2, %v168_v3 }
 0x1b2   :  { %1017 = vmatprep.subr.bf16.mxu1 %v2284_v12  ;;  %v2261_v12 = vcombine.low %v172_v6, %v176_v7 }
 0x1b5   :  { %1018 = vmatpush1.bf16.msra.mxu1 %v2283_v14  ;;  %v188_v14 = vld [vmem:[%s3692_s3 + $0x2d8] sm:$0xff] }
 0x1b6   :  { %1019 = vmatprep.subr.bf16.mxu1 %v2292_v16  ;;  %v2269_v16 = vcombine.low %v180_v10, %v184_v11  ;;  %v2278_v17 = vcombine.high %v188_v14, %v192_v15  ;;  %v2515_v11 = vld [vmem:[%s3695_s5 + $0x100] ss:$8 sps:$4 sm:$0xff]  }
 0x1b9   :  { %1020 = vmatpush1.bf16.msra.mxu1 %v2291_v20  ;;  %v2277_v20 = vcombine.low %v188_v14, %v192_v15  ;;  %v2523_v14 = vld [vmem:[%s3695_s5 + $0x124] ss:$8 sps:$4 sm:$0xff]   ;;  %v2521_v15 = vld [vmem:[%s3695_s5 + $0x120] ss:$8 sps:$4 sm:$0xff]  }
 0x1ba   :  { %1021 = vmatprep.subr.bf16.mxu1 %v2300_v22  ;;  %v204_v22 = vld [vmem:[%s3692_s3 + $0x358] sm:$0xff] }
 0x1bb   :  { %v2294_v25 = vcombine.high %v204_v22, %v208_v23 }
 0x1bd   :  { %1022 = vmatpush1.bf16.msra.mxu1 %v2299_v27  ;;  %v216_v27 = vld [vmem:[%s3692_s3 + $0x3b8] sm:$0xff] }
 0x1be   :  { %1023 = vmatprep.subr.bf16.mxu1 %v2308_v28  ;;  %v2293_v28 = vcombine.low %v204_v22, %v208_v23  ;;  %v2302_v29 = vcombine.high %v212_v26, %v216_v27  ;;  %v2535_v22 = vld [vmem:[%s3695_s5 + $0x164] ss:$8 sps:$4 sm:$0xff]   ;;  %v237_v23 = vsub.s32 2, %v2917_v31 }
 0x1c1   :  { %1024 = vmatpush1.bf16.msra.mxu1 %v2307_v35  ;;  %v2301_v35 = vcombine.low %v212_v26, %v216_v27  ;;  %v238_v26 = vrot.slane %v3335_v38, %v237_v23  ;;  %v2538_v27 = vld [vmem:[%s3695_s5 + $0x174] ss:$8 sps:$4 sm:$0xff]   ;;  %v2566_v23 = vld [vmem:[%s3695_s5 + $0x210] ss:$8 sps:$4 sm:$0xff]  }
 0x1c2   :  { %1036 = vmatprep.subr.bf16.mxu1 %v2190_v36  ;;  %v2310_v36 = vcombine.high %v220_v30, %v224_v34  ;;  %v2536_v30 = vld [vmem:[%s3695_s5 + $0x170] ss:$8 sps:$4 sm:$0xff]  }
 0x1c4   :  { %1026 = vmatmul.mubr.bf16.vlgmr.msra.gmra.mrb[8].mxu1 %v2947_v53 }
 0x1c5   :  { %1037 = vmatpush1.bf16.msra.mxu1 %v2189_v39  ;;  %1068 = vmatprep.mubr.bf16.mxu1 %v2945_v58  ;;  %v136_v58 = vld [vmem:[%s3692_s3 + $0x138] sm:$0xff]  ;;  %v230_v39 = vrot.slane %v3335_v38, %v2923_v33 }
 0x1c6   :  { %1038 = vmatprep.subr.bf16.mxu1 %v2198_v40  ;;  %v2222_v51 = vcombine.high %v132_v49, %v136_v58  ;;  %v2221_v56 = vcombine.low %v132_v49, %v136_v58  ;;  %v234_v40 = vrot.slane %v3335_v38, %v2920_v32 }
 0x1c9   :  { %1039 = vmatpush1.bf16.msra.mxu1 %v2197_v43 }
 0x1ca   :  { %1040 = vmatprep.subr.bf16.mxu1 %v2206_v44 }
 0x1cd   :  { %1041 = vmatpush1.bf16.msra.mxu1 %v2205_v47 }
 0x1ce   :  { %1042 = vmatprep.subr.bf16.mxu1 %v2214_v48 }
 0x1d1   :  { %1043 = vmatpush1.bf16.msra.mxu1 %v2213_v50 }
 0x1d2   :  { %1044 = vmatprep.subr.bf16.mxu1 %v2222_v51 }
 0x1d5   :  { %1045 = vmatpush1.bf16.msra.mxu1 %v2221_v56 }
 0x1d6   :  { %1046 = vmatprep.subr.bf16.mxu1 %v2230_v57 }
 0x1d9   :  { %1047 = vmatpush1.bf16.msra.mxu1 %v2229_v60 }
 0x1da   :  { %1048 = vmatprep.subr.bf16.mxu1 %v2238_v61 }
 0x1dd   :  { %1049 = vmatpush1.bf16.msra.mxu1 %v2237_v0 }
 0x1de   :  { %1050 = vmatprep.subr.bf16.mxu1 %v2246_v1 }
 0x1e1   :  { %1051 = vmatpush1.bf16.msra.mxu1 %v2245_v4 }
 0x1e2   :  { %1052 = vmatprep.subr.bf16.mxu1 %v2254_v5 }
 0x1e5   :  { %1053 = vmatpush1.bf16.msra.mxu1 %v2253_v8 }
 0x1e6   :  { %1054 = vmatprep.subr.bf16.mxu1 %v2262_v9 }
 0x1e9   :  { %1055 = vmatpush1.bf16.msra.mxu1 %v2261_v12  ;;  %v2520_v12 = vld [vmem:[%s3695_s5 + $0x114] ss:$8 sps:$4 sm:$0xff]  }
 0x1ea   :  { %1056 = vmatprep.subr.bf16.mxu1 %v2270_v13  ;;  %v2518_v13 = vld [vmem:[%s3695_s5 + $0x110] ss:$8 sps:$4 sm:$0xff]  }
 0x1ed   :  { %1057 = vmatpush1.bf16.msra.mxu1 %v2269_v16  ;;  %v2526_v16 = vld [vmem:[%s3695_s5 + $0x134] ss:$8 sps:$4 sm:$0xff]  }
 0x1ee   :  { %1058 = vmatprep.subr.bf16.mxu1 %v2278_v17  ;;  %v2524_v17 = vld [vmem:[%s3695_s5 + $0x130] ss:$8 sps:$4 sm:$0xff]  }
 0x1f1   :  { %1059 = vmatpush1.bf16.msra.mxu1 %v2277_v20  ;;  %v2532_v20 = vld [vmem:[%s3695_s5 + $0x154] ss:$8 sps:$4 sm:$0xff]  }
 0x1f2   :  { %1060 = vmatprep.subr.bf16.mxu1 %v2286_v21  ;;  %v2530_v21 = vld [vmem:[%s3695_s5 + $0x150] ss:$8 sps:$4 sm:$0xff]  }
 0x1f5   :  { %1061 = vmatpush1.bf16.msra.mxu1 %v2285_v24  ;;  %v241_v24 = vsub.s32 3, %v2917_v31 }
 0x1f6   :  { %1062 = vmatprep.subr.bf16.mxu1 %v2294_v25  ;;  %v2533_v25 = vld [vmem:[%s3695_s5 + $0x160] ss:$8 sps:$4 sm:$0xff]  }
 0x1f9   :  { %1063 = vmatpush1.bf16.msra.mxu1 %v2293_v28  ;;  %v242_v28 = vrot.slane %v3335_v38, %v241_v24  ;;  %v2571_v24 = vld [vmem:[%s3695_s5 + $0x224] ss:$8 sps:$4 sm:$0xff]  }
 0x1fa   :  { %1064 = vmatprep.subr.bf16.mxu1 %v2302_v29 }
 0x1fd   :  { %1065 = vmatpush1.bf16.msra.mxu1 %v2301_v35 }
 0x1fe   :  { %1066 = vmatprep.subr.bf16.mxu1 %v2310_v36  ;;  %v2541_v36 = vld [vmem:[%s3695_s5 + $0x184] ss:$8 sps:$4 sm:$0xff]  }
 0x201   :  { %1067 = vmatpush1.bf16.msra.mxu1 %v2309_v37 }
 0x204   :  { %1069 = vmatmul.mubr.bf16.vlgmr.msra.gmra.mrb[12].mxu1 %v2947_v53 }
 0x217   :  { %v941_v41 = vpop.f32.mrb[0].mxu1 }
 0x218   :  { %v942_v42 = vadd.f32 %v941_v41, %v230_v39  ;;  %v943_v43 = vpop.f32.mrb[1].mxu1 }
 0x219   :  { %v944_v44 = vadd.f32 %v943_v43, %v234_v40  ;;  %v945_v45 = vpop.f32.mrb[2].mxu1 }
 0x21a   :  { %v2311_v46 = vmul.f32 -1.702, %v942_v42  ;;  %v946_v47 = vadd.f32 %v945_v45, %v230_v39  ;;  %v947_v48 = vpop.f32.mrb[3].mxu1  ;;  %v2539_v45 = vld [vmem:[%s3695_s5 + $0x180] ss:$8 sps:$4 sm:$0xff]  }
 0x21b   :  { %v2312_v53 = vmul.f32 -1.702, %v944_v44  ;;  %v948_v49 = vadd.f32 %v947_v48, %v234_v40  ;;  %v2544_v48 = vld [vmem:[%s3695_s5 + $0x194] ss:$8 sps:$4 sm:$0xff]  }
 0x21c   :  { %v1111_v58 = vmul.f32 1.442695, %v2311_v46  ;;  %v2319_v50 = vmul.f32 -1.702, %v946_v47 }
 0x21d   :  { %v1113_v51 = vmul.f32 1.442695, %v2312_v53  ;;  %v2320_v52 = vmul.f32 -1.702, %v948_v49 }
 0x21e   :  { %2663 = vpow2.f32 %v1111_v58  ;;  %v1127_v55 = vmul.f32 1.442695, %v2319_v50 }
 0x21f   :  { %2665 = vpow2.f32 %v1113_v51  ;;  %v1129_v56 = vmul.f32 1.442695, %v2320_v52  ;;  %v2542_v51 = vld [vmem:[%s3695_s5 + $0x190] ss:$8 sps:$4 sm:$0xff]   ;;  %v2547_v52 = vld [vmem:[%s3695_s5 + $0x1a4] ss:$8 sps:$4 sm:$0xff]  }
 0x220   :  { %2667 = vpow2.f32 %v1127_v55  ;;  %v2545_v55 = vld [vmem:[%s3695_s5 + $0x1a0] ss:$8 sps:$4 sm:$0xff]  }
 0x221   :  { %2669 = vpow2.f32 %v1129_v56  ;;  %v2550_v56 = vld [vmem:[%s3695_s5 + $0x1b4] ss:$8 sps:$4 sm:$0xff]  }
 0x228   :  { %v2664_v57 = vpop.eup %2663 }
 0x229   :  { %v2666_v54 = vpop.eup %2665  ;;  %v1143_v59 = vadd.f32 1.0, %v2664_v57  ;;  %v2548_v57 = vld [vmem:[%s3695_s5 + $0x1b0] ss:$8 sps:$4 sm:$0xff]  }
 0x22a   :  { %v2668_v60 = vpop.eup %2667  ;;  %v1144_v61 = vadd.f32 1.0, %v2666_v54 }
 0x22b   :  { %v2670_v62 = vpop.eup %2669  ;;  %2671 = vrcp.f32 %v1143_v59  ;;  %v1151_v63 = vadd.f32 1.0, %v2668_v60  ;;  %v2553_v59 = vld [vmem:[%s3695_s5 + $0x1c4] ss:$8 sps:$4 sm:$0xff]  }
 0x22c   :  { %2673 = vrcp.f32 %v1144_v61  ;;  %v1152_v0 = vadd.f32 1.0, %v2670_v62 }
 0x22d   :  { %2675 = vrcp.f32 %v1151_v63 }
 0x22e   :  { %2677 = vrcp.f32 %v1152_v0 }
 0x235   :  { %v2672_v1 = vpop.eup %2671 }
 0x236   :  { %v2674_v2 = vpop.eup %2673  ;;  %v1191_v5 = vmul.f32 %v2672_v1, %v942_v42 }
 0x237   :  { %v2676_v3 = vpop.eup %2675  ;;  %v1192_v7 = vmul.f32 %v2674_v2, %v944_v44  ;;  %v2551_v2 = vld [vmem:[%s3695_s5 + $0x1c0] ss:$8 sps:$4 sm:$0xff]  }
 0x238   :  { %v2678_v4 = vpop.eup %2677  ;;  %v1199_v6 = vmul.f32 %v2676_v3, %v946_v47 }
 0x239   :  { %v1200_v8 = vmul.f32 %v2678_v4, %v948_v49  ;;  %v2556_v4 = vld [vmem:[%s3695_s5 + $0x1d4] ss:$8 sps:$4 sm:$0xff]  }
 0x23a   :  { %v1207_v9 = vpack.c.bf16 %v1199_v6, %v1191_v5  ;;  %v2554_v5 = vld [vmem:[%s3695_s5 + $0x1d0] ss:$8 sps:$4 sm:$0xff]   ;;  %v2559_v6 = vld [vmem:[%s3695_s5 + $0x1e4] ss:$8 sps:$4 sm:$0xff]  }
 0x23b   :  { %v1208_v10 = vpack.c.bf16 %v1200_v8, %v1192_v7  ;;  %v2557_v7 = vld [vmem:[%s3695_s5 + $0x1e0] ss:$8 sps:$4 sm:$0xff]   ;;  %v2562_v8 = vld [vmem:[%s3695_s5 + $0x1f4] ss:$8 sps:$4 sm:$0xff]  }
 0x23d   :  { %2015 = vmatprep.mubr.bf16.mxu0 %v1208_v10 }
 0x23e   :  { %2016 = vmatmul.mubr.bf16.vlgmr.msra.gmra.mrb[0].mxu0 %v1207_v9 }
 0x23f   :  { %2027 = vmatpush1.bf16.msra.mxu0 %v2515_v11 }
 0x240   :  { %2028 = vmatprep.subr.bf16.mxu0 %v2520_v12  ;;  %v2560_v12 = vld [vmem:[%s3695_s5 + $0x1f0] ss:$8 sps:$4 sm:$0xff]  }
 0x243   :  { %2029 = vmatpush1.bf16.msra.mxu0 %v2518_v13 }
 0x244   :  { %2030 = vmatprep.subr.bf16.mxu0 %v2523_v14 }
 0x247   :  { %2031 = vmatpush1.bf16.msra.mxu0 %v2521_v15 }
 0x248   :  { %2032 = vmatprep.subr.bf16.mxu0 %v2526_v16  ;;  %v2565_v16 = vld [vmem:[%s3695_s5 + $0x204] ss:$8 sps:$4 sm:$0xff]  }
 0x24b   :  { %2033 = vmatpush1.bf16.msra.mxu0 %v2524_v17 }
 0x24c   :  { %2034 = vmatprep.subr.bf16.mxu0 %v2529_v18 }
 0x24f   :  { %2035 = vmatpush1.bf16.msra.mxu0 %v2527_v19 }
 0x250   :  { %2036 = vmatprep.subr.bf16.mxu0 %v2532_v20 }
 0x253   :  { %2037 = vmatpush1.bf16.msra.mxu0 %v2530_v21  ;;  %v2563_v21 = vld [vmem:[%s3695_s5 + $0x200] ss:$8 sps:$4 sm:$0xff]  }
 0x254   :  { %2038 = vmatprep.subr.bf16.mxu0 %v2535_v22  ;;  %v2568_v22 = vld [vmem:[%s3695_s5 + $0x214] ss:$8 sps:$4 sm:$0xff]  }
 0x257   :  { %v984_v29 = vpop.f32.mrb[4].mxu1  ;;  %2039 = vmatpush1.bf16.msra.mxu0 %v2533_v25  ;;  %v2569_v25 = vld [vmem:[%s3695_s5 + $0x220] ss:$8 sps:$4 sm:$0xff]  }
 0x258   :  { %v3390_v34 = vadd.f32 %v984_v29, %v238_v26  ;;  %v986_v35 = vpop.f32.mrb[5].mxu1  ;;  %2040 = vmatprep.subr.bf16.mxu0 %v2538_v27  ;;  %v2572_v27 = vld [vmem:[%s3695_s5 + $0x230] ss:$8 sps:$4 sm:$0xff]   ;;  %v2575_v29 = vld [vmem:[%s3695_s5 + $0x240] ss:$8 sps:$4 sm:$0xff]  }
 0x259   :  { %v3395_v37 = vadd.f32 %v986_v35, %v242_v28  ;;  %v988_v39 = vpop.f32.mrb[6].mxu1  ;;  %v2583_v35 = vld [vmem:[%s3695_s5 + $0x264] ss:$8 sps:$4 sm:$0xff]  }
 0x25a   :  { %v2313_v40 = vmul.f32 -1.702, %v3390_v34  ;;  %v989_v41 = vadd.f32 %v988_v39, %v238_v26  ;;  %v990_v42 = vpop.f32.mrb[7].mxu1  ;;  %v2574_v26 = vld [vmem:[%s3695_s5 + $0x234] ss:$8 sps:$4 sm:$0xff]  }
 0x25b   :  { %v2314_v43 = vmul.f32 -1.702, %v3395_v37  ;;  %v991_v44 = vadd.f32 %v990_v42, %v242_v28  ;;  %2041 = vmatpush1.bf16.msra.mxu0 %v2536_v30  ;;  %v2577_v28 = vld [vmem:[%s3695_s5 + $0x244] ss:$8 sps:$4 sm:$0xff]   ;;  %v2580_v30 = vld [vmem:[%s3695_s5 + $0x254] ss:$8 sps:$4 sm:$0xff]  }
 0x25c   :  { %v1115_v46 = vmul.f32 1.442695, %v2313_v40  ;;  %v2321_v47 = vmul.f32 -1.702, %v989_v41  ;;  %2042 = vmatprep.subr.bf16.mxu0 %v2541_v36  ;;  %v245_v36 = vsub.s32 4, %v2917_v31 }
 0x25d   :  { %v1117_v53 = vmul.f32 1.442695, %v2314_v43  ;;  %v2322_v49 = vmul.f32 -1.702, %v991_v44  ;;  %v2581_v39 = vld [vmem:[%s3695_s5 + $0x260] ss:$8 sps:$4 sm:$0xff]  }
 0x25e   :  { %2679 = vpow2.f32 %v1115_v46  ;;  %v1131_v58 = vmul.f32 1.442695, %v2321_v47  ;;  %v246_v40 = vrot.slane %v3335_v38, %v245_v36  ;;  %v2589_v47 = vld [vmem:[%s3695_s5 + $0x284] ss:$8 sps:$4 sm:$0xff]   ;;  %v2614_v36 = vld [vmem:[%s3695_s5 + $0x310] ss:$8 sps:$4 sm:$0xff]  }
 0x25f   :  { %2681 = vpow2.f32 %v1117_v53  ;;  %v1133_v50 = vmul.f32 1.442695, %v2322_v49  ;;  %2043 = vmatpush1.bf16.msra.mxu0 %v2539_v45 }
 0x260   :  { %2683 = vpow2.f32 %v1131_v58  ;;  %2044 = vmatprep.subr.bf16.mxu0 %v2544_v48 }
 0x261   :  { %2685 = vpow2.f32 %v1133_v50 }
 0x263   :  { %2045 = vmatpush1.bf16.msra.mxu0 %v2542_v51 }
 0x264   :  { %2046 = vmatprep.subr.bf16.mxu0 %v2547_v52 }
 0x267   :  { %2047 = vmatpush1.bf16.msra.mxu0 %v2545_v55  ;;  %v2587_v55 = vld [vmem:[%s3695_s5 + $0x280] ss:$8 sps:$4 sm:$0xff]  }
 0x268   :  { %v2680_v54 = vpop.eup %2679  ;;  %2048 = vmatprep.subr.bf16.mxu0 %v2550_v56 }
 0x269   :  { %v2682_v60 = vpop.eup %2681  ;;  %v1145_v61 = vadd.f32 1.0, %v2680_v54  ;;  %v2592_v54 = vld [vmem:[%s3695_s5 + $0x294] ss:$8 sps:$4 sm:$0xff]  }
 0x26a   :  { %v2684_v62 = vpop.eup %2683  ;;  %v1146_v63 = vadd.f32 1.0, %v2682_v60 }
 0x26b   :  { %v2686_v0 = vpop.eup %2685  ;;  %2687 = vrcp.f32 %v1145_v61  ;;  %v1153_v1 = vadd.f32 1.0, %v2684_v62  ;;  %2049 = vmatpush1.bf16.msra.mxu0 %v2548_v57 }
 0x26c   :  { %2689 = vrcp.f32 %v1146_v63  ;;  %v1154_v3 = vadd.f32 1.0, %v2686_v0  ;;  %2050 = vmatprep.subr.bf16.mxu0 %v2553_v59  ;;  %v2590_v63 = vld [vmem:[%s3695_s5 + $0x290] ss:$8 sps:$4 sm:$0xff]   ;;  %v2595_v0 = vld [vmem:[%s3695_s5 + $0x2a4] ss:$8 sps:$4 sm:$0xff]  }
 0x26d   :  { %2691 = vrcp.f32 %v1153_v1  ;;  %v2593_v1 = vld [vmem:[%s3695_s5 + $0x2a0] ss:$8 sps:$4 sm:$0xff]  }
 0x26e   :  { %2693 = vrcp.f32 %v1154_v3  ;;  %v2596_v3 = vld [vmem:[%s3695_s5 + $0x2b0] ss:$8 sps:$4 sm:$0xff]  }
 0x26f   :  { %2051 = vmatpush1.bf16.msra.mxu0 %v2551_v2  ;;  %v2598_v2 = vld [vmem:[%s3695_s5 + $0x2b4] ss:$8 sps:$4 sm:$0xff]  }
 0x270   :  { %2052 = vmatprep.subr.bf16.mxu0 %v2556_v4 }
 0x273   :  { %2053 = vmatpush1.bf16.msra.mxu0 %v2554_v5  ;;  %v2601_v5 = vld [vmem:[%s3695_s5 + $0x2c4] ss:$8 sps:$4 sm:$0xff]  }
 0x274   :  { %2054 = vmatprep.subr.bf16.mxu0 %v2559_v6 }
 0x275   :  { %v2688_v9 = vpop.eup %2687 }
 0x276   :  { %v2690_v10 = vpop.eup %2689  ;;  %v1193_v14 = vmul.f32 %v2688_v9, %v3390_v34  ;;  %v2578_v34 = vld [vmem:[%s3695_s5 + $0x250] ss:$8 sps:$4 sm:$0xff]  }
 0x277   :  { %v2692_v11 = vpop.eup %2691  ;;  %2055 = vmatpush1.bf16.msra.mxu0 %v2557_v7  ;;  %v1194_v17 = vmul.f32 %v2690_v10, %v3395_v37  ;;  %v249_v37 = vsub.s32 5, %v2917_v31 }
 0x278   :  { %v2694_v13 = vpop.eup %2693  ;;  %v1201_v15 = vmul.f32 %v2692_v11, %v989_v41  ;;  %2056 = vmatprep.subr.bf16.mxu0 %v2562_v8  ;;  %v2586_v41 = vld [vmem:[%s3695_s5 + $0x274] ss:$8 sps:$4 sm:$0xff]  }
 0x279   :  { %v1202_v18 = vmul.f32 %v2694_v13, %v991_v44  ;;  %v250_v42 = vrot.slane %v3335_v38, %v249_v37  ;;  %v2584_v44 = vld [vmem:[%s3695_s5 + $0x270] ss:$8 sps:$4 sm:$0xff]   ;;  %v2619_v37 = vld [vmem:[%s3695_s5 + $0x324] ss:$8 sps:$4 sm:$0xff]  }
 0x27a   :  { %v1209_v19 = vpack.c.bf16 %v1201_v15, %v1193_v14  ;;  %v2604_v14 = vld [vmem:[%s3695_s5 + $0x2d4] ss:$8 sps:$4 sm:$0xff]   ;;  %v2602_v15 = vld [vmem:[%s3695_s5 + $0x2d0] ss:$8 sps:$4 sm:$0xff]  }
 0x27b   :  { %2057 = vmatpush1.bf16.msra.mxu0 %v2560_v12  ;;  %v1210_v20 = vpack.c.bf16 %v1202_v18, %v1194_v17  ;;  %v2599_v12 = vld [vmem:[%s3695_s5 + $0x2c0] ss:$8 sps:$4 sm:$0xff]   ;;  %v2610_v18 = vld [vmem:[%s3695_s5 + $0x2f4] ss:$8 sps:$4 sm:$0xff]  }
 0x27c   :  { %2069 = vmatprep.subr.bf16.mxu0 %v2565_v16  ;;  %v2607_v16 = vld [vmem:[%s3695_s5 + $0x2e4] ss:$8 sps:$4 sm:$0xff]   ;;  %v2605_v17 = vld [vmem:[%s3695_s5 + $0x2e0] ss:$8 sps:$4 sm:$0xff]  }
 0x27d   :  { %2058 = vmatprep.mubr.bf16.mxu0 %v1210_v20 }
 0x27e   :  { %2059 = vmatmul.mubr.bf16.vlgmr.msra.gmra.mrb[0].mxu0 %v1209_v19 }
 0x27f   :  { %2070 = vmatpush1.bf16.msra.mxu0 %v2563_v21 }
 0x280   :  { %2071 = vmatprep.subr.bf16.mxu0 %v2568_v22  ;;  %v2608_v22 = vld [vmem:[%s3695_s5 + $0x2f0] ss:$8 sps:$4 sm:$0xff]  }
 0x283   :  { %2072 = vmatpush1.bf16.msra.mxu0 %v2566_v23 }
 0x284   :  { %2073 = vmatprep.subr.bf16.mxu0 %v2571_v24 }
 0x287   :  { %2074 = vmatpush1.bf16.msra.mxu0 %v2569_v25 }
 0x288   :  { %2075 = vmatprep.subr.bf16.mxu0 %v2574_v26  ;;  %v2613_v26 = vld [vmem:[%s3695_s5 + $0x304] ss:$8 sps:$4 sm:$0xff]  }
 0x28b   :  { %2076 = vmatpush1.bf16.msra.mxu0 %v2572_v27 }
 0x28c   :  { %2077 = vmatprep.subr.bf16.mxu0 %v2577_v28 }
 0x28f   :  { %2078 = vmatpush1.bf16.msra.mxu0 %v2575_v29 }
 0x290   :  { %2079 = vmatprep.subr.bf16.mxu0 %v2580_v30 }
 0x293   :  { %2080 = vmatpush1.bf16.msra.mxu0 %v2578_v34  ;;  %v2611_v34 = vld [vmem:[%s3695_s5 + $0x300] ss:$8 sps:$4 sm:$0xff]  }
 0x294   :  { %2081 = vmatprep.subr.bf16.mxu0 %v2583_v35  ;;  %v2616_v35 = vld [vmem:[%s3695_s5 + $0x314] ss:$8 sps:$4 sm:$0xff]  }
 0x297   :  { %v1027_v43 = vpop.f32.mrb[8].mxu1  ;;  %2082 = vmatpush1.bf16.msra.mxu0 %v2581_v39  ;;  %v2617_v39 = vld [vmem:[%s3695_s5 + $0x320] ss:$8 sps:$4 sm:$0xff]  }
 0x298   :  { %v3498_v45 = vadd.f32 %v1027_v43, %v246_v40  ;;  %v1029_v46 = vpop.f32.mrb[9].mxu1  ;;  %2083 = vmatprep.subr.bf16.mxu0 %v2586_v41  ;;  %v2620_v41 = vld [vmem:[%s3695_s5 + $0x330] ss:$8 sps:$4 sm:$0xff]   ;;  %v2623_v43 = vld [vmem:[%s3695_s5 + $0x340] ss:$8 sps:$4 sm:$0xff]  }
 0x299   :  { %v3503_v48 = vadd.f32 %v1029_v46, %v250_v42  ;;  %v1031_v53 = vpop.f32.mrb[10].mxu1  ;;  %v2631_v46 = vld [vmem:[%s3695_s5 + $0x364] ss:$8 sps:$4 sm:$0xff]  }
 0x29a   :  { %v2315_v49 = vmul.f32 -1.702, %v3498_v45  ;;  %v1032_v58 = vadd.f32 %v1031_v53, %v246_v40  ;;  %v1033_v50 = vpop.f32.mrb[11].mxu1  ;;  %v2622_v40 = vld [vmem:[%s3695_s5 + $0x334] ss:$8 sps:$4 sm:$0xff]  }
 0x29b   :  { %v2316_v51 = vmul.f32 -1.702, %v3503_v48  ;;  %v1034_v52 = vadd.f32 %v1033_v50, %v250_v42  ;;  %2084 = vmatpush1.bf16.msra.mxu0 %v2584_v44  ;;  %v2625_v42 = vld [vmem:[%s3695_s5 + $0x344] ss:$8 sps:$4 sm:$0xff]   ;;  %v2628_v44 = vld [vmem:[%s3695_s5 + $0x354] ss:$8 sps:$4 sm:$0xff]  }
 0x29c   :  { %v1119_v56 = vmul.f32 1.442695, %v2315_v49  ;;  %v2323_v57 = vmul.f32 -1.702, %v1032_v58  ;;  %2085 = vmatprep.subr.bf16.mxu0 %v2589_v47  ;;  %v253_v47 = vsub.s32 6, %v2917_v31 }
 0x29d   :  { %v1121_v59 = vmul.f32 1.442695, %v2316_v51  ;;  %v2324_v60 = vmul.f32 -1.702, %v1034_v52  ;;  %v2629_v53 = vld [vmem:[%s3695_s5 + $0x360] ss:$8 sps:$4 sm:$0xff]  }
 0x29e   :  { %2695 = vpow2.f32 %v1119_v56  ;;  %v1135_v61 = vmul.f32 1.442695, %v2323_v57  ;;  %v254_v49 = vrot.slane %v3335_v38, %v253_v47  ;;  %v2637_v56 = vld [vmem:[%s3695_s5 + $0x384] ss:$8 sps:$4 sm:$0xff]  }
 0x29f   :  { %2697 = vpow2.f32 %v1121_v59  ;;  %v1137_v62 = vmul.f32 1.442695, %v2324_v60  ;;  %2086 = vmatpush1.bf16.msra.mxu0 %v2587_v55 }
 0x2a0   :  { %2699 = vpow2.f32 %v1135_v61  ;;  %2087 = vmatprep.subr.bf16.mxu0 %v2592_v54 }
 0x2a1   :  { %2701 = vpow2.f32 %v1137_v62 }
 0x2a3   :  { %2088 = vmatpush1.bf16.msra.mxu0 %v2590_v63  ;;  %v2635_v63 = vld [vmem:[%s3695_s5 + $0x380] ss:$8 sps:$4 sm:$0xff]  }
 0x2a4   :  { %2089 = vmatprep.subr.bf16.mxu0 %v2595_v0 }
 0x2a7   :  { %2090 = vmatpush1.bf16.msra.mxu0 %v2593_v1 }
 0x2a8   :  { %v2696_v4 = vpop.eup %2695  ;;  %2091 = vmatprep.subr.bf16.mxu0 %v2598_v2  ;;  %v2640_v2 = vld [vmem:[%s3695_s5 + $0x394] ss:$8 sps:$4 sm:$0xff]  }
 0x2a9   :  { %v2698_v6 = vpop.eup %2697  ;;  %v1147_v7 = vadd.f32 1.0, %v2696_v4 }
 0x2aa   :  { %v2700_v8 = vpop.eup %2699  ;;  %v1148_v9 = vadd.f32 1.0, %v2698_v6 }
 0x2ab   :  { %v2702_v10 = vpop.eup %2701  ;;  %2703 = vrcp.f32 %v1147_v7  ;;  %v1155_v11 = vadd.f32 1.0, %v2700_v8  ;;  %2092 = vmatpush1.bf16.msra.mxu0 %v2596_v3  ;;  %v2638_v7 = vld [vmem:[%s3695_s5 + $0x390] ss:$8 sps:$4 sm:$0xff]   ;;  %v2643_v8 = vld [vmem:[%s3695_s5 + $0x3a4] ss:$8 sps:$4 sm:$0xff]  }
 0x2ac   :  { %2705 = vrcp.f32 %v1148_v9  ;;  %v1156_v13 = vadd.f32 1.0, %v2702_v10  ;;  %2093 = vmatprep.subr.bf16.mxu0 %v2601_v5  ;;  %v2641_v9 = vld [vmem:[%s3695_s5 + $0x3a0] ss:$8 sps:$4 sm:$0xff]   ;;  %v2646_v10 = vld [vmem:[%s3695_s5 + $0x3b4] ss:$8 sps:$4 sm:$0xff]  }
 0x2ad   :  { %2707 = vrcp.f32 %v1155_v11  ;;  %v2644_v11 = vld [vmem:[%s3695_s5 + $0x3b0] ss:$8 sps:$4 sm:$0xff]  }
 0x2ae   :  { %2709 = vrcp.f32 %v1156_v13  ;;  %v2649_v13 = vld [vmem:[%s3695_s5 + $0x3c4] ss:$8 sps:$4 sm:$0xff]  }
 0x2af   :  { %2094 = vmatpush1.bf16.msra.mxu0 %v2599_v12 }
 0x2b0   :  { %2095 = vmatprep.subr.bf16.mxu0 %v2604_v14 }
 0x2b3   :  { %2096 = vmatpush1.bf16.msra.mxu0 %v2602_v15 }
 0x2b4   :  { %2097 = vmatprep.subr.bf16.mxu0 %v2607_v16 }
 0x2b5   :  { %v2704_v19 = vpop.eup %2703 }
 0x2b6   :  { %v2706_v20 = vpop.eup %2705  ;;  %v1195_v24 = vmul.f32 %v2704_v19, %v3498_v45  ;;  %v2626_v45 = vld [vmem:[%s3695_s5 + $0x350] ss:$8 sps:$4 sm:$0xff]  }
 0x2b7   :  { %v2708_v21 = vpop.eup %2707  ;;  %2098 = vmatpush1.bf16.msra.mxu0 %v2605_v17  ;;  %v1196_v27 = vmul.f32 %v2706_v20, %v3503_v48  ;;  %v257_v48 = vsub.s32 7, %v2917_v31  ;;  %v2632_v31 = vld [vmem:[%s3695_s5 + $0x370] ss:$8 sps:$4 sm:$0xff]   ;;  %v2647_v20 = vld [vmem:[%s3695_s5 + $0x3c0] ss:$8 sps:$4 sm:$0xff]  }
 0x2b8   :  { %v2710_v23 = vpop.eup %2709  ;;  %v1203_v25 = vmul.f32 %v2708_v21, %v1032_v58  ;;  %2099 = vmatprep.subr.bf16.mxu0 %v2610_v18  ;;  %v2634_v58 = vld [vmem:[%s3695_s5 + $0x374] ss:$8 sps:$4 sm:$0xff]  }
 0x2b9   :  { %v1204_v28 = vmul.f32 %v2710_v23, %v1034_v52  ;;  %v258_v50 = vrot.slane %v3335_v38, %v257_v48  ;;  %v2650_v23 = vld [vmem:[%s3695_s5 + $0x3d0] ss:$8 sps:$4 sm:$0xff]  }
 0x2ba   :  { %v1211_v29 = vpack.c.bf16 %v1203_v25, %v1195_v24  ;;  %v2655_v24 = vld [vmem:[%s3695_s5 + $0x3e4] ss:$8 sps:$4 sm:$0xff]   ;;  %v2653_v25 = vld [vmem:[%s3695_s5 + $0x3e0] ss:$8 sps:$4 sm:$0xff]  }
 0x2bb   :  { %2100 = vmatpush1.bf16.msra.mxu0 %v2608_v22  ;;  %v1212_v30 = vpack.c.bf16 %v1204_v28, %v1196_v27  ;;  %v2652_v22 = vld [vmem:[%s3695_s5 + $0x3d4] ss:$8 sps:$4 sm:$0xff]  }
 0x2bc   :  { %2112 = vmatprep.subr.bf16.mxu0 %v2613_v26  ;;  %v2658_v26 = vld [vmem:[%s3695_s5 + $0x3f4] ss:$8 sps:$4 sm:$0xff]  }
 0x2bd   :  { %2101 = vmatprep.mubr.bf16.mxu0 %v1212_v30  ;;  %v2656_v30 = vld [vmem:[%s3695_s5 + $0x3f0] ss:$8 sps:$4 sm:$0xff]  }
 0x2be   :  { %2102 = vmatmul.mubr.bf16.vlgmr.msra.gmra.mrb[0].mxu0 %v1211_v29 }
 0x2bf   :  { %2113 = vmatpush1.bf16.msra.mxu0 %v2611_v34 }
 0x2c0   :  { %2114 = vmatprep.subr.bf16.mxu0 %v2616_v35 }
 0x2c3   :  { %2115 = vmatpush1.bf16.msra.mxu0 %v2614_v36 }
 0x2c4   :  { %2116 = vmatprep.subr.bf16.mxu0 %v2619_v37 }
 0x2c7   :  { %2117 = vmatpush1.bf16.msra.mxu0 %v2617_v39 }
 0x2c8   :  { %2118 = vmatprep.subr.bf16.mxu0 %v2622_v40 }
 0x2cb   :  { %2119 = vmatpush1.bf16.msra.mxu0 %v2620_v41 }
 0x2cc   :  { %2120 = vmatprep.subr.bf16.mxu0 %v2625_v42  ;;  %v2159_v42 = vld [vmem:[%s3697_s6] sm:$0x3] }
 0x2cf   :  { %2121 = vmatpush1.bf16.msra.mxu0 %v2623_v43  ;;  %v2164_v43 = vrot.slane %v2159_v42, %v2923_v33  ;;  %v2729_v33 = vld [vmem:[%s3691_s0 + $0x10] sm:$0xff] }
 0x2d0   :  { %2122 = vmatprep.subr.bf16.mxu0 %v2628_v44 }
 0x2d3   :  { %2123 = vmatpush1.bf16.msra.mxu0 %v2626_v45  ;;  %v2168_v45 = vrot.slane %v2159_v42, %v2920_v32 }
 0x2d4   :  { %2124 = vmatprep.subr.bf16.mxu0 %v2631_v46  ;;  %v2727_v46 = vld [vmem:[%s3691_s0] sm:$0xff] }
 0x2d7   :  { %v1070_v51 = vpop.f32.mrb[12].mxu1  ;;  %2125 = vmatpush1.bf16.msra.mxu0 %v2629_v53  ;;  %v2728_v53 = vld [vmem:[%s3691_s0 + $0x8] sm:$0xff] }
 0x2d8   :  { %v3606_v52 = vadd.f32 %v1070_v51, %v254_v49  ;;  %v1072_v55 = vpop.f32.mrb[13].mxu1  ;;  %2126 = vmatprep.subr.bf16.mxu0 %v2634_v58 }
 0x2d9   :  { %v3611_v57 = vadd.f32 %v1072_v55, %v258_v50  ;;  %v1074_v54 = vpop.f32.mrb[14].mxu1 }
 0x2da   :  { %v2317_v59 = vmul.f32 -1.702, %v3606_v52  ;;  %v1075_v38 = vadd.f32 %v1074_v54, %v254_v49  ;;  %v1076_v60 = vpop.f32.mrb[15].mxu1 }
 0x2db   :  { %v2318_v61 = vmul.f32 -1.702, %v3611_v57  ;;  %v1077_v62 = vadd.f32 %v1076_v60, %v258_v50  ;;  %2127 = vmatpush1.bf16.msra.mxu0 %v2632_v31 }
 0x2dc   :  { %v1123_v0 = vmul.f32 1.442695, %v2317_v59  ;;  %v2325_v1 = vmul.f32 -1.702, %v1075_v38  ;;  %2128 = vmatprep.subr.bf16.mxu0 %v2637_v56 }
 0x2dd   :  { %v1125_v3 = vmul.f32 1.442695, %v2318_v61  ;;  %v2326_v4 = vmul.f32 -1.702, %v1077_v62 }
 0x2de   :  { %2711 = vpow2.f32 %v1123_v0  ;;  %v1139_v5 = vmul.f32 1.442695, %v2325_v1 }
 0x2df   :  { %2713 = vpow2.f32 %v1125_v3  ;;  %v1141_v6 = vmul.f32 1.442695, %v2326_v4  ;;  %2129 = vmatpush1.bf16.msra.mxu0 %v2635_v63 }
 0x2e0   :  { %2715 = vpow2.f32 %v1139_v5  ;;  %2130 = vmatprep.subr.bf16.mxu0 %v2640_v2 }
 0x2e1   :  { %2717 = vpow2.f32 %v1141_v6 }
 0x2e3   :  { %2131 = vmatpush1.bf16.msra.mxu0 %v2638_v7 }
 0x2e4   :  { %2132 = vmatprep.subr.bf16.mxu0 %v2643_v8 }
 0x2e7   :  { %2133 = vmatpush1.bf16.msra.mxu0 %v2641_v9 }
 0x2e8   :  { %v2712_v12 = vpop.eup %2711  ;;  %2134 = vmatprep.subr.bf16.mxu0 %v2646_v10 }
 0x2e9   :  { %v2714_v14 = vpop.eup %2713  ;;  %v1149_v15 = vadd.f32 1.0, %v2712_v12 }
 0x2ea   :  { %v2716_v16 = vpop.eup %2715  ;;  %v1150_v17 = vadd.f32 1.0, %v2714_v14 }
 0x2eb   :  { %v2718_v18 = vpop.eup %2717  ;;  %2719 = vrcp.f32 %v1149_v15  ;;  %v1157_v19 = vadd.f32 1.0, %v2716_v16  ;;  %2135 = vmatpush1.bf16.msra.mxu0 %v2644_v11 }
 0x2ec   :  { %2721 = vrcp.f32 %v1150_v17  ;;  %v1158_v21 = vadd.f32 1.0, %v2718_v18  ;;  %2136 = vmatprep.subr.bf16.mxu0 %v2649_v13 }
 0x2ed   :  { %2723 = vrcp.f32 %v1157_v19 }
 0x2ee   :  { %2725 = vrcp.f32 %v1158_v21 }
 0x2ef   :  { %2137 = vmatpush1.bf16.msra.mxu0 %v2647_v20 }
 0x2f0   :  { %2138 = vmatprep.subr.bf16.mxu0 %v2652_v22 }
 0x2f3   :  { %2139 = vmatpush1.bf16.msra.mxu0 %v2650_v23 }
 0x2f4   :  { %2140 = vmatprep.subr.bf16.mxu0 %v2655_v24 }
 0x2f5   :  { %v2720_v27 = vpop.eup %2719 }
 0x2f6   :  { %v2722_v28 = vpop.eup %2721  ;;  %v1197_v35 = vmul.f32 %v2720_v27, %v3606_v52  ;;  %v2730_v52 = vld [vmem:[%s3691_s0 + $0x18] sm:$0xff] }
 0x2f7   :  { %v2724_v29 = vpop.eup %2723  ;;  %2141 = vmatpush1.bf16.msra.mxu0 %v2653_v25  ;;  %v1198_v37 = vmul.f32 %v2722_v28, %v3611_v57 }
 0x2f8   :  { %v2726_v34 = vpop.eup %2725  ;;  %v1205_v36 = vmul.f32 %v2724_v29, %v1075_v38  ;;  %2142 = vmatprep.subr.bf16.mxu0 %v2658_v26 }
 0x2f9   :  { %v1206_v39 = vmul.f32 %v2726_v34, %v1077_v62 }
 0x2fa   :  { %v1213_v40 = vpack.c.bf16 %v1205_v36, %v1197_v35 }
 0x2fb   :  { %2143 = vmatpush1.bf16.msra.mxu0 %v2656_v30  ;;  %v1214_v41 = vpack.c.bf16 %v1206_v39, %v1198_v37 }
 0x2fd   :  { %2144 = vmatprep.mubr.bf16.mxu0 %v1214_v41 }
 0x2fe   :  { %2145 = vmatmul.mubr.bf16.vlgmr.msra.gmra.mrb[0].mxu0 %v1213_v40 }
 0x3d1   :  { %v2146_v44 = vpop.f32.mrb[0].mxu0 }
 0x3d2   :  { %v2155_v47 = vadd.f32 %v2727_v46, %v2146_v44  ;;  %v2148_v48 = vpop.f32.mrb[1].mxu0 }
 0x3d3   :  { %v2156_v49 = vadd.f32 %v2728_v53, %v2148_v48  ;;  %v2150_v58 = vpop.f32.mrb[2].mxu0 }
 0x3d4   :  { %v2171_v50 = vadd.f32 %v2164_v43, %v2155_v47  ;;  %v2157_v51 = vadd.f32 %v2729_v33, %v2150_v58  ;;  %v2152_v31 = vpop.f32.mrb[3].mxu0 }
 0x3d5   :  { %v2172_v32 = vadd.f32 %v2168_v45, %v2156_v49  ;;  %v2158_v55 = vadd.f32 %v2730_v52, %v2152_v31 }
 0x3d6   :  { %2175 = vst [vmem:[%s3698_s7] sm:$0xff] %v2171_v50  ;;  %v2173_v56 = vadd.f32 %v2164_v43, %v2157_v51 }
 0x3d7   :  { %2176 = vst [vmem:[%s3698_s7 + $0x8] sm:$0xff] %v2172_v32  ;;  %v2174_v57 = vadd.f32 %v2168_v45, %v2158_v55 }
 0x3d8   :  { %2177 = vst [vmem:[%s3698_s7 + $0x10] sm:$0xff] %v2173_v56 }
 0x3d9   :  { %2178 = vst [vmem:[%s3698_s7 + $0x18] sm:$0xff] %v2174_v57 }

</bundles_post_ra>
